<compile_context>
chip_gen: v7x
topology: tpu7x:2x2x1
jax: 0.10.0
libtpu: 0.0.40
codegen_flags: <defaults>
</compile_context>

<pallas_src>
import numpy as np
import jax
import jax.numpy as jnp
from jax.experimental import pallas as pl
from jax.experimental.pallas import tpu as pltpu

# Small, deterministic configuration (original: size=128, J=6, L=4).
J = 3
L = 4
SIZE = 32
# TODO(synk): WaveletsMorlet is not provided; use the usual dyadic cut sizes size/2^j.
FILTER_SIZES = [SIZE // (2 ** j) for j in range(J)]   # [32, 16, 8]
PRIMARY_IDX = 2
P = FILTER_SIZES[PRIMARY_IDX]                         # primary filter spatial size (8)


# ----------------------- parameter-independent setup (glue) -----------------------

def _resize_matrix(s_out, s_in):
    """Bilinear resize matrix, F.interpolate(mode='bilinear', align_corners=False).
    # TODO(synk): torchvision Resize may apply antialias when downsampling; we match
    # plain bilinear (antialias=False) semantics here."""
    R = np.zeros((s_out, s_in), dtype=np.float64)
    scale = s_in / s_out
    for o in range(s_out):
        src = max((o + 0.5) * scale - 0.5, 0.0)
        i0 = min(int(np.floor(src)), s_in - 1)
        i1 = min(i0 + 1, s_in - 1)
        lam = src - i0
        R[o, i0] += 1.0 - lam
        R[o, i1] += lam
    return R


def _rotation_matrix(s, theta):
    """Dense (s*s, s*s) matrix implementing
    F.grid_sample(x, F.affine_grid([[cos,-sin,0],[sin,cos,0]], x.size()))
    with bilinear sampling, zeros padding, align_corners=False."""
    coords = (2.0 * np.arange(s) + 1.0) / s - 1.0        # normalized pixel centers
    ys, xs = np.meshgrid(coords, coords, indexing="ij")  # ys[h,w]=y_h, xs[h,w]=x_w
    gx = np.cos(theta) * xs - np.sin(theta) * ys         # sampling x (width) coord
    gy = np.sin(theta) * xs + np.cos(theta) * ys         # sampling y (height) coord
    ix = ((gx + 1.0) * s - 1.0) / 2.0
    iy = ((gy + 1.0) * s - 1.0) / 2.0
    x0 = np.floor(ix).astype(np.int64); x1 = x0 + 1
    y0 = np.floor(iy).astype(np.int64); y1 = y0 + 1
    wx1 = ix - x0; wx0 = 1.0 - wx1
    wy1 = iy - y0; wy0 = 1.0 - wy1
    M = np.zeros((s * s, s * s), dtype=np.float64)
    p = np.arange(s * s)
    for xi, yi, w in ((x0, y0, wx0 * wy0), (x1, y0, wx1 * wy0),
                      (x0, y1, wx0 * wy1), (x1, y1, wx1 * wy1)):
        valid = ((xi >= 0) & (xi < s) & (yi >= 0) & (yi < s)).reshape(-1)
        q = (yi * s + xi).reshape(-1)
        np.add.at(M, (p[valid], q[valid]), w.reshape(-1)[valid])
    return M


def _choose_tiling(n, pp, itemsize, budget_bytes=8 << 20, min_tiles=2):
    """Pick (tile_n, n_padded) for the fused RHS.

    Each (pp, tile_n) operator tile stays <= budget_bytes so a double-buffered stream
    (2 tiles + x + out) fits well inside scoped VMEM on v5e/v6e and inside v7x's smaller
    per-TC 64 MiB VMEM (at the real SIZE=128 / PP=1024 bf16 config this gives tile_n=4096,
    i.e. 2 x 8 MiB buffers).  tile_n is a multiple of 128 so loads/stores stay unmasked.
    Whenever N permits we force >= min_tiles grid steps so the "parallel" grid axis shards
    the HBM stream across v7x's two TensorCores (neutral on single-TC v5e/v6e)."""
    n_aligned = ((n + 127) // 128) * 128
    max_cols = max(128, (budget_bytes // (pp * itemsize)) // 128 * 128)
    k = pl.cdiv(n_aligned, max_cols)
    if n_aligned >= min_tiles * 128:
        k = max(k, min_tiles)
    tile_n = ((pl.cdiv(n_aligned, k) + 127) // 128) * 128
    n_padded = pl.cdiv(n_aligned, tile_n) * tile_n
    return tile_n, n_padded


# ------------------------------ Pallas kernel ------------------------------

def _fused_filters_kernel(x_ref, c_ref, out_ref):
    """Grid axis = independent N-tiles of the fused RHS (parallel).
    x_ref:   (2, P*P)  bf16   row 0 = flat mags, row 1 = flat phases
    c_ref:   (P*P, TN) bf16   fused (resize @ rotation)^T columns for this tile
    out_ref: (2, TN)   f32    row 0 = real, row 1 = imag of mags*exp(i*phases)
    """
    rot = jnp.dot(x_ref[...], c_ref[...],
                  preferred_element_type=jnp.float32)      # (2, TN) bf16 MXU, f32 accum
    mags = rot[0:1, :]
    phases = rot[1:2, :]
    trig = jnp.concatenate([jnp.cos(phases), jnp.sin(phases)], axis=0)   # (2, TN)
    out_ref[...] = mags * trig                              # single unmasked full-block store


def _fused_forward(x_flat, c_all, tile_n):
    pp = x_flat.shape[-1]
    n_padded = c_all.shape[-1]
    grid = (n_padded // tile_n,)
    return pl.pallas_call(
        _fused_filters_kernel,
        out_shape=jax.ShapeDtypeStruct((2, n_padded), jnp.float32),
        grid_spec=pltpu.PrefetchScalarGridSpec(
            num_scalar_prefetch=0,
            grid=grid,
            in_specs=[
                pl.BlockSpec((2, pp), lambda n: (0, 0)),
                pl.BlockSpec((pp, tile_n), lambda n: (0, n)),
            ],
            out_specs=pl.BlockSpec((2, tile_n), lambda n: (0, n)),
        ),
        compiler_params=pltpu.CompilerParams(
            dimension_semantics=("parallel",),
            # v5e's default scoped VMEM is 16 MiB; the enlarged double-buffered bf16 tiles
            # (~17 MiB at SIZE=128) need a raised limit there.  Actual usage stays far under
            # v7x's 64 MiB physical per-TC VMEM, so this is safe on all generations.
            vmem_limit_bytes=64 << 20),
    )(x_flat, c_all)


# ------------------------------ module wrapper ------------------------------

class AdaptiveScalingFiltersPallas:
    def __init__(self, key):
        k1, k2 = jax.random.split(key)
        # deterministic synthetic parameters (mags >= 0, phases in [-pi, pi])
        self.primary_filter_mags = jax.random.uniform(k1, (P, P), jnp.float32)
        self.primary_filter_phases = jax.random.uniform(
            k2, (P, P), jnp.float32, minval=-np.pi, maxval=np.pi)

        # Fold resize + rotation into one linear map per (j, l) and concatenate all of them
        # into a single lane-dense RHS (shape-only setup; independent of the parameters).
        pp = P * P
        blocks, starts = [], []
        off = 0
        for j in range(J):
            s = FILTER_SIZES[j]
            R = _resize_matrix(s, P)
            rrt = np.kron(R, R).T                               # (P*P, s*s)
            starts.append(off)
            for l in range(L):
                M = _rotation_matrix(s, np.pi * l / L)
                blocks.append((rrt @ M.T).astype(np.float32))   # (P*P, s*s)
                off += s * s
        n = off                                                  # sum_j L*s_j^2
        self._n = n
        self._starts = starts
        self._tile_n, n_padded = _choose_tiling(n, pp, itemsize=2)   # bf16 operator bytes
        c_all = np.zeros((pp, n_padded), dtype=np.float32)           # zero-pad extra columns
        c_all[:, :n] = np.concatenate(blocks, axis=1)
        # Stream the (4-tap bilinear) operator as bf16: halves HBM traffic of the purely
        # bandwidth-bound kernel; weights are interpolation products in [0,1].
        self._c_all = jnp.asarray(c_all).astype(jnp.bfloat16)

    def forward(self):
        x_flat = jnp.stack([self.primary_filter_mags.reshape(-1),
                            self.primary_filter_phases.reshape(-1)],
                           axis=0).astype(jnp.bfloat16)                        # (2, P*P)
        out = _fused_forward(x_flat, self._c_all, self._tile_n)                # (2, N_pad) f32
        real, imag = out[0], out[1]
        filters_cut = []
        for j in range(J):
            s = FILTER_SIZES[j]
            start = self._starts[j]
            re = real[start:start + L * s * s].reshape(L, s, s)
            im = imag[start:start + L * s * s].reshape(L, s, s)
            # torch.fft.fftshift with default dim shifts ALL axes (incl. the L axis); applying
            # it after the elementwise complex combine is equivalent to the reference order.
            filters_cut.append(jnp.fft.fftshift(re + 1j * im))
        self.filters_cut = filters_cut
        return filters_cut


if __name__ == "__main__":
    key = jax.random.PRNGKey(0)
    model = AdaptiveScalingFiltersPallas(key)
    filters = model.forward()
    filters = jax.block_until_ready(filters)

    # sanity check: at the primary scale, resize is identity and the l=0 rotation
    # (which lands at index L//2 after the fftshift over the L axis) must reproduce
    # fftshift(mags * exp(i * phases)).  Tolerance relaxed for the bf16 operator/input
    # stream (f32 MXU accumulation keeps the error ~1e-2).
    ref = jnp.fft.fftshift(model.primary_filter_mags *
                           jnp.exp(1j * model.primary_filter_phases))
    got = filters[PRIMARY_IDX][L // 2]
    assert got.shape == (P, P)
    assert all(f.shape == (L, s, s) for f, s in zip(filters, FILTER_SIZES))
    assert jnp.allclose(got, ref, atol=2e-2), float(jnp.max(jnp.abs(got - ref)))

    print("KERNEL_OK")
</pallas_src>

<mosaic_0001>
module attributes {stable_mosaic.version = 11 : i64} {
  func.func @_fused_filters_kernel(%arg0: i32, %arg1: memref<2x64xbf16, #tpu.memory_space<vmem>>, %arg2: memref<64x2688xbf16, #tpu.memory_space<vmem>>, %arg3: memref<2x2688xf32, #tpu.memory_space<vmem>>) attributes {dimension_semantics = [#tpu.dimension_semantics<parallel>], iteration_bounds = array<i64: 2>, scalar_prefetch = 0 : i64, scratch_operands = 0 : i64, tpu.core_type = #tpu.core_type<tc>, window_params = [{pipeline_mode = #tpu.pipeline_mode<synchronous>, transform_indices = @transform_0, window_bounds = array<i64: 2, 64>}, {transform_indices = @transform_1, window_bounds = array<i64: 64, 2688>}, {transform_indices = @transform_2, window_bounds = array<i64: 2, 2688>}]} {
    %c0 = arith.constant 0 : index
    %c0_0 = arith.constant 0 : index
    %0 = vector.load %arg1[%c0, %c0_0] : memref<2x64xbf16, #tpu.memory_space<vmem>>, vector<2x64xbf16>
    %c0_1 = arith.constant 0 : index
    %c0_2 = arith.constant 0 : index
    %1 = vector.load %arg2[%c0_1, %c0_2] : memref<64x2688xbf16, #tpu.memory_space<vmem>>, vector<64x2688xbf16>
    %cst = arith.constant dense<0.000000e+00> : vector<2x2688xf32>
    %2 = tpu.matmul %0, %1, %cst {dimension_numbers = #tpu.dot_dimension_numbers<[1], [0], [0], [1], [0, 0, 1, 1], [], []>} : vector<2x64xbf16>, vector<64x2688xbf16>, vector<2x2688xf32> -> vector<2x2688xf32>
    %3 = vector.extract_strided_slice %2 {offsets = [0, 0], sizes = [1, 2688], strides = [1, 1]} : vector<2x2688xf32> to vector<1x2688xf32>
    %4 = vector.extract_strided_slice %2 {offsets = [1, 0], sizes = [1, 2688], strides = [1, 1]} : vector<2x2688xf32> to vector<1x2688xf32>
    %5 = math.cos %4 : vector<1x2688xf32>
    %6 = math.sin %4 : vector<1x2688xf32>
    %7 = tpu.concatenate %5, %6 in 0 : vector<1x2688xf32>, vector<1x2688xf32> -> vector<2x2688xf32>
    %8 = vector.broadcast %3 : vector<1x2688xf32> to vector<2x2688xf32>
    %9 = arith.mulf %8, %7 : vector<2x2688xf32>
    %c0_3 = arith.constant 0 : index
    %c0_4 = arith.constant 0 : index
    %10 = vector.load %arg3[%c0_3, %c0_4] : memref<2x2688xf32, #tpu.memory_space<vmem>>, vector<2x2688xf32>
    tpu.vector_store %arg3[%c0_3, %c0_4], %9 {strides = array<i32>} : memref<2x2688xf32, #tpu.memory_space<vmem>>, vector<2x2688xf32>,
    return
  }
  func.func @transform_0(%arg0: i32) -> (i32, i32) {
    %c0_i32 = arith.constant 0 : i32
    %c0_i32_0 = arith.constant 0 : i32
    %c0_i32_1 = arith.constant 0 : i32
    return %c0_i32, %c0_i32_0 : i32, i32
  }
  func.func @transform_1(%arg0: i32) -> (i32, i32) {
    %c0_i32 = arith.constant 0 : i32
    %c0_i32_0 = arith.constant 0 : i32
    return %c0_i32, %arg0 : i32, i32
  }
  func.func @transform_2(%arg0: i32) -> (i32, i32) {
    %c0_i32 = arith.constant 0 : i32
    %c0_i32_0 = arith.constant 0 : i32
    return %c0_i32, %arg0 : i32, i32
  }
}

</mosaic_0001>

<bundles_post_ra>
// kernel: tpu_custom_call.1
= control target key start
LH: loop header
LB: loop body
LE: loop exit
PB: predicated region body
PF: predicated region fallthrough
CT: control target
= control target key end

     0   :  { %7 = vsyncpa [#allocation3], 0  ;;  %s9291_s0 = inlined_call_operand.hbm [shape: bf16[2,64], index: 0, kind: input, shape index: {}]   ;;  %s9292_s1 = inlined_call_operand.hbm [shape: bf16[64,5376], index: 1, kind: input, shape index: {}]   ;;  %s9293_s2 = inlined_call_operand.hbm [shape: f32[2,5376], index: 2, kind: output, shape index: {}]  }
   0x1   :  { %8 = vsyncpa [#allocation6], 0 }
   0x2   :  { %10 = vsyncpa [#allocation6 + $0x1], 0 }
   0x3   :  { %11 = vsyncpa [#allocation4], 0 }
   0x4   :  { %13 = vsyncpa [#allocation4 + $0x1], 0  ;;  %s6723_s9 = smov 0   ;;  %s6725_s10 = smov 0  }
   0x5   :  { %s6727_s11 = smov 0   ;;  %s6729_s12 = smov 0  }
   0x6 LB: > { %s6744_s13 = sadd.s32 4294967295, %s6690_s12   ;;  %s5904_s14 = sadd.s32 4294967294, %s6690_s12   ;;  %s6690_s12 = sphi %s6729_s12, %s9352_s12   ;;  %s6686_s11 = sphi %s6727_s11, %s9351_s11   ;;  %s6682_s10 = sphi %s6725_s10, %s9350_s10   ;;  %s6678_s9 = sphi %s6723_s9, %s9349_s9  }
   0x7   : > { %s6748_s15 = sadd.s32 1, %s6690_s12   ;;  %s47_s16 = sadd.s32 1, %s6686_s11 }
   0x8   : > { %s44_s17 = ssub.s32 %s6690_s12, %s6748_s15  ;;  %p54_p0 = scmp.ne.s32.totalorder %s6686_s11, %s6682_s10 }
   0x9   : > { %p45_p1 = scmp.eq.s32.totalorder %s44_s17, 0  ;;  %p55_p2 = scmp.eq.s32.totalorder %s6690_s12, 0 }
   0xa   : > { %p60_p3 = scmp.ne.s32.totalorder %s6682_s10, %s6678_s9  ;;  %p9294_p4 = scmp.eq.s32.totalorder %s6744_s13, 0 }
   0xb   : > { %s6760_s18 = scalar_select %p45_p1, %s6686_s11, %s47_s16  }
   0xc   : > { %p6762_p5 = por %p55_p2, %p54_p0  ;;  %p6768_p6 = por %p9294_p4, %p60_p3 }
   0xd   : > { %p84_p7 = scmp.eq.s32.totalorder %s6744_s13, 1  ;;  %p90_p8 = scmp.eq.s32.totalorder %s5904_s14, 1 }
   0xe   : > { %s9300_s20 = scalar_select %p6768_p6, 1, 0 }
   0xf   : > { %p5905_p9 = scmp.ge.s32.totalorder %s6690_s12, 1  ;;  %p97_p10 = scmp.lt.s32.totalorder %s6690_s12, 3 }
  0x10   : > { %p6775_p11 = por %p84_p7, %p54_p0  ;;  %p6779_p12 = por %p90_p8, %p60_p3 }
  0x11   : > { %p6783_p13 = pnand %p5905_p9, %p97_p10  ;;  %s6692_s24 = smov [#allocation2]  }
  0x12   : > { %s9301_s21 = scalar_select %p6775_p11, 1, 0 }
  0x13   : > { %s9302_s22 = scalar_select %p6779_p12, 1, 0 }
  0x14   : > { %s9303_s23 = scalar_select %p6783_p13, 1, 0 }
  0x15   : > { %p6292_p2 = pneg %p6783_p13  ;;  %s110_s25 = sshll.u32 %s6692_s24, 4  ;;  %s111_s25 = int_to_ptr.vmem [resolvable:$true] %s110_s25 }
  0x16   : > { %p6305_p4 = scmp.lt.s32.totalorder %s6690_s12, 2  ;;  %p9304_p0 = scmp.eq.s32.totalorder %s6744_s13, 0 }
  0x17   : > { %s121_s27 = sand.u32 1, %s6686_s11   ;;  %s6562_s4 = scalar_lea.hbm %s9291_s0, 16 }
  0x18   : > { %p6793_p7 = pnand %p6292_p2, %p9304_p0  ;;  %p6800_p3 = pnand %p6305_p4, %p6762_p5 }
  0x19   : > { %s6197_s29 = smul.u32 672, %s121_s27  ;;  %p6563_p8 = scmp.ne.s32.totalorder %s9291_s0, %s6562_s4 }
  0x1a   : > { %s9306_s28 = scalar_select %p6800_p3, 1, 0 }
  0x1b   : > { %p6564_p9 = pneg %p6793_p7  ;;  %p6569_p4 = scmp.lt.u32.totalorder %s6562_s4, %s9291_s0 }
  0x1d   : > { %p6565_p10 = pnand %p6564_p9, %p6563_p8 }
  0x1f   : > { %p6566_p2 = pneg %p6565_p10 }
  0x21   : > { %p6571_p5 = pnand %p6569_p4, %p6566_p2 }
  0x23   : > { %6574 = shalt.err (!%p6571_p5)
}
  0x24   : > { %s6575_s14 = scalar_lea.vmem %s111_s25, 16  ;;  %s6582_s16 = scalar_lea.vmem %s111_s25, 32 }
  0x25   : > { %p6576_p0 = scmp.ne.s32.totalorder %s111_s25, %s6575_s14  ;;  %p6583_p11 = scmp.lt.s32.totalorder %s111_s25, %s111_s25 }
  0x26   : > { %p6584_p6 = scmp.lt.s32.totalorder %s6582_s16, %s6575_s14 }
  0x27   : > { %p6578_p1 = pnand %p6576_p0, %p6564_p9 }
  0x28   : > { %p6585_p13 = por %p6584_p6, %p6583_p11 }
  0x29   : > { %p6579_p12 = pneg %p6578_p1 }
  0x2b   : > { %p6586_p3 = pnand %p6585_p13, %p6579_p12 }
  0x2d   : > { %6589 = shalt.err (!%p6586_p3)
}
  0x2e   : > { %6295 = dma.hbm_to_vmem [thread:$0]  (!%p6793_p7), %s9291_s0, 16, %s111_s25, [#allocation3]  }
  0x2f   : > { %s6178_s24 = smul.u32 1344, %s6690_s12  ;;  %s125_s30 = scalar_lea.vmem [#allocation5], %s6197_s29 }
  0x30   : > { %s132_s3 = sshll.u32 %s125_s30, 4  ;;  %s6828_s26 = scalar_lea.sflag [#allocation6], %s121_s27  ;;  %s6821_s3 = int_to_ptr.vmem [resolvable:$true] %s132_s3 }
  0x31   : > { %s6826_s6 = scalar_lea.hbm %s9292_s1, %s6178_s24  ;;  %p9307_p11 = scmp.ne.s32.totalorder %s9306_s28, 0 }
  0x32   : > { %s6590_s7 = scalar_lea.hbm %s6826_s6, 10752  ;;  %s6595_s8 = scalar_lea.hbm %s9292_s1, 21504 }
  0x33   : > { %p6591_p6 = scmp.ne.s32.totalorder %s6826_s6, %s6590_s7  ;;  %p6592_p12 = pneg %p9307_p11 }
  0x34   : > { %p6596_p7 = scmp.lt.u32.totalorder %s6826_s6, %s9292_s1  ;;  %p6597_p3 = scmp.lt.u32.totalorder %s6595_s8, %s6590_s7 }
  0x35   : > { %p6593_p13 = pnand %p6592_p12, %p6591_p6  ;;  %p6599_p9 = scmp.lt.u32.totalorder %s6590_s7, %s6826_s6 }
  0x36   : > { %p6598_p8 = por %p6597_p3, %p6596_p7 }
  0x37   : > { %p6594_p1 = pneg %p6593_p13 }
  0x38   : > { %p6600_p10 = por %p6599_p9, %p6598_p8 }
  0x3a   : > { %p6601_p2 = pnand %p6600_p10, %p6594_p1 }
  0x3c   : > { %6604 = shalt.err (!%p6601_p2)
}
  0x3d   : > { %s6605_s27 = scalar_lea.vmem %s6821_s3, 10752  ;;  %s6693_s17 = smov [#allocation5]  }
  0x3e   : > { %p6606_p4 = scmp.ne.s32.totalorder %s6821_s3, %s6605_s27  ;;  %s6610_s19 = sshll.u32 %s6693_s17, 4  ;;  %s6611_s19 = int_to_ptr.vmem [resolvable:$false] %s6610_s19 }
  0x3f   : > { %s6612_s24 = scalar_lea.vmem %s6611_s19, 21504  ;;  %p6613_p6 = scmp.lt.s32.totalorder %s6821_s3, %s6611_s19 }
  0x40   : > { %p6608_p5 = pnand %p6606_p4, %p6592_p12  ;;  %p6614_p13 = scmp.lt.s32.totalorder %s6612_s24, %s6605_s27 }
  0x42   : > { %p6609_p0 = pneg %p6608_p5  ;;  %p6615_p7 = por %p6614_p13, %p6613_p6 }
  0x44   : > { %p6616_p3 = pnand %p6615_p7, %p6609_p0 }
  0x46   : > { %6619 = shalt.err (!%p6616_p3)
}
  0x47   : > { %s6694_s30 = smov 2688   ;;  %s6695_s4 = smov 1344  }
  0x48   : > { %s6696_s5 = smov 84   ;;  %p9308_p12 = scmp.ne.s32.totalorder %s9303_s23, 0 }
  0x49   : > { %6299 = dma.hbm_to_vmem [thread:$0]  (!%p9307_p11), %s6826_s6, 10752, %s6821_s3, %s6828_s26, %s6694_s30, %s6695_s4, %s6696_s5  }
  0x4a   : > { %144 = sbr.rel (%p9308_p12) target bundleno = 947 (0x3b3), region = 28  ;;  %p9309_p1 = scmp.eq.s32.totalorder (!%p9308_p12), %s6744_s13, 0 }
  0x51   : > { %6665 = dma.done.wait (%p9309_p1), [#allocation3], 16   ;;  %p9310_p8 = pmov %p9309_p1 }
  0x52   : > { %s6863_s7 = sand.u32 1, %s6682_s10   ;;  %p9311_p11 = scmp.ne.s32.totalorder %s9300_s20, 0 }
  0x53   : > { %6667 = vsyncadd (%p9310_p8), [#allocation3], 4294967280  ;;  %s6198_s25 = smul.u32 672, %s6863_s7  ;;  %s151_s29 = scalar_lea.sflag [#allocation6], %s6863_s7 }
  0x55   : > { %s6867_s8 = scalar_lea.vmem [#allocation5], %s6198_s25 }
  0x56   : > { %6669 = dma.done.wait (%p9311_p11), %s151_s29, 10752  }
  0x57   : > { %6671 = vsyncadd (%p9311_p11), %s151_s29, 4294956544  ;;  %v6697_v0 = vmov 0   ;;  %v6354_v1 = vld [vmem:[%s6867_s8 + $0x4] ss:$84 sps:$4 sm:$0xff]   ;;  %v6356_v2 = vld [vmem:[%s6867_s8 + $0xc] ss:$84 sps:$4 sm:$0xff]  }
  0x58   : > { %727 = vmatprep.mubr.bf16.mxu0 %v6697_v0  ;;  %768 = vmatprep.mubr.bf16.mxu1 %v6697_v0  ;;  %v6358_v3 = vld [vmem:[%s6867_s8] ss:$84 sps:$4 sm:$0xff]   ;;  %v6359_v4 = vld [vmem:[%s6867_s8 + $0x8] ss:$84 sps:$4 sm:$0xff]   ;;  %v6365_v8 = vld [vmem:[%s6867_s8 + $0xb0] ss:$84 sps:$4 sm:$0xff]  }
  0x59   : > { %695 = vmatprep.subr.bf16.mxu0 %v6354_v1  ;;  %736 = vmatprep.subr.bf16.mxu1 %v6356_v2  ;;  %v6360_v5 = vld [vmem:[%s6867_s8 + $0xac] ss:$84 sps:$4 sm:$0xff]   ;;  %v6362_v6 = vld [vmem:[%s6867_s8 + $0xb4] ss:$84 sps:$4 sm:$0xff]   ;;  %v6368_v10 = vld [vmem:[%s6867_s8 + $0x15c] ss:$84 sps:$4 sm:$0xff]  }
  0x5a   : > { %696 = vmatpush1.bf16.msra.mxu0 %v6358_v3  ;;  %737 = vmatpush1.bf16.msra.mxu1 %v6359_v4  ;;  %v6364_v7 = vld [vmem:[%s6867_s8 + $0xa8] ss:$84 sps:$4 sm:$0xff]   ;;  %v6370_v11 = vld [vmem:[%s6867_s8 + $0x150] ss:$84 sps:$4 sm:$0xff]   ;;  %v6371_v12 = vld [vmem:[%s6867_s8 + $0x158] ss:$84 sps:$4 sm:$0xff]  }
  0x5b   : > { %697 = vmatprep.subr.bf16.mxu0 %v6360_v5  ;;  %738 = vmatprep.subr.bf16.mxu1 %v6362_v6  ;;  %v6366_v9 = vld [vmem:[%s6867_s8 + $0x154] ss:$84 sps:$4 sm:$0xff]   ;;  %v6372_v13 = vld [vmem:[%s6867_s8 + $0x1fc] ss:$84 sps:$4 sm:$0xff]   ;;  %v6374_v14 = vld [vmem:[%s6867_s8 + $0x204] ss:$84 sps:$4 sm:$0xff]  }
  0x5c   : > { %v6376_v15 = vld [vmem:[%s6867_s8 + $0x1f8] ss:$84 sps:$4 sm:$0xff]   ;;  %v6377_v16 = vld [vmem:[%s6867_s8 + $0x200] ss:$84 sps:$4 sm:$0xff]   ;;  %v6383_v18 = vld [vmem:[%s6867_s8 + $0x1c] ss:$84 sps:$4 sm:$0xff]  }
  0x5d   : > { %v6380_v17 = vld [vmem:[%s6867_s8 + $0x14] ss:$84 sps:$4 sm:$0xff]   ;;  %v6893_v19 = vld [vmem:[#allocation2] sm:$0x1]  ;;  %v6378_v20 = vld [vmem:[%s6867_s8 + $0x10] ss:$84 sps:$4 sm:$0xff]  }
  0x5e   : > { %698 = vmatpush1.bf16.msra.mxu0 %v6364_v7  ;;  %739 = vmatpush1.bf16.msra.mxu1 %v6365_v8  ;;  %vm691_vm0 = vcmask 523264   ;;  %v6381_v21 = vld [vmem:[%s6867_s8 + $0x18] ss:$84 sps:$4 sm:$0xff]   ;;  %v6386_v22 = vld [vmem:[%s6867_s8 + $0xbc] ss:$84 sps:$4 sm:$0xff]   ;;  %vm6699_vm1 = vmmov 0  }
  0x5f   : > { %699 = vmatprep.subr.bf16.mxu0 %v6366_v9  ;;  %740 = vmatprep.subr.bf16.mxu1 %v6368_v10  ;;  %v6389_v23 = vld [vmem:[%s6867_s8 + $0xc4] ss:$84 sps:$4 sm:$0xff]   ;;  %v6387_v25 = vld [vmem:[%s6867_s8 + $0xc0] ss:$84 sps:$4 sm:$0xff]   ;;  %v6393_v29 = vld [vmem:[%s6867_s8 + $0x168] ss:$84 sps:$4 sm:$0xff]  }
  0x60   : > { %v6384_v24 = vld [vmem:[%s6867_s8 + $0xb8] ss:$84 sps:$4 sm:$0xff]   ;;  %v6390_v28 = vld [vmem:[%s6867_s8 + $0x160] ss:$84 sps:$4 sm:$0xff]   ;;  %v6396_v32 = vld [vmem:[%s6867_s8 + $0x208] ss:$84 sps:$4 sm:$0xff]  }
  0x61   : > { %v6392_v26 = vld [vmem:[%s6867_s8 + $0x164] ss:$84 sps:$4 sm:$0xff]   ;;  %v6395_v27 = vld [vmem:[%s6867_s8 + $0x16c] ss:$84 sps:$4 sm:$0xff]   ;;  %v6401_v31 = vld [vmem:[%s6867_s8 + $0x214] ss:$84 sps:$4 sm:$0xff]  }
  0x62   : > { %700 = vmatpush1.bf16.msra.mxu0 %v6370_v11  ;;  %741 = vmatpush1.bf16.msra.mxu1 %v6371_v12  ;;  %v6398_v30 = vld [vmem:[%s6867_s8 + $0x20c] ss:$84 sps:$4 sm:$0xff]   ;;  %v6399_v33 = vld [vmem:[%s6867_s8 + $0x210] ss:$84 sps:$4 sm:$0xff]   ;;  %v6405_v37 = vld [vmem:[%s6867_s8 + $0x28] ss:$84 sps:$4 sm:$0xff]  }
  0x63   : > { %701 = vmatprep.subr.bf16.mxu0 %v6372_v13  ;;  %742 = vmatprep.subr.bf16.mxu1 %v6374_v14  ;;  %v6404_v34 = vld [vmem:[%s6867_s8 + $0x24] ss:$84 sps:$4 sm:$0xff]   ;;  %v6407_v35 = vld [vmem:[%s6867_s8 + $0x2c] ss:$84 sps:$4 sm:$0xff]   ;;  %v6413_v39 = vld [vmem:[%s6867_s8 + $0xd4] ss:$84 sps:$4 sm:$0xff]  }
  0x64   : > { %v6402_v36 = vld [vmem:[%s6867_s8 + $0x20] ss:$84 sps:$4 sm:$0xff]   ;;  %v6408_v40 = vld [vmem:[%s6867_s8 + $0xc8] ss:$84 sps:$4 sm:$0xff]   ;;  %v6411_v41 = vld [vmem:[%s6867_s8 + $0xd0] ss:$84 sps:$4 sm:$0xff]  }
  0x65   : > { %v6410_v38 = vld [vmem:[%s6867_s8 + $0xcc] ss:$84 sps:$4 sm:$0xff]   ;;  %v6416_v42 = vld [vmem:[%s6867_s8 + $0x174] ss:$84 sps:$4 sm:$0xff]   ;;  %v6419_v43 = vld [vmem:[%s6867_s8 + $0x17c] ss:$84 sps:$4 sm:$0xff]  }
  0x66   : > { %702 = vmatpush1.bf16.msra.mxu0 %v6376_v15  ;;  %743 = vmatpush1.bf16.msra.mxu1 %v6377_v16  ;;  %v6414_v44 = vld [vmem:[%s6867_s8 + $0x170] ss:$84 sps:$4 sm:$0xff]   ;;  %v6417_v45 = vld [vmem:[%s6867_s8 + $0x178] ss:$84 sps:$4 sm:$0xff]   ;;  %v6423_v49 = vld [vmem:[%s6867_s8 + $0x220] ss:$84 sps:$4 sm:$0xff]  }
  0x67   : > { %777 = vmatprep.subr.bf16.mxu0 %v6380_v17  ;;  %818 = vmatprep.subr.bf16.mxu1 %v6383_v18  ;;  %v6422_v46 = vld [vmem:[%s6867_s8 + $0x21c] ss:$84 sps:$4 sm:$0xff]   ;;  %v6425_v47 = vld [vmem:[%s6867_s8 + $0x224] ss:$84 sps:$4 sm:$0xff]   ;;  %v6428_v50 = vld [vmem:[%s6867_s8 + $0x34] ss:$84 sps:$4 sm:$0xff]  }
  0x68   : > { %v6420_v48 = vld [vmem:[%s6867_s8 + $0x218] ss:$84 sps:$4 sm:$0xff]   ;;  %v6431_v51 = vld [vmem:[%s6867_s8 + $0x3c] ss:$84 sps:$4 sm:$0xff]   ;;  %v6435_v57 = vld [vmem:[%s6867_s8 + $0xe0] ss:$84 sps:$4 sm:$0xff]  }
  0x69   : > { %5995 = vmatmul.mubr.msk.bf16.vlgmr.msra.gmra.mrb[0].mxu0 %vm691_vm0, %v6893_v19  ;;  %5996 = vmatmul.mubr.msk.bf16.vlgmr.msra.gmra.mrb[0].mxu1 %vm691_vm0, %v6893_v19  ;;  %v6426_v52 = vld [vmem:[%s6867_s8 + $0x30] ss:$84 sps:$4 sm:$0xff]   ;;  %v6429_v53 = vld [vmem:[%s6867_s8 + $0x38] ss:$84 sps:$4 sm:$0xff]   ;;  %v6438_v60 = vld [vmem:[%s6867_s8 + $0x180] ss:$84 sps:$4 sm:$0xff]  }
  0x6a   : > { %778 = vmatpush1.bf16.msra.mxu0 %v6378_v20  ;;  %819 = vmatpush1.bf16.msra.mxu1 %v6381_v21  ;;  %v6434_v54 = vld [vmem:[%s6867_s8 + $0xdc] ss:$84 sps:$4 sm:$0xff]   ;;  %v6437_v55 = vld [vmem:[%s6867_s8 + $0xe4] ss:$84 sps:$4 sm:$0xff]   ;;  %v6443_v59 = vld [vmem:[%s6867_s8 + $0x18c] ss:$84 sps:$4 sm:$0xff]  }
  0x6b   : > { %779 = vmatprep.subr.bf16.mxu0 %v6386_v22  ;;  %820 = vmatprep.subr.bf16.mxu1 %v6389_v23  ;;  %v6432_v56 = vld [vmem:[%s6867_s8 + $0xd8] ss:$84 sps:$4 sm:$0xff]   ;;  %v6441_v61 = vld [vmem:[%s6867_s8 + $0x188] ss:$84 sps:$4 sm:$0xff]   ;;  %v6447_v2 = vld [vmem:[%s6867_s8 + $0x230] ss:$84 sps:$4 sm:$0xff]  }
  0x6c   : > { %809 = vmatprep.mubr.bf16.mxu0 %v6697_v0  ;;  %850 = vmatprep.mubr.bf16.mxu1 %v6697_v0  ;;  %v6440_v58 = vld [vmem:[%s6867_s8 + $0x184] ss:$84 sps:$4 sm:$0xff]   ;;  %v6446_v62 = vld [vmem:[%s6867_s8 + $0x22c] ss:$84 sps:$4 sm:$0xff]   ;;  %v6449_v63 = vld [vmem:[%s6867_s8 + $0x234] ss:$84 sps:$4 sm:$0xff]  }
  0x6d   : > { %v6444_v1 = vld [vmem:[%s6867_s8 + $0x228] ss:$84 sps:$4 sm:$0xff]   ;;  %v6452_v3 = vld [vmem:[%s6867_s8 + $0x44] ss:$84 sps:$4 sm:$0xff]   ;;  %v6455_v4 = vld [vmem:[%s6867_s8 + $0x4c] ss:$84 sps:$4 sm:$0xff]  }
  0x6e   : > { %780 = vmatpush1.bf16.msra.mxu0 %v6384_v24  ;;  %821 = vmatpush1.bf16.msra.mxu1 %v6387_v25  ;;  %v6450_v5 = vld [vmem:[%s6867_s8 + $0x40] ss:$84 sps:$4 sm:$0xff]   ;;  %v6453_v6 = vld [vmem:[%s6867_s8 + $0x48] ss:$84 sps:$4 sm:$0xff]   ;;  %v6459_v10 = vld [vmem:[%s6867_s8 + $0xf0] ss:$84 sps:$4 sm:$0xff]  }
  0x6f   : > { %781 = vmatprep.subr.bf16.mxu0 %v6392_v26  ;;  %822 = vmatprep.subr.bf16.mxu1 %v6395_v27  ;;  %v6458_v7 = vld [vmem:[%s6867_s8 + $0xec] ss:$84 sps:$4 sm:$0xff]   ;;  %v6461_v8 = vld [vmem:[%s6867_s8 + $0xf4] ss:$84 sps:$4 sm:$0xff]   ;;  %v6467_v12 = vld [vmem:[%s6867_s8 + $0x19c] ss:$84 sps:$4 sm:$0xff]  }
  0x70   : > { %v6456_v9 = vld [vmem:[%s6867_s8 + $0xe8] ss:$84 sps:$4 sm:$0xff]   ;;  %v6462_v13 = vld [vmem:[%s6867_s8 + $0x190] ss:$84 sps:$4 sm:$0xff]   ;;  %v6465_v14 = vld [vmem:[%s6867_s8 + $0x198] ss:$84 sps:$4 sm:$0xff]  }
  0x71   : > { %v6464_v11 = vld [vmem:[%s6867_s8 + $0x194] ss:$84 sps:$4 sm:$0xff]   ;;  %v6470_v15 = vld [vmem:[%s6867_s8 + $0x23c] ss:$84 sps:$4 sm:$0xff]   ;;  %v6473_v16 = vld [vmem:[%s6867_s8 + $0x244] ss:$84 sps:$4 sm:$0xff]  }
  0x72   : > { %782 = vmatpush1.bf16.msra.mxu0 %v6390_v28  ;;  %823 = vmatpush1.bf16.msra.mxu1 %v6393_v29  ;;  %v6468_v17 = vld [vmem:[%s6867_s8 + $0x238] ss:$84 sps:$4 sm:$0xff]   ;;  %v6471_v18 = vld [vmem:[%s6867_s8 + $0x240] ss:$84 sps:$4 sm:$0xff]   ;;  %v6698_v20 = vmov 0.0   ;;  %s6199_s20 = smul.u32 42, %s6863_s7 }
  0x73   : > { %783 = vmatprep.subr.bf16.mxu0 %v6398_v30  ;;  %824 = vmatprep.subr.bf16.mxu1 %v6401_v31  ;;  %v6475_v21 = vld [vmem:[%s6867_s8 + $0xf8] ss:$84 sps:$4 sm:$0xff]   ;;  %v6476_v22 = vld [vmem:[%s6867_s8 + $0x1a0] ss:$84 sps:$4 sm:$0xff]   ;;  %v6477_v23 = vld [vmem:[%s6867_s8 + $0x248] ss:$84 sps:$4 sm:$0xff]  }
  0x74   : > { %s7569_s23 = scalar_lea.vmem [#allocation7], %s6199_s20  ;;  %s6179_s28 = smul.u32 672, %s6744_s13 }
  0x75   : > { %s5822_s3 = sshll.u32 %s7569_s23, 4  ;;  %s5808_s13 = scalar_lea.sflag [#allocation4], %s6863_s7  ;;  %s9248_s3 = int_to_ptr.vmem [resolvable:$true] %s5822_s3 }
  0x76   : > { %784 = vmatpush1.bf16.msra.mxu0 %v6396_v32  ;;  %825 = vmatpush1.bf16.msra.mxu1 %v6399_v33  ;;  %s9246_s14 = scalar_lea.hbm %s9293_s2, %s6179_s28  ;;  %s6620_s16 = scalar_lea.vmem %s9248_s3, 672 }
  0x77   : > { %859 = vmatprep.subr.bf16.mxu0 %v6404_v34  ;;  %900 = vmatprep.subr.bf16.mxu1 %v6407_v35  ;;  %p6621_p9 = scmp.ne.s32.totalorder %s9248_s3, %s6620_s16  ;;  %p9346_p10 = scmp.ne.s32.totalorder %s9301_s21, 0 }
  0x78   : > { %s6707_s27 = smov [#allocation7]  }
  0x79   : > { %5997 = vmatmul.mubr.msk.bf16.vlgmr.msra.gmra.mrb[4].mxu0 %vm691_vm0, %v6893_v19  ;;  %5998 = vmatmul.mubr.msk.bf16.vlgmr.msra.gmra.mrb[4].mxu1 %vm691_vm0, %v6893_v19  ;;  %p6622_p2 = pnand %p6621_p9, %p9346_p10  ;;  %s6624_s17 = sshll.u32 %s6707_s27, 4  ;;  %s6625_s17 = int_to_ptr.vmem [resolvable:$false] %s6624_s17 }
  0x7a   : > { %860 = vmatpush1.bf16.msra.mxu0 %v6402_v36  ;;  %901 = vmatpush1.bf16.msra.mxu1 %v6405_v37  ;;  %s6626_s19 = scalar_lea.vmem %s6625_s17, 1344  ;;  %p6627_p5 = scmp.lt.s32.totalorder %s9248_s3, %s6625_s17 }
  0x7b   : > { %861 = vmatprep.subr.bf16.mxu0 %v6410_v38  ;;  %902 = vmatprep.subr.bf16.mxu1 %v6413_v39  ;;  %p6623_p4 = pneg %p6622_p2  ;;  %p6628_p0 = scmp.lt.s32.totalorder %s6626_s19, %s6620_s16 }
  0x7c   : > { %891 = vmatprep.mubr.bf16.mxu0 %v6697_v0  ;;  %932 = vmatprep.mubr.bf16.mxu1 %v6697_v0 }
  0x7d   : > { %p6629_p6 = por %p6628_p0, %p6627_p5 }
  0x7e   : > { %862 = vmatpush1.bf16.msra.mxu0 %v6408_v40  ;;  %903 = vmatpush1.bf16.msra.mxu1 %v6411_v41 }
  0x7f   : > { %863 = vmatprep.subr.bf16.mxu0 %v6416_v42  ;;  %904 = vmatprep.subr.bf16.mxu1 %v6419_v43  ;;  %p6630_p13 = pnand %p6629_p6, %p6623_p4 }
  0x82   : > { %864 = vmatpush1.bf16.msra.mxu0 %v6414_v44  ;;  %905 = vmatpush1.bf16.msra.mxu1 %v6417_v45 }
  0x83   : > { %865 = vmatprep.subr.bf16.mxu0 %v6422_v46  ;;  %906 = vmatprep.subr.bf16.mxu1 %v6425_v47 }
  0x86   : > { %866 = vmatpush1.bf16.msra.mxu0 %v6420_v48  ;;  %907 = vmatpush1.bf16.msra.mxu1 %v6423_v49 }
  0x87   : > { %941 = vmatprep.subr.bf16.mxu0 %v6428_v50  ;;  %982 = vmatprep.subr.bf16.mxu1 %v6431_v51 }
  0x89   : > { %5999 = vmatmul.mubr.msk.bf16.vlgmr.msra.gmra.mrb[8].mxu0 %vm691_vm0, %v6893_v19  ;;  %6000 = vmatmul.mubr.msk.bf16.vlgmr.msra.gmra.mrb[8].mxu1 %vm691_vm0, %v6893_v19 }
  0x8a   : > { %942 = vmatpush1.bf16.msra.mxu0 %v6426_v52  ;;  %983 = vmatpush1.bf16.msra.mxu1 %v6429_v53 }
  0x8b   : > { %943 = vmatprep.subr.bf16.mxu0 %v6434_v54  ;;  %984 = vmatprep.subr.bf16.mxu1 %v6437_v55 }
  0x8c   : > { %973 = vmatprep.mubr.bf16.mxu0 %v6697_v0  ;;  %1014 = vmatprep.mubr.bf16.mxu1 %v6697_v0 }
  0x8e   : > { %944 = vmatpush1.bf16.msra.mxu0 %v6432_v56  ;;  %985 = vmatpush1.bf16.msra.mxu1 %v6435_v57  ;;  %v6700_v57 = vmov 683565275  }
  0x8f   : > { %945 = vmatprep.subr.bf16.mxu0 %v6440_v58  ;;  %986 = vmatprep.subr.bf16.mxu1 %v6443_v59 }
  0x92   : > { %946 = vmatpush1.bf16.msra.mxu0 %v6438_v60  ;;  %987 = vmatpush1.bf16.msra.mxu1 %v6441_v61  ;;  %v6701_v61 = vmov 2475754826  }
  0x93   : > { %947 = vmatprep.subr.bf16.mxu0 %v6446_v62  ;;  %988 = vmatprep.subr.bf16.mxu1 %v6449_v63  ;;  %v6702_v63 = vmov 2131351028  }
  0x96   : > { %948 = vmatpush1.bf16.msra.mxu0 %v6444_v1  ;;  %989 = vmatpush1.bf16.msra.mxu1 %v6447_v2  ;;  %v6703_v2 = vmov 2102212464  }
  0x97   : > { %1023 = vmatprep.subr.bf16.mxu0 %v6452_v3  ;;  %1064 = vmatprep.subr.bf16.mxu1 %v6455_v4  ;;  %v6704_v4 = vmov 920167782  }
  0x99   : > { %6001 = vmatmul.mubr.msk.bf16.vlgmr.msra.gmra.mrb[12].mxu0 %vm691_vm0, %v6893_v19  ;;  %6002 = vmatmul.mubr.msk.bf16.vlgmr.msra.gmra.mrb[12].mxu1 %vm691_vm0, %v6893_v19 }
  0x9a   : > { %1024 = vmatpush1.bf16.msra.mxu0 %v6450_v5  ;;  %1065 = vmatpush1.bf16.msra.mxu1 %v6453_v6 }
  0x9b   : > { %1025 = vmatprep.subr.bf16.mxu0 %v6458_v7  ;;  %1066 = vmatprep.subr.bf16.mxu1 %v6461_v8 }
  0x9c   : > { %1055 = vmatprep.mubr.bf16.mxu0 %v6697_v0  ;;  %1096 = vmatprep.mubr.bf16.mxu1 %v6697_v0  ;;  %v6474_v0 = vld [vmem:[%s6867_s8 + $0x50] ss:$84 sps:$4 sm:$0xff]  }
  0x9e   : > { %1026 = vmatpush1.bf16.msra.mxu0 %v6456_v9  ;;  %1067 = vmatpush1.bf16.msra.mxu1 %v6459_v10 }
  0x9f   : > { %1027 = vmatprep.subr.bf16.mxu0 %v6464_v11  ;;  %1068 = vmatprep.subr.bf16.mxu1 %v6467_v12  ;;  %v6705_v11 = vmov 1326507024  }
  0xa2   : > { %1028 = vmatpush1.bf16.msra.mxu0 %v6462_v13  ;;  %1069 = vmatpush1.bf16.msra.mxu1 %v6465_v14 }
  0xa3   : > { %1029 = vmatprep.subr.bf16.mxu0 %v6470_v15  ;;  %1070 = vmatprep.subr.bf16.mxu1 %v6473_v16 }
  0xa6   : > { %1030 = vmatpush1.bf16.msra.mxu0 %v6468_v17  ;;  %1071 = vmatpush1.bf16.msra.mxu1 %v6471_v18 }
  0xa7   : > { %6185 = vmatprep.subr.bf16.mxu0 %v6698_v20 }
  0xa9   : > { %6003 = vmatmul.mubr.msk.bf16.vlgmr.msra.gmra.mrb[16].mxu0 %vm691_vm0, %v6893_v19  ;;  %6004 = vmatmul.mubr.msk.bf16.vlgmr.msra.gmra.mrb[16].mxu1 %vm691_vm0, %v6893_v19 }
  0xaa   : > { %6186 = vmatpush3.bf16.msra.mxu0 %v6474_v0  ;;  %6193 = vmatprep.mubr.msk.bf16.mxu0 %vm6699_vm1, %v6698_v20 }
  0xab   : > { %6187 = vmatprep.subr.bf16.mxu0 %v6698_v20 }
  0xae   : > { %6188 = vmatpush3.bf16.msra.mxu0 %v6475_v21 }
  0xaf   : > { %6189 = vmatprep.subr.bf16.mxu0 %v6698_v20 }
  0xb2   : > { %6190 = vmatpush3.bf16.msra.mxu0 %v6476_v22 }
  0xb3   : > { %6191 = vmatprep.subr.bf16.mxu0 %v6698_v20 }
  0xb6   : > { %6192 = vmatpush3.bf16.msra.mxu0 %v6477_v23 }
  0xb9   : > { %6194 = vmatmul.mubr.msk.bf16.vlgmr.msra.gmra.mrb[20].mxu0 %vm691_vm0, %v6893_v19 }
 0x13c   : > { %v6991_v24 = vpop.f32.mrb[0].mxu0  ;;  %v6993_v25 = vpop.f32.mrb[0].mxu1 }
 0x13d   : > { %v1145_v26 = vand.u32 2147483647, %v6991_v24  ;;  %v1148_v27 = vand.u32 2139095040, %v6991_v24  ;;  %v6997_v28 = vpop.f32.mrb[1].mxu0  ;;  %v1351_v29 = vand.u32 2147483647, %v6993_v25 }
 0x13e   : > { %v1354_v30 = vand.u32 2139095040, %v6993_v25  ;;  %v7001_v31 = vpop.f32.mrb[1].mxu1  ;;  %v733_v32 = vpop.f32.mrb[2].mxu0  ;;  %v1251_v40 = vand.u32 2139095040, %v6997_v28  ;;  %v1248_v55 = vand.u32 2147483647, %v6997_v28 }
 0x13f   : > { %v1149_v33 = vshrl.u32 %v1148_v27, 23  ;;  %v1152_v19 = vand.u32 8388607, %v1145_v26  ;;  %v1358_v35 = vand.u32 8388607, %v1351_v29  ;;  %v734_v36 = vpop.f32.mrb[3].mxu0 }
 0x140   : > { %v1355_v34 = vshrl.u32 %v1354_v30, 23  ;;  %v774_v38 = vpop.f32.mrb[2].mxu1  ;;  %v1252_v46 = vshrl.u32 %v1251_v40, 23  ;;  %vm1147_vm0 = vcmp.lt.s32.totalorder %v6991_v24, 0 }
 0x141   : > { %v6006_v37 = vadd.s32 4294967169, %v1149_v33  ;;  %v775_v41 = vpop.f32.mrb[3].mxu1  ;;  %v1153_v43 = vor.u32 8388608, %v1152_v19  ;;  %v1359_v44 = vor.u32 8388608, %v1358_v35 }
 0x142   : > { %v6014_v39 = vadd.s32 4294967169, %v1355_v34  ;;  %v6010_v48 = vadd.s32 4294967169, %v1252_v46 }
 0x143   : > { %v1155_v42 = vadd.s32 1, %v6006_v37  ;;  %v7008_v52 = vshll.u32 %v1153_v43, 8  ;;  %v7012_v54 = vshll.u32 %v1359_v44, 8 }
 0x144   : > { %v1361_v45 = vadd.s32 1, %v6014_v39  ;;  %v7016_v60 = vadd.s32 1, %v6010_v48 }
 0x145   : > { %vm1156_vm2 = vcmp.gt.s32.totalorder %v1155_v42, 0 }
 0x146   : > { %v1157_v47 = vsel %vm1156_vm2, %v1155_v42, 0  ;;  %vm1362_vm3 = vcmp.gt.s32.totalorder %v1361_v45, 0  ;;  %vm1259_vm13 = vcmp.gt.s32.totalorder %v7016_v60, 0 }
 0x147   : > { %v1158_v49 = vshrl.u32 %v1157_v47, 5  ;;  %v1159_v50 = vand.u32 31, %v1157_v47  ;;  %v1363_v51 = vsel %vm1362_vm3, %v1361_v45, 0 }
 0x148   : > { %v7010_v53 = vshrl.u32 %v1363_v51, 5  ;;  %v1365_v59 = vand.u32 31, %v1363_v51 }
 0x149   : > { %v1160_v56 = vsub.s32 32, %v1159_v50  ;;  %v1162_v58 = vshll.u32 %v6700_v57, %v1159_v50  ;;  %v1165_v62 = vshll.u32 %v6701_v61, %v1159_v50  ;;  %v1168_v1 = vshll.u32 %v6702_v63, %v1159_v50 }
 0x14a   : > { %v1171_v3 = vshll.u32 %v6703_v2, %v1159_v50  ;;  %v1174_v5 = vshll.u32 %v6704_v4, %v1159_v50  ;;  %vm1177_vm4 = vcmp.lt.s32.totalorder %v1158_v49, 1  ;;  %vm1179_vm5 = vcmp.lt.s32.totalorder %v1158_v49, 3 }
 0x14b   : > { %v1163_v6 = vshrl.u32 %v6701_v61, %v1160_v56  ;;  %v1166_v7 = vshrl.u32 %v6702_v63, %v1160_v56  ;;  %v1169_v8 = vshrl.u32 %v6703_v2, %v1160_v56  ;;  %v1161_v9 = vshrl.u32 %v6700_v57, %v1160_v56 }
 0x14c   : > { %v1172_v10 = vshrl.u32 %v6704_v4, %v1160_v56  ;;  %v1175_v12 = vshrl.u32 %v6705_v11, %v1160_v56  ;;  %v7028_v13 = vpop.f32.mrb[4].mxu0  ;;  %v7030_v14 = vpop.f32.mrb[4].mxu1  ;;  %v1366_v18 = vsub.s32 32, %v1365_v59  ;;  %vm1180_vm6 = vcmp.lt.s32.totalorder %v1158_v49, 4 }
 0x14d   : > { %v1164_v15 = vor.u32 %v1163_v6, %v1162_v58  ;;  %v1167_v16 = vor.u32 %v1166_v7, %v1165_v62  ;;  %v1170_v17 = vor.u32 %v1169_v8, %v1168_v1  ;;  %v7032_v0 = vpop.f32.mrb[5].mxu0  ;;  %v1368_v22 = vshll.u32 %v6700_v57, %v1365_v59  ;;  %v7055_v58 = vpop.f32.mrb[5].mxu1 }
 0x14e   : > { %v1173_v20 = vor.u32 %v1172_v10, %v1171_v3  ;;  %v1176_v21 = vor.u32 %v1175_v12, %v1174_v5  ;;  %v815_v23 = vpop.f32.mrb[6].mxu0  ;;  %v1371_v37 = vshll.u32 %v6701_v61, %v1365_v59  ;;  %vm1178_vm7 = vcmp.lt.s32.totalorder %v1158_v49, 2  ;;  %v856_v6 = vpop.f32.mrb[6].mxu1 }
 0x14f   : > { %v1181_v27 = vsel %vm1177_vm4, %v1161_v9, %v1164_v15  ;;  %v1182_v30 = vsel %vm1180_vm6, %v1170_v17, 2102212464  ;;  %v1185_v32 = vsel %vm1177_vm4, %v1164_v15, %v1167_v16  ;;  %v1189_v33 = vsel %vm1177_vm4, %v1167_v16, %v1170_v17  ;;  %v816_v19 = vpop.f32.mrb[7].mxu0  ;;  %v857_v10 = vpop.f32.mrb[7].mxu1 }
 0x150   : > { %v1183_v34 = vsel %vm1179_vm5, %v1167_v16, %v1182_v30  ;;  %v1186_v35 = vsel %vm1180_vm6, %v1173_v20, 920167782  ;;  %v1190_v36 = vsel %vm1180_vm6, %v1176_v21, 1326507024  ;;  %v1369_v40 = vshrl.u32 %v6701_v61, %v1366_v18 }
 0x151   : > { %v1187_v38 = vsel %vm1179_vm5, %v1170_v17, %v1186_v35  ;;  %v1191_v39 = vsel %vm1179_vm5, %v1173_v20, %v1190_v36  ;;  %v1184_v41 = vsel %vm1178_vm7, %v1181_v27, %v1183_v34  ;;  %v1372_v44 = vshrl.u32 %v6702_v63, %v1366_v18 }
 0x152   : > { %v1188_v42 = vsel %vm1178_vm7, %v1185_v32, %v1187_v38  ;;  %v1192_v43 = vsel %vm1178_vm7, %v1189_v33, %v1191_v39  ;;  %v1370_v50 = vor.u32 %v1369_v40, %v1368_v22  ;;  %v1374_v49 = vshll.u32 %v6702_v63, %v1365_v59 }
 0x153   : > { %v7045_v45 = vmul.u32.u64.low %v7008_v52, %v1192_v43  ;;  %v7046_v46 = vmul.u32.u64.high %v7008_v52, %v1192_v43, %v7045_v45  ;;  %v7049_v47 = vmul.u32.u64.low %v7008_v52, %v1188_v42  ;;  %v7050_v48 = vmul.u32.u64.high %v7008_v52, %v1188_v42, %v7049_v47 }
 0x154   : > { %v1373_v51 = vor.u32 %v1372_v44, %v1371_v37  ;;  %v1375_v56 = vshrl.u32 %v6703_v2, %v1366_v18  ;;  %v1377_v62 = vshll.u32 %v6703_v2, %v1365_v59  ;;  %v1378_v1 = vshrl.u32 %v6704_v4, %v1366_v18 }
 0x155   : > { %v1380_v3 = vshll.u32 %v6704_v4, %v1365_v59  ;;  %v1381_v5 = vshrl.u32 %v6705_v11, %v1366_v18  ;;  %v1200_v7 = vmul.u32 %v7008_v52, %v1184_v41  ;;  %v1367_v8 = vshrl.u32 %v6700_v57, %v1366_v18 }
 0x156   : > { %v1376_v9 = vor.u32 %v1375_v56, %v1374_v49  ;;  %vm1383_vm8 = vcmp.lt.s32.totalorder %v7010_v53, 1  ;;  %vm1202_vm9 = vc.u32 %v7046_v46, %v7049_v47  ;;  %v1203_v12 = vadd.s32 1, %v7050_v48 }
 0x157   : > { %v1379_v15 = vor.u32 %v1378_v1, %v1377_v62  ;;  %vm1385_vm10 = vcmp.lt.s32.totalorder %v7010_v53, 3  ;;  %v1382_v59 = vor.u32 %v1381_v5, %v1380_v3  ;;  %vm1384_vm11 = vcmp.lt.s32.totalorder %v7010_v53, 2 }
 0x158   : > { %vm1386_vm12 = vcmp.lt.s32.totalorder %v7010_v53, 4  ;;  %v1391_v52 = vsel %vm1383_vm8, %v1370_v50, %v1373_v51  ;;  %v1204_v16 = vsel %vm1202_vm9, %v1203_v12, %v7050_v48  ;;  %v1395_v20 = vsel %vm1383_vm8, %v1373_v51, %v1376_v9 }
 0x159   : > { %v1388_v17 = vsel %vm1386_vm12, %v1376_v9, 2102212464  ;;  %v1392_v18 = vsel %vm1386_vm12, %v1379_v15, 920167782  ;;  %v1205_v21 = vadd.s32 %v1204_v16, %v1200_v7  ;;  %v1387_v22 = vsel %vm1383_vm8, %v1367_v8, %v1370_v50 }
 0x15a   : > { %v1393_v23 = vsel %vm1385_vm10, %v1376_v9, %v1392_v18  ;;  %v1396_v27 = vsel %vm1386_vm12, %v1382_v59, 1326507024  ;;  %v1389_v30 = vsel %vm1385_vm10, %v1373_v51, %v1388_v17  ;;  %v1260_v41 = vsel %vm1259_vm13, %v7016_v60, 0 }
 0x15b   : > { %v1394_v32 = vsel %vm1384_vm11, %v1391_v52, %v1393_v23  ;;  %v1397_v33 = vsel %vm1385_vm10, %v1379_v15, %v1396_v27  ;;  %v1206_v19 = vadd.s32 536870912, %v1205_v21  ;;  %v1390_v40 = vsel %vm1384_vm11, %v1387_v22, %v1389_v30 }
 0x15c   : > { %v1398_v34 = vsel %vm1384_vm11, %v1395_v20, %v1397_v33  ;;  %v7077_v35 = vmul.u32.u64.low %v7012_v54, %v1394_v32  ;;  %v7078_v36 = vmul.u32.u64.high %v7012_v54, %v1394_v32, %v7077_v35  ;;  %v5577_v42 = vlaneseq }
 0x15d   : > { %v7081_v37 = vmul.u32.u64.low %v7012_v54, %v1398_v34  ;;  %v7082_v38 = vmul.u32.u64.high %v7012_v54, %v1398_v34, %v7081_v37  ;;  %v7084_v39 = vshrl.u32 %v1206_v19, 30  ;;  %v1255_v45 = vand.u32 8388607, %v1248_v55 }
 0x15e   : > { %v1409_v44 = vadd.s32 1, %v7078_v36  ;;  %v1406_v48 = vmul.u32 %v7012_v54, %v1390_v40  ;;  %v1262_v50 = vand.u32 31, %v1260_v41  ;;  %v7096_v53 = vshrl.u32 %v5577_v42, 7 }
 0x15f   : > { %v1208_v43 = vshll.u32 %v7084_v39, 30  ;;  %vm1408_vm14 = vc.u32 %v7082_v38, %v7077_v35  ;;  %v1256_v62 = vor.u32 8388608, %v1255_v45  ;;  %v6706_v1 = vmov 1983009808  }
 0x160   : > { %v1410_v49 = vsel %vm1408_vm14, %v1409_v44, %v7078_v36  ;;  %v7098_v3 = vunpack.c.l.s4 %v6706_v1  ;;  %v1263_v6 = vsub.s32 32, %v1262_v50  ;;  %v1457_v8 = vand.u32 2139095040, %v7001_v31 }
 0x161   : > { %v1209_v51 = vsub.s32 %v1205_v21, %v1208_v43  ;;  %v1411_v56 = vadd.s32 %v1410_v49, %v1406_v48  ;;  %v7102_v54 = vsub.s32 0, %v7096_v53  ;;  %v1201_v10 = vadd.s32 %v7049_v47, %v7046_v46 }
 0x162   : > { %v7108_v15 = vshll.u32 %v1256_v62, 8  ;;  %v5707_v59 = vunpack.c.0.s8 %v7098_v3  ;;  %v7112_v16 = vshrl.u32 %v1260_v41, 5  ;;  %v1266_v17 = vshrl.u32 %v6701_v61, %v1263_v6 }
 0x163   : > { %v1211_v60 = vsub.s32 0, %v1209_v51  ;;  %v1412_v5 = vadd.s32 536870912, %v1411_v56  ;;  %v1269_v18 = vshrl.u32 %v6702_v63, %v1263_v6  ;;  %v1231_v21 = vsub.s32 4, %v7084_v39 }
 0x164   : > { %v1275_v22 = vshrl.u32 %v6704_v4, %v1263_v6  ;;  %v1458_v23 = vshrl.u32 %v1457_v8, 23  ;;  %v1265_v47 = vshll.u32 %v6700_v57, %v1262_v50  ;;  %v1268_v27 = vshll.u32 %v6701_v61, %v1262_v50 }
 0x165   : > { %v6007_v7 = vmin.u32 %v1211_v60, %v1209_v51  ;;  %v7104_v9 = vshrl.u32 %v1412_v5, 30  ;;  %v1272_v30 = vshrl.u32 %v6703_v2, %v1263_v6  ;;  %v1271_v32 = vshll.u32 %v6702_v63, %v1262_v50 }
 0x166   : > { %v1274_v33 = vshll.u32 %v6703_v2, %v1262_v50  ;;  %v1278_v19 = vshrl.u32 %v6705_v11, %v1263_v6  ;;  %v1267_v37 = vor.u32 %v1266_v17, %v1265_v47  ;;  %v1270_v40 = vor.u32 %v1269_v18, %v1268_v27 }
 0x167   : > { %v1213_v12 = vclz %v6007_v7  ;;  %v1414_v52 = vshll.u32 %v7104_v9, 30  ;;  %v1277_v44 = vshll.u32 %v6704_v4, %v1262_v50  ;;  %v1407_v45 = vadd.s32 %v7077_v35, %v7082_v38 }
 0x168   : > { %v1276_v43 = vor.u32 %v1275_v22, %v1274_v33  ;;  %v1264_v49 = vshrl.u32 %v6700_v57, %v1263_v6  ;;  %vm1280_vm1 = vcmp.lt.s32.totalorder %v7112_v16, 1  ;;  %vm1281_vm2 = vcmp.lt.s32.totalorder %v7112_v16, 2 }
 0x169   : > { %v6008_v20 = vadd.s32 4294967294, %v1213_v12  ;;  %v7118_v46 = vsub.s32 %v1411_v56, %v1414_v52  ;;  %v1273_v56 = vor.u32 %v1272_v30, %v1271_v32  ;;  %v1279_v5 = vor.u32 %v1278_v19, %v1277_v44 }
 0x16a   : > { %vm1283_vm3 = vcmp.lt.s32.totalorder %v7112_v16, 4  ;;  %v1288_v38 = vsel %vm1280_vm1, %v1267_v37, %v1270_v40  ;;  %vm1282_vm4 = vcmp.lt.s32.totalorder %v7112_v16, 3  ;;  %v6018_v33 = vadd.s32 4294967169, %v1458_v23 }
 0x16b   : > { %vm6009_vm15 = vcmp.lt.s32.totalorder %v6008_v20, 0  ;;  %v1417_v36 = vsub.s32 0, %v7118_v46  ;;  %v1289_v8 = vsel %vm1283_vm3, %v1276_v43, 920167782  ;;  %v1292_v6 = vsel %vm1280_vm1, %v1270_v40, %v1273_v56 }
 0x16c   : > { %v1216_v34 = vsel %vm6009_vm15, 0, %v6008_v20  ;;  %v1285_v52 = vsel %vm1283_vm3, %v1273_v56, 2102212464  ;;  %v1290_v17 = vsel %vm1282_vm4, %v1273_v56, %v1289_v8  ;;  %v1293_v18 = vsel %vm1283_vm3, %v1279_v5, 1326507024 }
 0x16d   : > { %v1217_v41 = vsub.s32 32, %v1216_v34  ;;  %v1221_v42 = vsub.s32 4294967266, %v1216_v34  ;;  %v6015_v48 = vmin.u32 %v1417_v36, %v7118_v46  ;;  %v1218_v60 = vshll.u32 %v1209_v51, %v1216_v34 }
 0x16e   : > { %v1284_v51 = vsel %vm1280_vm1, %v1264_v49, %v1267_v37  ;;  %v1291_v22 = vsel %vm1281_vm2, %v1288_v38, %v1290_v17  ;;  %v1294_v47 = vsel %vm1282_vm4, %v1276_v43, %v1293_v18  ;;  %v1286_v37 = vsel %vm1282_vm4, %v1270_v40, %v1285_v52 }
 0x16f   : > { %v1219_v62 = vshrl.u32 %v1201_v10, %v1217_v41  ;;  %v1222_v1 = vadd.s32 127, %v1221_v42  ;;  %v1419_v7 = vclz %v6015_v48  ;;  %v1295_v32 = vsel %vm1281_vm2, %v1292_v6, %v1294_v47 }
 0x170   : > { %v7148_v42 = vmul.u32.u64.low %v7108_v15, %v1295_v32  ;;  %v7149_v44 = vmul.u32.u64.high %v7108_v15, %v1295_v32, %v7148_v42  ;;  %v1464_v48 = vadd.s32 1, %v6018_v33  ;;  %v7164_v40 = vsub.s32 %v5707_v59, %v7096_v53 }
 0x171   : > { %v1220_v50 = vor.u32 %v1219_v62, %v1218_v60  ;;  %v1223_v35 = vshll.u32 %v1222_v1, 23  ;;  %v6016_v12 = vadd.s32 4294967294, %v1419_v7  ;;  %v1287_v5 = vsel %vm1281_vm2, %v1284_v51, %v1286_v37 }
 0x172   : > { %v7152_v56 = vmul.u32.u64.low %v7108_v15, %v1291_v22  ;;  %v7153_v60 = vmul.u32.u64.high %v7108_v15, %v1291_v22, %v7152_v56  ;;  %vm1465_vm6 = vcmp.gt.s32.totalorder %v1464_v48, 0  ;;  %vm1146_vm7 = vcmp.le.f32.partialorder %v1145_v26, 0.7853982 }
 0x173   : > { %v1224_v10 = vor.u32 4788187, %v1223_v35  ;;  %v1227_v20 = vcvt.s32.f32 %v1220_v50  ;;  %vm6017_vm5 = vcmp.lt.s32.totalorder %v6016_v12, 0  ;;  %v1466_v7 = vsel %vm1465_vm6, %v1464_v48, 0 }
 0x174   : > { %v1422_v30 = vsel %vm6017_vm5, 0, %v6016_v12  ;;  %vm1353_vm8 = vcmp.lt.s32.totalorder %v6993_v25, 0  ;;  %vm1305_vm9 = vc.u32 %v7149_v44, %v7152_v56  ;;  %v1306_v59 = vadd.s32 1, %v7153_v60 }
 0x175   : > { %v1225_v27 = vand.u32 2147483647, %v1224_v10  ;;  %v1423_v19 = vsub.s32 32, %v1422_v30  ;;  %v1424_v34 = vshll.u32 %v7118_v46, %v1422_v30  ;;  %v1427_v36 = vsub.s32 4294967266, %v1422_v30 }
 0x176   : > { %v1232_v46 = vsel %vm1147_vm0, %v1231_v21, %v7084_v39  ;;  %v1454_v16 = vand.u32 2147483647, %v7001_v31  ;;  %v1303_v50 = vmul.u32 %v7108_v15, %v1287_v5  ;;  %v7181_v35 = vshrl.u32 %v1466_v7, 5 }
 0x177   : > { %v1228_v41 = vmul.f32 %v1227_v20, %v1225_v27  ;;  %v1425_v43 = vshrl.u32 %v1407_v45, %v1423_v19  ;;  %v1428_v49 = vadd.s32 127, %v1427_v36  ;;  %v7166_v45 = vpop.f32.mrb[8].mxu0  ;;  %v1234_v21 = vsel %vm1146_vm7, 0, %v1232_v46 }
 0x178   : > { %v1468_v26 = vand.u32 31, %v1466_v7  ;;  %v1307_v12 = vsel %vm1305_vm9, %v1306_v59, %v7153_v60  ;;  %vm7190_vm10 = vcmp.le.f32.partialorder %v1351_v29, 0.7853982  ;;  %v1461_v32 = vand.u32 8388607, %v1454_v16 }
 0x179   : > { %v1229_v23 = vxor.u32 2147483648, %v1228_v41  ;;  %v1426_v62 = vor.u32 %v1425_v43, %v1424_v34  ;;  %v1429_v1 = vshll.u32 %v1428_v49, 23  ;;  %v1308_v51 = vadd.s32 %v1307_v12, %v1303_v50 }
 0x17a   : > { %v1469_v6 = vsub.s32 32, %v1468_v26  ;;  %v1471_v10 = vshll.u32 %v6700_v57, %v1468_v26  ;;  %v1474_v17 = vshll.u32 %v6701_v61, %v1468_v26  ;;  %v1477_v18 = vshll.u32 %v6702_v63, %v1468_v26 }
 0x17b   : > { %v1230_v39 = vsel %vm1147_vm0, %v1229_v23, %v1228_v41  ;;  %v1430_v3 = vor.u32 4788187, %v1429_v1  ;;  %v1433_v8 = vcvt.s32.f32 %v1426_v62  ;;  %v1480_v15 = vshll.u32 %v6703_v2, %v1468_v26 }
 0x17c   : > { %v1233_v53 = vsel %vm1146_vm7, %v6991_v24, %v1230_v39  ;;  %v1309_v22 = vadd.s32 536870912, %v1308_v51  ;;  %v1472_v47 = vshrl.u32 %v6701_v61, %v1469_v6  ;;  %v1475_v27 = vshrl.u32 %v6702_v63, %v1469_v6 }
 0x17d   : > { %6478 = vcosq.f32 %v1233_v53  ;;  %v1431_v38 = vand.u32 2147483647, %v1430_v3  ;;  %v1478_v33 = vshrl.u32 %v6703_v2, %v1469_v6  ;;  %v1481_v19 = vshrl.u32 %v6704_v4, %v1469_v6 }
 0x17e   : > { %6480 = vsinq.f32 %v1233_v53  ;;  %v7200_v34 = vand.u32 3, %v1234_v21  ;;  %v7202_v36 = vshrl.u32 %v1309_v22, 30  ;;  %v1473_v29 = vor.u32 %v1472_v47, %v1471_v10 }
 0x17f   : > { %v1434_v52 = vmul.f32 %v1433_v8, %v1431_v38  ;;  %vm1489_vm11 = vcmp.lt.s32.totalorder %v7181_v35, 4  ;;  %v1476_v41 = vor.u32 %v1475_v27, %v1474_v17  ;;  %v1479_v42 = vor.u32 %v1478_v33, %v1477_v18 }
 0x180   : > { %v1482_v48 = vor.u32 %v1481_v19, %v1480_v15  ;;  %v3401_v43 = vadd.s32 3, %v1234_v21  ;;  %v1311_v49 = vshll.u32 %v7202_v36, 30  ;;  %vm1486_vm12 = vcmp.lt.s32.totalorder %v7181_v35, 1 }
 0x181   : > { %v1435_v30 = vxor.u32 2147483648, %v1434_v52  ;;  %vm1488_vm13 = vcmp.lt.s32.totalorder %v7181_v35, 3  ;;  %v1483_v23 = vshll.u32 %v6704_v4, %v1468_v26  ;;  %v1484_v46 = vshrl.u32 %v6705_v11, %v1469_v6 }
 0x182   : > { %v1495_v62 = vsel %vm1489_vm11, %v1482_v48, 920167782  ;;  %v5580_v1 = vrot.slane %v6991_v24, %v7102_v54  ;;  %v1437_v5 = vsub.s32 4, %v7104_v9  ;;  %v7220_v7 = vsub.s32 %v1308_v51, %v1311_v49 }
 0x183   : > { %v1436_v37 = vsel %vm1353_vm8, %v1435_v30, %v1434_v52  ;;  %v5584_v39 = vrot.slane %v6997_v28, %v7102_v54  ;;  %vm1250_vm14 = vcmp.lt.s32.totalorder %v6997_v28, 0  ;;  %v1462_v3 = vor.u32 8388608, %v1461_v32  ;;  %v7258_v30 = vpop.f32.mrb[8].mxu1 }
 0x184   : > { %v1439_v60 = vsel %vm7190_vm10, %v6993_v25, %v1436_v37  ;;  %vm1487_vm15 = vcmp.lt.s32.totalorder %v7181_v35, 2  ;;  %v1494_v59 = vsel %vm1486_vm12, %v1473_v29, %v1476_v41  ;;  %v1496_v21 = vsel %vm1488_vm13, %v1479_v42, %v1495_v62 }
 0x185   : > { %v7232_v26 = vand.u32 3, %v3401_v43  ;;  %6482 = vcosq.f32 %v1439_v60  ;;  %v1314_v38 = vsub.s32 0, %v7220_v7  ;;  %v1557_v8 = vand.u32 2147483647, %v7028_v13 }
 0x186   : > { %vm1239_vm0 = vcmp.lt.s32.totalorder %v7200_v34, 2  ;;  %vm1240_vm1 = vcmp.eq.s32.totalorder %v7200_v34, 0  ;;  %6484 = vsinq.f32 %v1439_v60  ;;  %v1485_v12 = vor.u32 %v1484_v46, %v1483_v23 }
 0x187   : > { %v7224_v53 = vpop.eup %6478  ;;  %vm1243_vm2 = vcmp.eq.s32.totalorder %v7200_v34, 2  ;;  %vm7241_vm3 = vcmp.le.f32.partialorder %v1248_v55, 0.7853982  ;;  %v6011_v10 = vmin.u32 %v1314_v38, %v7220_v7  ;;  %v1470_v52 = vshrl.u32 %v6700_v57, %v1469_v6 }
 0x188   : > { %v6481_v50 = vpop.eup %6480  ;;  %v1497_v17 = vsel %vm1487_vm15, %v1494_v59, %v1496_v21  ;;  %v1244_v15 = vxor.u32 2147483648, %v7224_v53  ;;  %v1438_v22 = vsel %vm1353_vm8, %v1437_v5, %v7104_v9  ;;  %v1502_v47 = vshll.u32 %v1462_v3, 8 }
 0x189   : > { %v1241_v18 = vxor.u32 2147483648, %v6481_v50  ;;  %vm1237_vm4 = vweird.f32 %v6991_v24  ;;  %vm3404_vm5 = vcmp.eq.s32.totalorder %v7232_v26, 0  ;;  %v1316_v55 = vclz %v6011_v10 }
 0x18a   : > { %v1334_v27 = vsub.s32 4, %v7202_v36  ;;  %v1491_v6 = vsel %vm1489_vm11, %v1479_v42, 2102212464  ;;  %v1498_v32 = vsel %vm1486_vm12, %v1476_v41, %v1479_v42  ;;  %v1499_v33 = vsel %vm1489_vm11, %v1485_v12, 1326507024 }
 0x18b   : > { %v7264_v9 = vmul.u32.u64.low %v1502_v47, %v1497_v17  ;;  %v7265_v19 = vmul.u32.u64.high %v1502_v47, %v1497_v17, %v7264_v9  ;;  %vm3407_vm6 = vcmp.eq.s32.totalorder %v7232_v26, 2  ;;  %v1440_v37 = vsel %vm7190_vm10, 0, %v1438_v22 }
 0x18c   : > { %v6012_v43 = vadd.s32 4294967294, %v1316_v55  ;;  %v1490_v49 = vsel %vm1486_vm12, %v1470_v52, %v1473_v29  ;;  %v1242_v42 = vsel %vm1240_vm1, %v7224_v53, %v1241_v18  ;;  %v1245_v60 = vsel %vm1243_vm2, %v1244_v15, %v6481_v50 }
 0x18d   : > { %vm3403_vm7 = vcmp.lt.s32.totalorder %v7232_v26, 2  ;;  %v1492_v23 = vsel %vm1488_vm13, %v1476_v41, %v1491_v6  ;;  %v1500_v20 = vsel %vm1488_vm13, %v1482_v48, %v1499_v33  ;;  %v1335_v29 = vsel %vm1250_vm14, %v1334_v27, %v7202_v36 }
 0x18e   : > { %vm6013_vm8 = vcmp.lt.s32.totalorder %v6012_v43, 0  ;;  %v1501_v46 = vsel %vm1487_vm15, %v1498_v32, %v1500_v20  ;;  %v1560_v62 = vand.u32 2139095040, %v7028_v13  ;;  %vm5555_vm9 = vcmask 1040384  }
 0x18f   : > { %v1444_v5 = vand.u32 3, %v1440_v37  ;;  %v1319_v3 = vsel %vm6013_vm8, 0, %v6012_v43  ;;  %v7289_v59 = vmul.u32.u64.low %v1502_v47, %v1501_v46  ;;  %v7290_v21 = vmul.u32.u64.high %v1502_v47, %v1501_v46, %v7289_v59  ;;  %v6483_v41 = vpop.eup %6482 }
 0x190   : > { %v1246_v48 = vsel %vm1239_vm0, %v1242_v42, %v1245_v60  ;;  %v1304_v38 = vadd.s32 %v7152_v56, %v7149_v44  ;;  %v1320_v12 = vsub.s32 32, %v1319_v3  ;;  %v1493_v36 = vsel %vm1487_vm15, %v1490_v49, %v1492_v23  ;;  %v6485_v10 = vpop.eup %6484 }
 0x191   : > { %v3609_v52 = vadd.s32 3, %v1440_v37  ;;  %v1324_v17 = vsub.s32 4294967266, %v1319_v3  ;;  %v1337_v22 = vsel %vm7241_vm3, 0, %v1335_v29  ;;  %v1512_v55 = vadd.s32 1, %v7265_v19 }
 0x192   : > { %v3406_v34 = vsel %vm3404_vm5, %v7224_v53, %v1241_v18  ;;  %v3409_v27 = vsel %vm3407_vm6, %v1244_v15, %v6481_v50  ;;  %v1322_v44 = vshrl.u32 %v1304_v38, %v1320_v12  ;;  %v1561_v56 = vshrl.u32 %v1560_v62, 23 }
 0x193   : > { %v1247_v35 = vsel %vm1237_vm4, nan, %v1246_v48  ;;  %v1321_v6 = vshll.u32 %v7220_v7, %v1319_v3  ;;  %v1325_v32 = vadd.s32 127, %v1324_v17  ;;  %v1509_v33 = vmul.u32 %v1502_v47, %v1493_v36 }
 0x194   : > { %v1447_v37 = vxor.u32 2147483648, %v6485_v10  ;;  %v1450_v43 = vxor.u32 2147483648, %v6483_v41  ;;  %vm1511_vm10 = vc.u32 %v7290_v21, %v7264_v9  ;;  %v6022_v49 = vadd.s32 4294967169, %v1561_v56 }
 0x195   : > { %vm1443_vm11 = vweird.f32 %v6993_v25  ;;  %vm1446_vm12 = vcmp.eq.s32.totalorder %v1444_v5, 0  ;;  %v1323_v53 = vor.u32 %v1322_v44, %v1321_v6  ;;  %v1326_v50 = vshll.u32 %v1325_v32, 23 }
 0x196   : > { %v1513_v18 = vsel %vm1511_vm10, %v1512_v55, %v7265_v19  ;;  %v3410_v15 = vsel %vm3403_vm7, %v3406_v34, %v3409_v27  ;;  %v5513_v42 = vrot.slane %v1247_v35, 1  ;;  %v1567_v60 = vadd.s32 1, %v6022_v49 }
 0x197   : > { %v1514_v7 = vadd.s32 %v1513_v18, %v1509_v33  ;;  %vm1449_vm13 = vcmp.eq.s32.totalorder %v1444_v5, 2  ;;  %v7315_v47 = vand.u32 3, %v3609_v52  ;;  %v1327_v23 = vor.u32 4788187, %v1326_v50 }
 0x198   : > { %v3505_v20 = vadd.s32 3, %v1337_v22  ;;  %v1448_v29 = vsel %vm1446_vm12, %v6483_v41, %v1447_v37  ;;  %v1451_v46 = vsel %vm1449_vm13, %v1450_v43, %v6485_v10  ;;  %vm1568_vm15 = vcmp.gt.s32.totalorder %v1567_v60, 0 }
 0x199   : > { %v1515_v62 = vadd.s32 536870912, %v1514_v7  ;;  %v3411_v3 = vsel %vm1237_vm4, nan, %v3410_v15  ;;  %v1328_v59 = vand.u32 2147483647, %v1327_v23  ;;  %v1330_v19 = vcvt.s32.f32 %v1323_v53 }
 0x19a   : > { %v1569_v48 = vsel %vm1568_vm15, %v1567_v60, 0  ;;  %v5556_v26 = vsel %vm5555_vm9, %v5513_v42, %v3411_v3  ;;  %vm1445_vm0 = vcmp.lt.s32.totalorder %v1444_v5, 2  ;;  %vm3612_vm1 = vcmp.eq.s32.totalorder %v7315_v47, 0  ;;  %v7370_v3 = vpop.f32.mrb[9].mxu0 }
 0x19b   : > { %v7320_v38 = vshrl.u32 %v1515_v62, 30  ;;  %v1571_v12 = vand.u32 31, %v1569_v48  ;;  %v1452_v36 = vsel %vm1445_vm0, %v1448_v29, %v1451_v46  ;;  %vm3615_vm2 = vcmp.eq.s32.totalorder %v7315_v47, 2 }
 0x19c   : > { %v1331_v52 = vmul.f32 %v1330_v19, %v1328_v59  ;;  %v7324_v17 = vand.u32 3, %v1337_v22  ;;  %v1564_v34 = vand.u32 8388607, %v1557_v8  ;;  %v7332_v5 = vmul.f32 %v5580_v1, %v5556_v26 }
 0x19d   : > { %v1517_v55 = vshll.u32 %v7320_v38, 30  ;;  %v1572_v27 = vsub.s32 32, %v1571_v12  ;;  %v7334_v44 = vsel %vm3615_vm2, %v1450_v43, %v6485_v10  ;;  %v7336_v35 = vand.u32 3, %v3505_v20 }
 0x19e   : > { %v1332_v56 = vxor.u32 2147483648, %v1331_v52  ;;  %v7340_v22 = vsel %vm1443_vm11, nan, %v1452_v36  ;;  %v7342_v6 = vsel %vm3612_vm1, %v6483_v41, %v1447_v37  ;;  %v7346_v32 = vadd.s32 %v7264_v9, %v7290_v21  ;;  %v897_v36 = vpop.f32.mrb[10].mxu0 }
 0x19f   : > { %v7348_v33 = vsub.s32 %v1514_v7, %v1517_v55  ;;  %v1575_v1 = vshrl.u32 %v6701_v61, %v1572_v27  ;;  %v1578_v10 = vshrl.u32 %v6702_v63, %v1572_v27  ;;  %v1581_v43 = vshrl.u32 %v6703_v2, %v1572_v27  ;;  %v898_v55 = vpop.f32.mrb[11].mxu0 }
 0x1a0   : > { %v1333_v24 = vsel %vm1250_vm14, %v1332_v56, %v1331_v52  ;;  %v1565_v49 = vor.u32 8388608, %v1564_v34  ;;  %v1766_v9 = vand.u32 2139095040, %v7030_v14  ;;  %v1574_v21 = vshll.u32 %v6700_v57, %v1571_v12 }
 0x1a1   : > { %v1336_v41 = vsel %vm7241_vm3, %v6997_v28, %v1333_v24  ;;  %v1520_v37 = vsub.s32 0, %v7348_v33  ;;  %v1577_v53 = vshll.u32 %v6701_v61, %v1571_v12  ;;  %v1580_v50 = vshll.u32 %v6702_v63, %v1571_v12 }
 0x1a2   : > { %6486 = vcosq.f32 %v1336_v41  ;;  %v1570_v15 = vshrl.u32 %v1569_v48, 5  ;;  %v1583_v42 = vshll.u32 %v6703_v2, %v1571_v12  ;;  %v1576_v51 = vor.u32 %v1575_v1, %v1574_v21 }
 0x1a3   : > { %6488 = vsinq.f32 %v1336_v41  ;;  %v6019_v18 = vmin.u32 %v1520_v37, %v7348_v33  ;;  %v1579_v7 = vor.u32 %v1578_v10, %v1577_v53  ;;  %v1582_v60 = vor.u32 %v1581_v43, %v1580_v50 }
 0x1a4   : > { %v1584_v23 = vshrl.u32 %v6704_v4, %v1572_v27  ;;  %v1586_v29 = vshll.u32 %v6704_v4, %v1571_v12  ;;  %v1587_v46 = vshrl.u32 %v6705_v11, %v1572_v27  ;;  %v7368_v62 = vshll.u32 %v1565_v49, 8 }
 0x1a5   : > { %v1522_v20 = vclz %v6019_v18  ;;  %vm1346_vm14 = vcmp.eq.s32.totalorder %v7324_v17, 2  ;;  %vm3511_vm3 = vcmp.eq.s32.totalorder %v7336_v35, 2  ;;  %v1540_v59 = vsub.s32 4, %v7320_v38 }
 0x1a6   : > { %v1573_v19 = vshrl.u32 %v6700_v57, %v1572_v27  ;;  %v1585_v48 = vor.u32 %v1584_v23, %v1583_v42  ;;  %v1767_v26 = vshrl.u32 %v1766_v9, 23  ;;  %vm1343_vm4 = vcmp.eq.s32.totalorder %v7324_v17, 0 }
 0x1a7   : > { %vm3508_vm5 = vcmp.eq.s32.totalorder %v7336_v35, 0  ;;  %v6020_v12 = vadd.s32 4294967294, %v1522_v20  ;;  %v1588_v52 = vor.u32 %v1587_v46, %v1586_v29  ;;  %vm1589_vm6 = vcmp.lt.s32.totalorder %v1570_v15, 1 }
 0x1a8   : > { %vm1592_vm7 = vcmp.lt.s32.totalorder %v1570_v15, 4  ;;  %vm1342_vm8 = vcmp.lt.s32.totalorder %v7324_v17, 2  ;;  %vm3507_vm10 = vcmp.lt.s32.totalorder %v7336_v35, 2  ;;  %vm1456_vm12 = vcmp.lt.s32.totalorder %v7001_v31, 0 }
 0x1a9   : > { %vm1591_vm13 = vcmp.lt.s32.totalorder %v1570_v15, 3  ;;  %v1594_v34 = vsel %vm1592_vm7, %v1582_v60, 2102212464  ;;  %v1597_v27 = vsel %vm1589_vm6, %v1576_v51, %v1579_v7  ;;  %v1598_v56 = vsel %vm1592_vm7, %v1585_v48, 920167782 }
 0x1aa   : > { %vm1340_vm15 = vweird.f32 %v6997_v28  ;;  %vm6021_vm0 = vcmp.lt.s32.totalorder %v6020_v12, 0  ;;  %vm1590_vm1 = vcmp.lt.s32.totalorder %v1570_v15, 2  ;;  %v1599_v24 = vsel %vm1591_vm13, %v1582_v60, %v1598_v56 }
 0x1ab   : > { %v1601_v1 = vsel %vm1589_vm6, %v1579_v7, %v1582_v60  ;;  %v1525_v10 = vsel %vm6021_vm0, 0, %v6020_v12  ;;  %v1593_v43 = vsel %vm1589_vm6, %v1573_v19, %v1576_v51  ;;  %v1600_v41 = vsel %vm1590_vm1, %v1597_v27, %v1599_v24 }
 0x1ac   : > { %v1602_v37 = vsel %vm1592_vm7, %v1588_v52, 1326507024  ;;  %v1526_v49 = vsub.s32 32, %v1525_v10  ;;  %v1530_v9 = vsub.s32 4294967266, %v1525_v10  ;;  %v1595_v21 = vsel %vm1591_vm13, %v1579_v7, %v1594_v34  ;;  %v6487_v50 = vpop.eup %6486 }
 0x1ad   : > { %v1603_v53 = vsel %vm1591_vm13, %v1585_v48, %v1602_v37  ;;  %vm7394_vm2 = vcmp.le.f32.partialorder %v1454_v16, 0.7853982  ;;  %v1527_v42 = vshll.u32 %v7348_v33, %v1525_v10  ;;  %v6489_v20 = vpop.eup %6488  ;;  %v1347_v7 = vxor.u32 2147483648, %v6487_v50 }
 0x1ae   : > { %v1604_v51 = vsel %vm1590_vm1, %v1601_v1, %v1603_v53  ;;  %v7401_v60 = vmul.u32.u64.low %v7368_v62, %v1600_v41  ;;  %v7402_v23 = vmul.u32.u64.high %v7368_v62, %v1600_v41, %v7401_v60  ;;  %v1528_v29 = vshrl.u32 %v7346_v32, %v1526_v49 }
 0x1af   : > { %v1531_v46 = vadd.s32 127, %v1530_v9  ;;  %v6030_v19 = vadd.s32 4294967169, %v1767_v26  ;;  %v1344_v48 = vxor.u32 2147483648, %v6489_v20  ;;  %v1596_v16 = vsel %vm1590_vm1, %v1593_v43, %v1595_v21 }
 0x1b0   : > { %v7408_v36 = vmul.u32.u64.low %v7368_v62, %v1604_v51  ;;  %v7409_v12 = vmul.u32.u64.high %v7368_v62, %v1604_v51, %v7408_v36  ;;  %v1348_v33 = vsel %vm1346_vm14, %v1347_v7, %v6489_v20  ;;  %v3513_v52 = vsel %vm3511_vm3, %v1347_v7, %v6489_v20 }
 0x1b1   : > { %v1529_v55 = vor.u32 %v1528_v29, %v1527_v42  ;;  %v1532_v34 = vshll.u32 %v1531_v46, 23  ;;  %v1345_v32 = vsel %vm1343_vm4, %v6487_v50, %v1344_v48  ;;  %v3510_v26 = vsel %vm3508_vm5, %v6487_v50, %v1344_v48 }
 0x1b2   : > { %v1615_v15 = vadd.s32 1, %v7402_v23  ;;  %v1773_v27 = vadd.s32 1, %v6030_v19  ;;  %v1349_v56 = vsel %vm1342_vm8, %v1345_v32, %v1348_v33  ;;  %v3514_v24 = vsel %vm3507_vm10, %v3510_v26, %v3513_v52 }
 0x1b3   : > { %v1533_v1 = vor.u32 4788187, %v1532_v34  ;;  %v1541_v10 = vsel %vm1456_vm12, %v1540_v59, %v7320_v38  ;;  %v1350_v43 = vsel %vm1340_vm15, nan, %v1349_v56  ;;  %v1536_v41 = vcvt.s32.f32 %v1529_v55 }
 0x1b4   : > { %v1612_v37 = vmul.u32 %v7368_v62, %v1596_v16  ;;  %vm1614_vm14 = vc.u32 %v7409_v12, %v7401_v60  ;;  %v5514_v49 = vrot.slane %v1350_v43, 1  ;;  %vm1774_vm3 = vcmp.gt.s32.totalorder %v1773_v27, 0 }
 0x1b5   : > { %v1534_v17 = vand.u32 2147483647, %v1533_v1  ;;  %v1616_v9 = vsel %vm1614_vm14, %v1615_v15, %v7402_v23  ;;  %v3515_v35 = vsel %vm1340_vm15, nan, %v3514_v24  ;;  %v1763_v38 = vand.u32 2147483647, %v7030_v14 }
 0x1b6   : > { %v1617_v21 = vadd.s32 %v1616_v9, %v1612_v37  ;;  %v1775_v59 = vsel %vm1774_vm3, %v1773_v27, 0  ;;  %v5557_v53 = vsel %vm5555_vm9, %v5514_v49, %v3515_v35  ;;  %v1543_v62 = vsel %vm7394_vm2, 0, %v1541_v10 }
 0x1b7   : > { %v1537_v50 = vmul.f32 %v1536_v41, %v1534_v17  ;;  %v1777_v42 = vand.u32 31, %v1775_v59  ;;  %vm3611_vm4 = vcmp.lt.s32.totalorder %v7315_v47, 2  ;;  %v5588_v51 = vrot.slane %v6993_v25, %v7102_v54 }
 0x1b8   : > { %v7445_v23 = vmul.f32 %v5584_v39, %v5557_v53  ;;  %v1618_v20 = vadd.s32 536870912, %v1617_v21  ;;  %v3618_v7 = vsel %vm3611_vm4, %v7342_v6, %v7334_v44  ;;  %v5515_v29 = vrot.slane %v7340_v22, 1 }
 0x1b9   : > { %v1538_v46 = vxor.u32 2147483648, %v1537_v50  ;;  %v1778_v19 = vsub.s32 32, %v1777_v42  ;;  %v7452_v47 = vand.u32 3, %v1543_v62  ;;  %v1770_v28 = vand.u32 8388607, %v1763_v38 }
 0x1ba   : > { %v5703_v48 = vcombine.low %v7332_v5, %v7445_v23  ;;  %v7454_v16 = vshrl.u32 %v1618_v20, 30  ;;  %v3713_v36 = vadd.s32 3, %v1543_v62  ;;  %v7460_v33 = vshrl.u32 %v1775_v59, 5  ;;  %v7495_v62 = vpop.f32.mrb[9].mxu1 }
 0x1bb   : > { %v1539_v39 = vsel %vm1456_vm12, %v1538_v46, %v1537_v50  ;;  %v1780_v44 = vshll.u32 %v6700_v57, %v1777_v42  ;;  %v1786_v52 = vshll.u32 %v6702_v63, %v1777_v42  ;;  %v1789_v55 = vshll.u32 %v6703_v2, %v1777_v42 }
 0x1bc   : > { %v1542_v22 = vsel %vm7394_vm2, %v7001_v31, %v1539_v39  ;;  %v1620_v6 = vshll.u32 %v7454_v16, 30  ;;  %v1783_v34 = vshll.u32 %v6701_v61, %v1777_v42  ;;  %v1784_v32 = vshrl.u32 %v6702_v63, %v1778_v19 }
 0x1bd   : > { %6490 = vcosq.f32 %v1542_v22  ;;  %v1787_v26 = vshrl.u32 %v6703_v2, %v1778_v19  ;;  %v1781_v27 = vshrl.u32 %v6701_v61, %v1778_v19  ;;  %v1790_v18 = vshrl.u32 %v6704_v4, %v1778_v19 }
 0x1be   : > { %6492 = vsinq.f32 %v1542_v22  ;;  %v7472_v15 = vsub.s32 %v1617_v21, %v1620_v6  ;;  %v7476_v56 = vand.u32 3, %v3713_v36  ;;  %v5592_v24 = vrot.slane %v7001_v31, %v7102_v54 }
 0x1bf   : > { %v1792_v1 = vshll.u32 %v6704_v4, %v1777_v42  ;;  %v1793_v10 = vshrl.u32 %v6705_v11, %v1778_v19  ;;  %v3619_v43 = vsel %vm1443_vm11, nan, %v3618_v7  ;;  %v1788_v37 = vor.u32 %v1787_v26, %v1786_v52 }
 0x1c0   : > { %v1623_v41 = vsub.s32 0, %v7472_v15  ;;  %v1791_v49 = vor.u32 %v1790_v18, %v1789_v55  ;;  %v5558_v17 = vsel %vm5555_vm9, %v5515_v29, %v3619_v43  ;;  %v1771_v9 = vor.u32 8388608, %v1770_v28  ;;  %v938_v29 = vpop.f32.mrb[10].mxu1 }
 0x1c1   : > { %v1779_v35 = vshrl.u32 %v6700_v57, %v1778_v19  ;;  %v1785_v21 = vor.u32 %v1784_v32, %v1783_v34  ;;  %vm1549_vm5 = vcmp.eq.s32.totalorder %v7452_v47, 0  ;;  %v1782_v53 = vor.u32 %v1781_v27, %v1780_v44  ;;  %v939_v28 = vpop.f32.mrb[11].mxu1 }
 0x1c2   : > { %v6023_v59 = vmin.u32 %v1623_v41, %v7472_v15  ;;  %v1794_v50 = vor.u32 %v1793_v10, %v1792_v1  ;;  %vm1795_vm6 = vcmp.lt.s32.totalorder %v7460_v33, 1  ;;  %vm1548_vm11 = vcmp.lt.s32.totalorder %v7452_v47, 2 }
 0x1c3   : > { %vm1552_vm7 = vcmp.eq.s32.totalorder %v7452_v47, 2  ;;  %vm3715_vm8 = vcmp.lt.s32.totalorder %v7476_v56, 2  ;;  %vm3716_vm10 = vcmp.eq.s32.totalorder %v7476_v56, 0  ;;  %vm1798_vm12 = vcmp.lt.s32.totalorder %v7460_v33, 4 }
 0x1c4   : > { %vm1546_vm13 = vweird.f32 %v7001_v31  ;;  %v1625_v42 = vclz %v6023_v59  ;;  %vm1797_vm15 = vcmp.lt.s32.totalorder %v7460_v33, 3  ;;  %v1800_v20 = vsel %vm1798_vm12, %v1788_v37, 2102212464 }
 0x1c5   : > { %v1804_v7 = vsel %vm1798_vm12, %v1791_v49, 920167782  ;;  %vm3719_vm0 = vcmp.eq.s32.totalorder %v7476_v56, 2  ;;  %v1613_v46 = vadd.s32 %v7401_v60, %v7409_v12  ;;  %vm1796_vm1 = vcmp.lt.s32.totalorder %v7460_v33, 2 }
 0x1c6   : > { %v1807_v19 = vsel %vm1795_vm6, %v1785_v21, %v1788_v37  ;;  %v6024_v39 = vadd.s32 4294967294, %v1625_v42  ;;  %v1799_v36 = vsel %vm1795_vm6, %v1779_v35, %v1782_v53  ;;  %v1808_v44 = vsel %vm1798_vm12, %v1794_v50, 1326507024 }
 0x1c7   : > { %v1811_v22 = vshll.u32 %v1771_v9, 8  ;;  %v6491_v6 = vpop.eup %6490  ;;  %v1801_v52 = vsel %vm1797_vm15, %v1785_v21, %v1800_v20  ;;  %v1803_v55 = vsel %vm1795_vm6, %v1782_v53, %v1785_v21  ;;  %v1805_v60 = vsel %vm1797_vm15, %v1788_v37, %v1804_v7 }
 0x1c8   : > { %v1809_v12 = vsel %vm1797_vm15, %v1791_v49, %v1808_v44  ;;  %v6493_v34 = vpop.eup %6492  ;;  %v1553_v32 = vxor.u32 2147483648, %v6491_v6  ;;  %vm6025_vm2 = vcmp.lt.s32.totalorder %v6024_v39, 0  ;;  %v1663_v27 = vand.u32 2139095040, %v7032_v0 }
 0x1c9   : > { %v1810_v26 = vsel %vm1796_vm1, %v1807_v19, %v1809_v12  ;;  %v1550_v18 = vxor.u32 2147483648, %v6493_v34  ;;  %v1628_v1 = vsel %vm6025_vm2, 0, %v6024_v39  ;;  %v1806_v9 = vsel %vm1796_vm1, %v1803_v55, %v1805_v60 }
 0x1ca   : > { %v7518_v10 = vmul.u32.u64.low %v1811_v22, %v1810_v26  ;;  %v7519_v43 = vmul.u32.u64.high %v1811_v22, %v1810_v26, %v7518_v10  ;;  %v1554_v41 = vsel %vm1552_vm7, %v1553_v32, %v6493_v34  ;;  %v3721_v37 = vsel %vm3719_vm0, %v1553_v32, %v6493_v34 }
 0x1cb   : > { %v1629_v49 = vsub.s32 32, %v1628_v1  ;;  %v1551_v35 = vsel %vm1549_vm5, %v6491_v6, %v1550_v18  ;;  %v3718_v21 = vsel %vm3716_vm10, %v6491_v6, %v1550_v18  ;;  %v1633_v59 = vsub.s32 4294967266, %v1628_v1 }
 0x1cc   : > { %v1664_v53 = vshrl.u32 %v1663_v27, 23  ;;  %v5663_v50 = vmul.f32 %v5588_v51, %v5558_v17  ;;  %v1555_v42 = vsel %vm1548_vm11, %v1551_v35, %v1554_v41  ;;  %v3722_v20 = vsel %vm3715_vm8, %v3718_v21, %v3721_v37 }
 0x1cd   : > { %v1631_v7 = vshrl.u32 %v1613_v46, %v1629_v49  ;;  %v1556_v29 = vsel %vm1546_vm13, nan, %v1555_v42  ;;  %v1630_v19 = vshll.u32 %v7472_v15, %v1628_v1  ;;  %v1634_v28 = vadd.s32 127, %v1633_v59 }
 0x1ce   : > { %v6026_v39 = vadd.s32 4294967169, %v1664_v53  ;;  %v5516_v44 = vrot.slane %v1556_v29, 1  ;;  %v1802_v25 = vsel %vm1796_vm1, %v1799_v36, %v1801_v52  ;;  %v3723_v47 = vsel %vm1546_vm13, nan, %v3722_v20 }
 0x1cf   : > { %v7543_v51 = vmul.u32.u64.low %v1811_v22, %v1806_v9  ;;  %v7544_v17 = vmul.u32.u64.high %v1811_v22, %v1806_v9, %v7543_v51  ;;  %v1632_v56 = vor.u32 %v1631_v7, %v1630_v19  ;;  %v1635_v46 = vshll.u32 %v1634_v28, 23 }
 0x1d0   : > { %v1670_v6 = vadd.s32 1, %v6026_v39  ;;  %v5559_v55 = vsel %vm5555_vm9, %v5516_v44, %v3723_v47  ;;  %v5711_v33 = vrot.slane %v5703_v48, %v7164_v40  ;;  %v1818_v36 = vmul.u32 %v1811_v22, %v1802_v25 }
 0x1d1   : > { %v5664_v15 = vmul.f32 %v5592_v24, %v5559_v55  ;;  %v1636_v60 = vor.u32 4788187, %v1635_v46  ;;  %vm1820_vm14 = vc.u32 %v7519_v43, %v7543_v51  ;;  %v1821_v52 = vadd.s32 1, %v7544_v17 }
 0x1d2   : > { %vm1671_vm3 = vcmp.gt.s32.totalorder %v1670_v6, 0  ;;  %v1639_v26 = vcvt.s32.f32 %v1632_v56  ;;  %v1660_v27 = vand.u32 2147483647, %v7032_v0  ;;  %vm1559_vm4 = vcmp.lt.s32.totalorder %v7028_v13, 0 }
 0x1d3   : > { %v1672_v12 = vsel %vm1671_vm3, %v1670_v6, 0  ;;  %v5704_v34 = vcombine.low %v5663_v50, %v5664_v15  ;;  %v1637_v32 = vand.u32 2147483647, %v1636_v60  ;;  %v1822_v24 = vsel %vm1820_vm14, %v1821_v52, %v7544_v17 }
 0x1d4   : > { %v1674_v31 = vand.u32 31, %v1672_v12  ;;  %v1823_v10 = vadd.s32 %v1822_v24, %v1818_v36  ;;  %v1667_v21 = vand.u32 8388607, %v1660_v27  ;;  %v1673_v28 = vshrl.u32 %v1672_v12, 5 }
 0x1d5   : > { %v5718_v18 = vrot.slane %v5704_v34, %v7164_v40  ;;  %v1640_v1 = vmul.f32 %v1639_v26, %v1637_v32  ;;  %vm7587_vm5 = vcmp.le.f32.partialorder %v1557_v8, 0.7853982  ;;  %v1643_v55 = vsub.s32 4, %v7454_v16 }
 0x1d6   : > { %v1675_v41 = vsub.s32 32, %v1674_v31  ;;  %v1824_v48 = vadd.s32 536870912, %v1823_v10  ;;  %v1677_v59 = vshll.u32 %v6700_v57, %v1674_v31  ;;  %v1680_v50 = vshll.u32 %v6701_v61, %v1674_v31 }
 0x1d7   : > { %v5719_v5 = vcombine.low %v5711_v33, %v5718_v18  ;;  %v1641_v23 = vxor.u32 2147483648, %v1640_v1  ;;  %v1683_v42 = vshll.u32 %v6702_v63, %v1674_v31  ;;  %v1686_v20 = vshll.u32 %v6703_v2, %v1674_v31 }
 0x1d8   : > { %v1678_v22 = vshrl.u32 %v6701_v61, %v1675_v41  ;;  %v1681_v37 = vshrl.u32 %v6702_v63, %v1675_v41  ;;  %v1684_v49 = vshrl.u32 %v6703_v2, %v1675_v41  ;;  %v1687_v9 = vshrl.u32 %v6704_v4, %v1675_v41 }
 0x1d9   : > { %5801 = vst [vmem:[%s7569_s23] sm:$0xff] %v5719_v5  ;;  %v7572_v35 = vshrl.u32 %v1824_v48, 30  ;;  %v1690_v53 = vshrl.u32 %v6705_v11, %v1675_v41  ;;  %v1689_v7 = vshll.u32 %v6704_v4, %v1674_v31  ;;  %v1642_v29 = vsel %vm1559_vm4, %v1641_v23, %v1640_v1 }
 0x1da   : > { %v1679_v39 = vor.u32 %v1678_v22, %v1677_v59  ;;  %v1682_v44 = vor.u32 %v1681_v37, %v1680_v50  ;;  %v1685_v25 = vor.u32 %v1684_v49, %v1683_v42  ;;  %v1688_v17 = vor.u32 %v1687_v9, %v1686_v20 }
 0x1db   : > { %v1826_v19 = vshll.u32 %v7572_v35, 30  ;;  %v1691_v47 = vor.u32 %v1690_v53, %v1689_v7  ;;  %v1668_v6 = vor.u32 8388608, %v1667_v21  ;;  %v1645_v15 = vsel %vm7587_vm5, %v7028_v13, %v1642_v29 }
 0x1dc   : > { %vm1692_vm6 = vcmp.lt.s32.totalorder %v1673_v28, 1  ;;  %vm1695_vm11 = vcmp.lt.s32.totalorder %v1673_v28, 4  ;;  %v1869_v33 = vand.u32 2139095040, %v7055_v58  ;;  %6494 = vcosq.f32 %v1645_v15 }
 0x1dd   : > { %v1827_v46 = vsub.s32 %v1823_v10, %v1826_v19  ;;  %v1700_v36 = vsel %vm1692_vm6, %v1679_v39, %v1682_v44  ;;  %v1701_v8 = vsel %vm1695_vm11, %v1688_v17, 920167782  ;;  %v1704_v52 = vsel %vm1692_vm6, %v1682_v44, %v1685_v25 }
 0x1de   : > { %v1705_v12 = vsel %vm1695_vm11, %v1691_v47, 1326507024  ;;  %vm1694_vm7 = vcmp.lt.s32.totalorder %v1673_v28, 3  ;;  %v1708_v32 = vshll.u32 %v1668_v6, 8  ;;  %6496 = vsinq.f32 %v1645_v15  ;;  %v7633_v15 = vpop.f32.mrb[12].mxu0 }
 0x1df   : > { %v1829_v60 = vsub.s32 0, %v1827_v46  ;;  %vm1693_vm8 = vcmp.lt.s32.totalorder %v1673_v28, 2  ;;  %v1702_v26 = vsel %vm1694_vm7, %v1685_v25, %v1701_v8  ;;  %v1706_v31 = vsel %vm1694_vm7, %v1688_v17, %v1705_v12 }
 0x1e0   : > { %v1703_v18 = vsel %vm1693_vm8, %v1700_v36, %v1702_v26  ;;  %v1707_v1 = vsel %vm1693_vm8, %v1704_v52, %v1706_v31  ;;  %v1870_v10 = vshrl.u32 %v1869_v33, 23  ;;  %v1644_v5 = vsel %vm1559_vm4, %v1643_v55, %v7454_v16 }
 0x1e1   : > { %v6031_v34 = vmin.u32 %v1829_v60, %v1827_v46  ;;  %v1676_v23 = vshrl.u32 %v6700_v57, %v1675_v41  ;;  %v1697_v48 = vsel %vm1695_vm11, %v1685_v25, 2102212464  ;;  %v1646_v53 = vsel %vm7587_vm5, 0, %v1644_v5 }
 0x1e2   : > { %v7609_v37 = vmul.u32.u64.low %v1708_v32, %v1707_v1  ;;  %v7610_v49 = vmul.u32.u64.high %v1708_v32, %v1707_v1, %v7609_v37  ;;  %v6034_v9 = vadd.s32 4294967169, %v1870_v10  ;;  %v1698_v16 = vsel %vm1694_vm7, %v1682_v44, %v1697_v48 }
 0x1e3   : > { %v1831_v24 = vclz %v6031_v34  ;;  %v7612_v21 = vmul.u32.u64.low %v1708_v32, %v1703_v18  ;;  %v7613_v59 = vmul.u32.u64.high %v1708_v32, %v1703_v18, %v7612_v21  ;;  %v1696_v50 = vsel %vm1692_vm6, %v1676_v23, %v1679_v39 }
 0x1e4   : > { %v1866_v42 = vand.u32 2147483647, %v7055_v58  ;;  %v1876_v20 = vadd.s32 1, %v6034_v9  ;;  %v5596_v7 = vrot.slane %v7028_v13, %v7102_v54  ;;  %v1819_v29 = vadd.s32 %v7543_v51, %v7519_v43 }
 0x1e5   : > { %v6032_v22 = vadd.s32 4294967294, %v1831_v24  ;;  %v7625_v25 = vand.u32 3, %v1646_v53  ;;  %v3817_v17 = vadd.s32 3, %v1646_v53  ;;  %v1699_v56 = vsel %vm1693_vm8, %v1696_v50, %v1698_v16 }
 0x1e6   : > { %v7628_v39 = vpop.eup %6494  ;;  %v1849_v55 = vsub.s32 4, %v7572_v35  ;;  %vm1717_vm12 = vc.u32 %v7610_v49, %v7612_v21  ;;  %v1718_v51 = vadd.s32 1, %v7613_v59  ;;  %v7640_v28 = vand.u32 8388607, %v1866_v42 }
 0x1e7   : > { %vm6033_vm10 = vcmp.lt.s32.totalorder %v6032_v22, 0  ;;  %vm1877_vm13 = vcmp.gt.s32.totalorder %v1876_v20, 0  ;;  %vm1765_vm15 = vcmp.lt.s32.totalorder %v7030_v14, 0  ;;  %v1715_v33 = vmul.u32 %v1708_v32, %v1699_v56 }
 0x1e8   : > { %v1834_v41 = vsel %vm6033_vm10, 0, %v6032_v22  ;;  %v7635_v60 = vpop.eup %6496  ;;  %v1878_v36 = vsel %vm1877_vm13, %v1876_v20, 0  ;;  %vm1652_vm0 = vcmp.eq.s32.totalorder %v7625_v25, 0  ;;  %vm1655_vm1 = vcmp.eq.s32.totalorder %v7625_v25, 2 }
 0x1e9   : > { %v1835_v19 = vsub.s32 32, %v1834_v41  ;;  %v1839_v47 = vsub.s32 4294967266, %v1834_v41  ;;  %v1836_v44 = vshll.u32 %v1827_v46, %v1834_v41  ;;  %v1719_v52 = vsel %vm1717_vm12, %v1718_v51, %v7613_v59 }
 0x1ea   : > { %vm1651_vm2 = vcmp.lt.s32.totalorder %v7625_v25, 2  ;;  %v7647_v12 = vand.u32 3, %v3817_v17  ;;  %vm7651_vm14 = vcmp.le.f32.partialorder %v1763_v38, 0.7853982  ;;  %v1850_v32 = vsel %vm1765_vm15, %v1849_v55, %v7572_v35 }
 0x1eb   : > { %v1837_v6 = vshrl.u32 %v1819_v29, %v1835_v19  ;;  %v1840_v43 = vadd.s32 127, %v1839_v47  ;;  %v1720_v26 = vadd.s32 %v1719_v52, %v1715_v33  ;;  %v1880_v31 = vand.u32 31, %v1878_v36 }
 0x1ec   : > { %v1653_v24 = vxor.u32 2147483648, %v7635_v60  ;;  %v1656_v18 = vxor.u32 2147483648, %v7628_v39  ;;  %v1874_v10 = vor.u32 8388608, %v7640_v28  ;;  %v7661_v48 = vshrl.u32 %v1878_v36, 5 }
 0x1ed   : > { %v1838_v46 = vor.u32 %v1837_v6, %v1836_v44  ;;  %v1841_v8 = vshll.u32 %v1840_v43, 23  ;;  %v1721_v23 = vadd.s32 536870912, %v1720_v26  ;;  %v1881_v38 = vsub.s32 32, %v1880_v31 }
 0x1ee   : > { %v1883_v37 = vshll.u32 %v6700_v57, %v1880_v31  ;;  %v1886_v9 = vshll.u32 %v6701_v61, %v1880_v31  ;;  %v1892_v35 = vshll.u32 %v6703_v2, %v1880_v31  ;;  %vm1649_vm3 = vweird.f32 %v7028_v13 }
 0x1ef   : > { %v1842_v1 = vor.u32 4788187, %v1841_v8  ;;  %v1845_v5 = vcvt.s32.f32 %v1838_v46  ;;  %vm3820_vm4 = vcmp.eq.s32.totalorder %v7647_v12, 0  ;;  %v7668_v59 = vshrl.u32 %v1721_v23, 30 }
 0x1f0   : > { %v1884_v53 = vshrl.u32 %v6701_v61, %v1881_v38  ;;  %v1887_v50 = vshrl.u32 %v6702_v63, %v1881_v38  ;;  %v1889_v16 = vshll.u32 %v6702_v63, %v1880_v31  ;;  %v1657_v41 = vsel %vm1655_vm1, %v1656_v18, %v7635_v60 }
 0x1f1   : > { %v1843_v22 = vand.u32 2147483647, %v1842_v1  ;;  %v1890_v29 = vshrl.u32 %v6703_v2, %v1881_v38  ;;  %v1893_v19 = vshrl.u32 %v6704_v4, %v1881_v38  ;;  %v1654_v17 = vsel %vm1652_vm0, %v7628_v39, %v1653_v24 }
 0x1f2   : > { %v1723_v47 = vshll.u32 %v7668_v59, 30  ;;  %v1895_v56 = vshll.u32 %v6704_v4, %v1880_v31  ;;  %v1896_v44 = vshrl.u32 %v6705_v11, %v1881_v38  ;;  %v1885_v55 = vor.u32 %v1884_v53, %v1883_v37  ;;  %v7699_v31 = vpop.f32.mrb[12].mxu1 }
 0x1f3   : > { %v1846_v20 = vmul.f32 %v1845_v5, %v1843_v22  ;;  %v1888_v43 = vor.u32 %v1887_v50, %v1886_v9  ;;  %v1894_v51 = vor.u32 %v1893_v19, %v1892_v35  ;;  %v1891_v46 = vor.u32 %v1890_v29, %v1889_v16 }
 0x1f4   : > { %v7684_v28 = vsub.s32 %v1720_v26, %v1723_v47  ;;  %vm1898_vm5 = vcmp.lt.s32.totalorder %v7661_v48, 1  ;;  %vm1901_vm6 = vcmp.lt.s32.totalorder %v7661_v48, 4  ;;  %v1658_v33 = vsel %vm1651_vm2, %v1654_v17, %v1657_v41 }
 0x1f5   : > { %v1847_v6 = vxor.u32 2147483648, %v1846_v20  ;;  %vm3823_vm11 = vcmp.eq.s32.totalorder %v7647_v12, 2  ;;  %v1852_v8 = vsel %vm7651_vm14, 0, %v1850_v32  ;;  %vm3819_vm7 = vcmp.lt.s32.totalorder %v7647_v12, 2 }
 0x1f6   : > { %v1726_v52 = vsub.s32 0, %v7684_v28  ;;  %v1897_v26 = vor.u32 %v1896_v44, %v1895_v56  ;;  %vm1899_vm8 = vcmp.lt.s32.totalorder %v7661_v48, 2  ;;  %vm1900_vm10 = vcmp.lt.s32.totalorder %v7661_v48, 3 }
 0x1f7   : > { %v1848_v36 = vsel %vm1765_vm15, %v1847_v6, %v1846_v20  ;;  %v1882_v1 = vshrl.u32 %v6700_v57, %v1881_v38  ;;  %v1906_v32 = vsel %vm1898_vm5, %v1885_v55, %v1888_v43  ;;  %v1907_v5 = vsel %vm1901_vm6, %v1894_v51, 920167782 }
 0x1f8   : > { %v1851_v25 = vsel %vm7651_vm14, %v7030_v14, %v1848_v36  ;;  %v3825_v23 = vsel %vm3823_vm11, %v1656_v18, %v7635_v60  ;;  %vm1662_vm12 = vcmp.lt.s32.totalorder %v7032_v0, 0  ;;  %v6027_v22 = vmin.u32 %v1726_v52, %v7684_v28 }
 0x1f9   : > { %v1903_v37 = vsel %vm1901_vm6, %v1891_v46, 2102212464  ;;  %v1914_v9 = vshll.u32 %v1874_v10, 8  ;;  %v1659_v34 = vsel %vm1649_vm3, nan, %v1658_v33  ;;  %v3822_v38 = vsel %vm3820_vm4, %v7628_v39, %v1653_v24 }
 0x1fa   : > { %v1908_v35 = vsel %vm1900_vm10, %v1891_v46, %v1907_v5  ;;  %v1910_v60 = vsel %vm1898_vm5, %v1888_v43, %v1891_v46  ;;  %6498 = vcosq.f32 %v1851_v25  ;;  %v1728_v18 = vclz %v6027_v22 }
 0x1fb   : > { %v1909_v53 = vsel %vm1899_vm8, %v1906_v32, %v1908_v35  ;;  %v1911_v10 = vsel %vm1901_vm6, %v1897_v26, 1326507024  ;;  %6500 = vsinq.f32 %v1851_v25  ;;  %v1902_v50 = vsel %vm1898_vm5, %v1882_v1, %v1885_v55 }
 0x1fc   : > { %v1904_v39 = vsel %vm1900_vm10, %v1888_v43, %v1903_v37  ;;  %v1912_v24 = vsel %vm1900_vm10, %v1894_v51, %v1911_v10  ;;  %v6028_v16 = vadd.s32 4294967294, %v1728_v18  ;;  %v7739_v19 = vand.u32 3, %v1852_v8 }
 0x1fd   : > { %v1913_v41 = vsel %vm1899_vm8, %v1910_v60, %v1912_v24  ;;  %v7735_v20 = vmul.u32.u64.low %v1914_v9, %v1909_v53  ;;  %v7736_v29 = vmul.u32.u64.high %v1914_v9, %v1909_v53, %v7735_v20  ;;  %v1746_v17 = vsub.s32 4, %v7668_v59 }
 0x1fe   : > { %v7742_v47 = vmul.u32.u64.low %v1914_v9, %v1913_v41  ;;  %v7743_v56 = vmul.u32.u64.high %v1914_v9, %v1913_v41, %v7742_v47  ;;  %v4025_v44 = vadd.s32 3, %v1852_v8  ;;  %vm6029_vm13 = vcmp.lt.s32.totalorder %v6028_v16, 0 }
 0x1ff   : > { %v1905_v6 = vsel %vm1899_vm8, %v1902_v50, %v1904_v39  ;;  %v1972_v55 = vand.u32 2139095040, %v7166_v45  ;;  %v3826_v43 = vsel %vm3819_vm7, %v3822_v38, %v3825_v23  ;;  %v5517_v51 = vrot.slane %v1659_v34, 1 }
 0x200   : > { %v1716_v46 = vadd.s32 %v7612_v21, %v7610_v49  ;;  %v1731_v33 = vsel %vm6029_vm13, 0, %v6028_v16  ;;  %v1924_v26 = vadd.s32 1, %v7736_v29  ;;  %v1969_v8 = vand.u32 2147483647, %v7166_v45 }
 0x201   : > { %v1732_v36 = vsub.s32 32, %v1731_v33  ;;  %v1736_v52 = vsub.s32 4294967266, %v1731_v33  ;;  %v1747_v48 = vsel %vm1662_vm12, %v1746_v17, %v7668_v59  ;;  %v1921_v25 = vmul.u32 %v1914_v9, %v1905_v6 }
 0x202   : > { %vm1923_vm15 = vc.u32 %v7743_v56, %v7735_v20  ;;  %v1973_v12 = vshrl.u32 %v1972_v55, 23  ;;  %v1733_v1 = vshll.u32 %v7684_v28, %v1731_v33  ;;  %v5604_v5 = vrot.slane %v7030_v14, %v7102_v54 }
 0x203   : > { %v1734_v32 = vshrl.u32 %v1716_v46, %v1732_v36  ;;  %v1737_v49 = vadd.s32 127, %v1736_v52  ;;  %v1925_v21 = vsel %vm1923_vm15, %v1924_v26, %v7736_v29  ;;  %vm7765_vm0 = vcmp.le.f32.partialorder %v1660_v27, 0.7853982 }
 0x204   : > { %v1926_v59 = vadd.s32 %v1925_v21, %v1921_v25  ;;  %v6038_v22 = vadd.s32 4294967169, %v1973_v12  ;;  %v6499_v37 = vpop.eup %6498  ;;  %v1749_v28 = vsel %vm7765_vm0, 0, %v1747_v48  ;;  %v5600_v38 = vrot.slane %v7032_v0, %v7102_v54 }
 0x205   : > { %v1735_v9 = vor.u32 %v1734_v32, %v1733_v1  ;;  %v1738_v34 = vshll.u32 %v1737_v49, 23  ;;  %v6501_v35 = vpop.eup %6500  ;;  %v3827_v60 = vsel %vm1649_vm3, nan, %v3826_v43  ;;  %v1976_v27 = vand.u32 8388607, %v1969_v8 }
 0x206   : > { %v1927_v18 = vadd.s32 536870912, %v1926_v59  ;;  %v1979_v53 = vadd.s32 1, %v6038_v22  ;;  %v5560_v10 = vsel %vm5555_vm9, %v5517_v51, %v3827_v60  ;;  %vm1857_vm1 = vcmp.lt.s32.totalorder %v7739_v19, 2 }
 0x207   : > { %vm1858_vm2 = vcmp.eq.s32.totalorder %v7739_v19, 0  ;;  %v7780_v50 = vand.u32 3, %v4025_v44  ;;  %v1739_v39 = vor.u32 4788187, %v1738_v34  ;;  %v1862_v24 = vxor.u32 2147483648, %v6499_v37 }
 0x208   : > { %v3921_v16 = vadd.s32 3, %v1749_v28  ;;  %v1928_v41 = vshrl.u32 %v1927_v18, 30  ;;  %vm1980_vm14 = vcmp.gt.s32.totalorder %v1979_v53, 0  ;;  %v1859_v29 = vxor.u32 2147483648, %v6501_v35 }
 0x209   : > { %v1740_v17 = vand.u32 2147483647, %v1739_v39  ;;  %v1742_v47 = vcvt.s32.f32 %v1735_v9  ;;  %v1981_v6 = vsel %vm1980_vm14, %v1979_v53, 0  ;;  %vm1855_vm3 = vweird.f32 %v7030_v14 }
 0x20a   : > { %vm1861_vm4 = vcmp.eq.s32.totalorder %v7739_v19, 2  ;;  %v1929_v55 = vshll.u32 %v1928_v41, 30  ;;  %v1977_v43 = vor.u32 8388608, %v1976_v27  ;;  %v1983_v51 = vand.u32 31, %v1981_v6 }
 0x20b   : > { %vm4028_vm5 = vcmp.eq.s32.totalorder %v7780_v50, 0  ;;  %vm4031_vm6 = vcmp.eq.s32.totalorder %v7780_v50, 2  ;;  %v1743_v44 = vmul.f32 %v1742_v47, %v1740_v17  ;;  %v5608_v46 = vrot.slane %v7055_v58, %v7102_v54 }
 0x20c   : > { %v7791_v33 = vmul.f32 %v5596_v7, %v5560_v10  ;;  %v7793_v36 = vand.u32 3, %v1749_v28  ;;  %vm1868_vm11 = vcmp.lt.s32.totalorder %v7055_v58, 0  ;;  %v7796_v52 = vsub.s32 %v1926_v59, %v1929_v55 }
 0x20d   : > { %v1984_v26 = vsub.s32 32, %v1983_v51  ;;  %v1860_v48 = vsel %vm1858_vm2, %v6499_v37, %v1859_v29  ;;  %v1863_v25 = vsel %vm1861_vm4, %v1862_v24, %v6501_v35  ;;  %v1744_v12 = vxor.u32 2147483648, %v1743_v44 }
 0x20e   : > { %v7800_v1 = vand.u32 3, %v3921_v16  ;;  %v7802_v32 = vsel %vm4031_vm6, %v1862_v24, %v6501_v35  ;;  %v1922_v13 = vadd.s32 %v7735_v20, %v7743_v56  ;;  %v1932_v7 = vsub.s32 0, %v7796_v52 }
 0x20f   : > { %v7807_v49 = vshll.u32 %v1977_v43, 8  ;;  %v7811_v21 = vsel %vm4028_vm5, %v6499_v37, %v1859_v29  ;;  %v1745_v59 = vsel %vm1662_vm12, %v1744_v12, %v1743_v44  ;;  %v1987_v22 = vshrl.u32 %v6701_v61, %v1984_v26 }
 0x210   : > { %v1990_v9 = vshrl.u32 %v6702_v63, %v1984_v26  ;;  %v1864_v34 = vsel %vm1857_vm1, %v1860_v48, %v1863_v25  ;;  %v1748_v20 = vsel %vm7765_vm0, %v7032_v0, %v1745_v59  ;;  %v6035_v56 = vmin.u32 %v1932_v7, %v7796_v52  ;;  %v7849_v48 = vpop.f32.mrb[13].mxu0 }
 0x211   : > { %v1952_v28 = vsub.s32 4, %v1928_v41  ;;  %6502 = vcosq.f32 %v1748_v20  ;;  %v7823_v37 = vshrl.u32 %v1981_v6, 5  ;;  %v1986_v35 = vshll.u32 %v6700_v57, %v1983_v51 }
 0x212   : > { %v1989_v60 = vshll.u32 %v6701_v61, %v1983_v51  ;;  %6504 = vsinq.f32 %v1748_v20  ;;  %v1934_v18 = vclz %v6035_v56  ;;  %v1992_v27 = vshll.u32 %v6702_v63, %v1983_v51 }
 0x213   : > { %v1993_v19 = vshrl.u32 %v6703_v2, %v1984_v26  ;;  %v7831_v23 = vsel %vm1855_vm3, nan, %v1864_v34  ;;  %v1988_v53 = vor.u32 %v1987_v22, %v1986_v35  ;;  %v2178_v39 = vand.u32 2139095040, %v7258_v30 }
 0x214   : > { %v1991_v10 = vor.u32 %v1990_v9, %v1989_v60  ;;  %v6036_v24 = vadd.s32 4294967294, %v1934_v18  ;;  %v1995_v29 = vshll.u32 %v6703_v2, %v1983_v51  ;;  %v1996_v17 = vshrl.u32 %v6704_v4, %v1984_v26 }
 0x215   : > { %v1994_v16 = vor.u32 %v1993_v19, %v1992_v27  ;;  %vm1758_vm7 = vcmp.eq.s32.totalorder %v7793_v36, 2  ;;  %vm3927_vm8 = vcmp.eq.s32.totalorder %v7800_v1, 2  ;;  %v7840_v47 = vsel %vm1868_vm11, %v1952_v28, %v1928_v41 }
 0x216   : > { %v1985_v6 = vshrl.u32 %v6700_v57, %v1984_v26  ;;  %v1998_v55 = vshll.u32 %v6704_v4, %v1983_v51  ;;  %v1999_v43 = vshrl.u32 %v6705_v11, %v1984_v26  ;;  %vm1755_vm10 = vcmp.eq.s32.totalorder %v7793_v36, 0  ;;  %v979_v26 = vpop.f32.mrb[14].mxu0 }
 0x217   : > { %vm3924_vm12 = vcmp.eq.s32.totalorder %v7800_v1, 0  ;;  %vm6037_vm13 = vcmp.lt.s32.totalorder %v6036_v24, 0  ;;  %v1997_v44 = vor.u32 %v1996_v17, %v1995_v29  ;;  %vm2001_vm15 = vcmp.lt.s32.totalorder %v7823_v37, 1  ;;  %v980_v22 = vpop.f32.mrb[15].mxu0 }
 0x218   : > { %vm2002_vm0 = vcmp.lt.s32.totalorder %v7823_v37, 2  ;;  %vm1754_vm1 = vcmp.lt.s32.totalorder %v7793_v36, 2  ;;  %vm3923_vm2 = vcmp.lt.s32.totalorder %v7800_v1, 2  ;;  %v1937_v41 = vsel %vm6037_vm13, 0, %v6036_v24 }
 0x219   : > { %v2000_v51 = vor.u32 %v1999_v43, %v1998_v55  ;;  %vm2003_vm14 = vcmp.lt.s32.totalorder %v7823_v37, 3  ;;  %vm2004_vm4 = vcmp.lt.s32.totalorder %v7823_v37, 4  ;;  %vm4027_vm5 = vcmp.lt.s32.totalorder %v7780_v50, 2 }
 0x21a   : > { %vm1752_vm6 = vweird.f32 %v7032_v0  ;;  %v1938_v25 = vsub.s32 32, %v1937_v41  ;;  %v1942_v12 = vsub.s32 4294967266, %v1937_v41  ;;  %v2006_v7 = vsel %vm2004_vm4, %v1994_v16, 2102212464 }
 0x21b   : > { %v2009_v59 = vsel %vm2001_vm15, %v1988_v53, %v1991_v10  ;;  %v1939_v9 = vshll.u32 %v7796_v52, %v1937_v41  ;;  %v2010_v34 = vsel %vm2004_vm4, %v1997_v44, 920167782  ;;  %v2013_v20 = vsel %vm2001_vm15, %v1991_v10, %v1994_v16  ;;  %v6503_v52 = vpop.eup %6502 }
 0x21c   : > { %v2014_v56 = vsel %vm2004_vm4, %v2000_v51, 1326507024  ;;  %vm7864_vm13 = vcmp.le.f32.partialorder %v1866_v42, 0.7853982  ;;  %v1940_v35 = vshrl.u32 %v1922_v13, %v1938_v25  ;;  %v1943_v60 = vadd.s32 127, %v1942_v12  ;;  %v6505_v17 = vpop.eup %6504 }
 0x21d   : > { %v2011_v18 = vsel %vm2003_vm14, %v1994_v16, %v2010_v34  ;;  %v2015_v27 = vsel %vm2003_vm14, %v1997_v44, %v2014_v56  ;;  %v2005_v19 = vsel %vm2001_vm15, %v1985_v6, %v1988_v53  ;;  %v2007_v24 = vsel %vm2003_vm14, %v1991_v10, %v2006_v7 }
 0x21e   : > { %v2016_v42 = vsel %vm2002_vm0, %v2013_v20, %v2015_v27  ;;  %v2179_v29 = vshrl.u32 %v2178_v39, 23  ;;  %v1759_v13 = vxor.u32 2147483648, %v6503_v52  ;;  %v1941_v55 = vor.u32 %v1940_v35, %v1939_v9 }
 0x21f   : > { %v1944_v43 = vshll.u32 %v1943_v60, 23  ;;  %v2012_v16 = vsel %vm2002_vm0, %v2009_v59, %v2011_v18  ;;  %v1756_v41 = vxor.u32 2147483648, %v6505_v17  ;;  %v4034_v56 = vsel %vm4027_vm5, %v7811_v21, %v7802_v32 }
 0x220   : > { %v7881_v44 = vmul.u32.u64.low %v7807_v49, %v2016_v42  ;;  %v7882_v51 = vmul.u32.u64.high %v7807_v49, %v2016_v42, %v7881_v44  ;;  %v6046_v53 = vadd.s32 4294967169, %v2179_v29  ;;  %v1760_v10 = vsel %vm1758_vm7, %v1759_v13, %v6505_v17 }
 0x221   : > { %v3929_v6 = vsel %vm3927_vm8, %v1759_v13, %v6505_v17  ;;  %v1945_v39 = vor.u32 4788187, %v1944_v43  ;;  %v1948_v26 = vcvt.s32.f32 %v1941_v55  ;;  %v1757_v25 = vsel %vm1755_vm10, %v6503_v52, %v1756_v41 }
 0x222   : > { %v3926_v12 = vsel %vm3924_vm12, %v6503_v52, %v1756_v41  ;;  %v7893_v7 = vmul.u32.u64.low %v7807_v49, %v2012_v16  ;;  %v7894_v59 = vmul.u32.u64.high %v7807_v49, %v2012_v16, %v7893_v7  ;;  %v1761_v22 = vsel %vm1754_vm1, %v1757_v25, %v1760_v10 }
 0x223   : > { %v3930_v9 = vsel %vm3923_vm2, %v3926_v12, %v3929_v6  ;;  %v1946_v34 = vand.u32 2147483647, %v1945_v39  ;;  %v2185_v20 = vadd.s32 1, %v6046_v53  ;;  %v5519_v35 = vrot.slane %v7831_v23, 1 }
 0x224   : > { %v1762_v60 = vsel %vm1752_vm6, nan, %v1761_v22  ;;  %v2008_v18 = vsel %vm2002_vm0, %v2005_v19, %v2007_v24  ;;  %vm2026_vm7 = vc.u32 %v7882_v51, %v7893_v7  ;;  %v3931_v1 = vsel %vm1752_vm6, nan, %v3930_v9 }
 0x225   : > { %v5518_v36 = vrot.slane %v1762_v60, 1  ;;  %v1949_v27 = vmul.f32 %v1948_v26, %v1946_v34  ;;  %vm2186_vm8 = vcmp.gt.s32.totalorder %v2185_v20, 0  ;;  %v1955_v50 = vsel %vm7864_vm13, 0, %v7840_v47 }
 0x226   : > { %v2027_v32 = vadd.s32 1, %v7894_v59  ;;  %v2187_v21 = vsel %vm2186_vm8, %v2185_v20, 0  ;;  %v2024_v52 = vmul.u32 %v7807_v49, %v2008_v18  ;;  %v4035_v24 = vsel %vm1855_vm3, nan, %v4034_v56 }
 0x227   : > { %v5561_v23 = vsel %vm5555_vm9, %v5518_v36, %v3931_v1  ;;  %v1950_v37 = vxor.u32 2147483648, %v1949_v27  ;;  %v2189_v19 = vand.u32 31, %v2187_v21  ;;  %v2175_v47 = vand.u32 2147483647, %v7258_v30 }
 0x228   : > { %v7925_v42 = vmul.f32 %v5600_v38, %v5561_v23  ;;  %v2028_v29 = vsel %vm2026_vm7, %v2027_v32, %v7894_v59  ;;  %v4129_v13 = vadd.s32 3, %v1955_v50  ;;  %v5562_v49 = vsel %vm5555_vm9, %v5519_v35, %v4035_v24 }
 0x229   : > { %v1951_v17 = vsel %vm1868_vm11, %v1950_v37, %v1949_v27  ;;  %v2029_v55 = vadd.s32 %v2028_v29, %v2024_v52  ;;  %v2190_v43 = vsub.s32 32, %v2189_v19  ;;  %v7937_v38 = vand.u32 3, %v1955_v50 }
 0x22a   : > { %v5720_v16 = vcombine.low %v7791_v33, %v7925_v42  ;;  %v1954_v0 = vsel %vm7864_vm13, %v7055_v58, %v1951_v17  ;;  %v7939_v44 = vshrl.u32 %v2187_v21, 5  ;;  %v2195_v53 = vshll.u32 %v6701_v61, %v2189_v19 }
 0x22b   : > { %6506 = vcosq.f32 %v1954_v0  ;;  %v2030_v41 = vadd.s32 536870912, %v2029_v55  ;;  %v2196_v10 = vshrl.u32 %v6702_v63, %v2190_v43  ;;  %v2198_v6 = vshll.u32 %v6702_v63, %v2189_v19 }
 0x22c   : > { %6508 = vsinq.f32 %v1954_v0  ;;  %v2199_v39 = vshrl.u32 %v6703_v2, %v2190_v43  ;;  %v4130_v26 = vand.u32 3, %v4129_v13  ;;  %v2201_v28 = vshll.u32 %v6703_v2, %v2189_v19 }
 0x22d   : > { %v7945_v25 = vshrl.u32 %v2030_v41, 30  ;;  %v2202_v12 = vshrl.u32 %v6704_v4, %v2190_v43  ;;  %v2192_v59 = vshll.u32 %v6700_v57, %v2189_v19  ;;  %v2193_v22 = vshrl.u32 %v6701_v61, %v2190_v43 }
 0x22e   : > { %v2204_v9 = vshll.u32 %v6704_v4, %v2189_v19  ;;  %v2205_v34 = vshrl.u32 %v6705_v11, %v2190_v43  ;;  %v7956_v20 = vmul.f32 %v5604_v5, %v5562_v49  ;;  %v2182_v35 = vand.u32 8388607, %v2175_v47 }
 0x22f   : > { %v2032_v56 = vshll.u32 %v7945_v25, 30  ;;  %v2203_v60 = vor.u32 %v2202_v12, %v2201_v28  ;;  %v2197_v18 = vor.u32 %v2196_v10, %v2195_v53  ;;  %v2200_v36 = vor.u32 %v2199_v39, %v2198_v6  ;;  %v7992_v53 = vpop.f32.mrb[13].mxu1 }
 0x230   : > { %v2206_v27 = vor.u32 %v2205_v34, %v2204_v9  ;;  %vm2210_vm3 = vcmp.lt.s32.totalorder %v7939_v44, 4  ;;  %vm1960_vm11 = vcmp.lt.s32.totalorder %v7937_v38, 2  ;;  %vm1961_vm10 = vcmp.eq.s32.totalorder %v7937_v38, 0  ;;  %v1020_v12 = vpop.f32.mrb[14].mxu1 }
 0x231   : > { %v7964_v1 = vsub.s32 %v2029_v55, %v2032_v56  ;;  %vm2207_vm12 = vcmp.lt.s32.totalorder %v7939_v44, 1  ;;  %vm1958_vm15 = vweird.f32 %v7055_v58  ;;  %vm1964_vm0 = vcmp.eq.s32.totalorder %v7937_v38, 2  ;;  %v1021_v56 = vpop.f32.mrb[15].mxu1 }
 0x232   : > { %vm4131_vm1 = vcmp.lt.s32.totalorder %v4130_v26, 2  ;;  %vm4132_vm2 = vcmp.eq.s32.totalorder %v4130_v26, 0  ;;  %v2194_v14 = vor.u32 %v2193_v22, %v2192_v59  ;;  %v2183_v50 = vor.u32 8388608, %v2182_v35 }
 0x233   : > { %v2035_v5 = vsub.s32 0, %v7964_v1  ;;  %vm2209_vm14 = vcmp.lt.s32.totalorder %v7939_v44, 3  ;;  %v2216_v32 = vsel %vm2210_vm3, %v2203_v60, 920167782  ;;  %v2191_v21 = vshrl.u32 %v6700_v57, %v2190_v43 }
 0x234   : > { %vm2208_vm4 = vcmp.lt.s32.totalorder %v7939_v44, 2  ;;  %v2219_v23 = vsel %vm2207_vm12, %v2197_v18, %v2200_v36  ;;  %v2220_v37 = vsel %vm2210_vm3, %v2206_v27, 1326507024  ;;  %vm4135_vm5 = vcmp.eq.s32.totalorder %v4130_v26, 2 }
 0x235   : > { %v6507_v52 = vpop.eup %6506  ;;  %v2025_v19 = vadd.s32 %v7893_v7, %v7882_v51  ;;  %v6039_v24 = vmin.u32 %v2035_v5, %v7964_v1  ;;  %v2212_v29 = vsel %vm2210_vm3, %v2200_v36, 2102212464  ;;  %v2215_v55 = vsel %vm2207_vm12, %v2194_v14, %v2197_v18 }
 0x236   : > { %v6509_v17 = vpop.eup %6508  ;;  %v1965_v13 = vxor.u32 2147483648, %v6507_v52  ;;  %v2217_v43 = vsel %vm2209_vm14, %v2200_v36, %v2216_v32  ;;  %v2221_v49 = vsel %vm2209_vm14, %v2203_v60, %v2220_v37  ;;  %v2223_v7 = vshll.u32 %v2183_v50, 8 }
 0x237   : > { %v1962_v0 = vxor.u32 2147483648, %v6509_v17  ;;  %v2037_v41 = vclz %v6039_v24  ;;  %v2222_v51 = vsel %vm2208_vm4, %v2219_v23, %v2221_v49  ;;  %v2211_v39 = vsel %vm2207_vm12, %v2191_v21, %v2194_v14 }
 0x238   : > { %v1966_v10 = vsel %vm1964_vm0, %v1965_v13, %v6509_v17  ;;  %v4137_v6 = vsel %vm4135_vm5, %v1965_v13, %v6509_v17  ;;  %v2213_v28 = vsel %vm2209_vm14, %v2197_v18, %v2212_v29  ;;  %v2218_v34 = vsel %vm2208_vm4, %v2215_v55, %v2217_v43 }
 0x239   : > { %v1963_v59 = vsel %vm1961_vm10, %v6507_v52, %v1962_v0  ;;  %v4134_v22 = vsel %vm4132_vm2, %v6507_v52, %v1962_v0  ;;  %v6040_v9 = vadd.s32 4294967294, %v2037_v41  ;;  %v2214_v14 = vsel %vm2208_vm4, %v2211_v39, %v2213_v28 }
 0x23a   : > { %v1967_v35 = vsel %vm1960_vm11, %v1963_v59, %v1966_v10  ;;  %v4138_v60 = vsel %vm4131_vm1, %v4134_v22, %v4137_v6  ;;  %v8008_v36 = vmul.u32.u64.low %v2223_v7, %v2222_v51  ;;  %v8009_v27 = vmul.u32.u64.high %v2223_v7, %v2222_v51, %v8008_v36 }
 0x23b   : > { %v1968_v18 = vsel %vm1958_vm15, nan, %v1967_v35  ;;  %vm6041_vm6 = vcmp.lt.s32.totalorder %v6040_v9, 0  ;;  %v2075_v5 = vand.u32 2139095040, %v7370_v3  ;;  %v4139_v38 = vsel %vm1958_vm15, nan, %v4138_v60 }
 0x23c   : > { %v5520_v50 = vrot.slane %v1968_v18, 1  ;;  %v2040_v32 = vsel %vm6041_vm6, 0, %v6040_v9  ;;  %v8016_v21 = vmul.u32.u64.low %v2223_v7, %v2218_v34  ;;  %v8017_v23 = vmul.u32.u64.high %v2223_v7, %v2218_v34, %v8016_v21 }
 0x23d   : > { %v2041_v26 = vsub.s32 32, %v2040_v32  ;;  %v2045_v37 = vsub.s32 4294967266, %v2040_v32  ;;  %v2076_v52 = vshrl.u32 %v2075_v5, 23  ;;  %v5728_v55 = vrot.slane %v5720_v16, %v7164_v40 }
 0x23e   : > { %v5563_v24 = vsel %vm5555_vm9, %v5520_v50, %v4139_v38  ;;  %vm2232_vm13 = vc.u32 %v8009_v27, %v8016_v21  ;;  %v2230_v43 = vmul.u32 %v2223_v7, %v2214_v14  ;;  %v2233_v49 = vadd.s32 1, %v8017_v23 }
 0x23f   : > { %v5668_v44 = vmul.f32 %v5608_v46, %v5563_v24  ;;  %v2043_v29 = vshrl.u32 %v2025_v19, %v2041_v26  ;;  %v2046_v17 = vadd.s32 127, %v2045_v37  ;;  %v6042_v13 = vadd.s32 4294967169, %v2076_v52 }
 0x240   : > { %v2042_v41 = vshll.u32 %v7964_v1, %v2040_v32  ;;  %v2234_v58 = vsel %vm2232_vm13, %v2233_v49, %v8017_v23  ;;  %v2072_v33 = vand.u32 2147483647, %v7370_v3  ;;  %vm1971_vm8 = vcmp.lt.s32.totalorder %v7166_v45, 0 }
 0x241   : > { %v5721_v0 = vcombine.low %v7956_v20, %v5668_v44  ;;  %v2047_v51 = vshll.u32 %v2046_v17, 23  ;;  %v2082_v10 = vadd.s32 1, %v6042_v13  ;;  %v2235_v39 = vadd.s32 %v2234_v58, %v2230_v43 }
 0x242   : > { %v2044_v19 = vor.u32 %v2043_v29, %v2042_v41  ;;  %v2055_v20 = vsub.s32 4, %v7945_v25  ;;  %v2079_v22 = vand.u32 8388607, %v2072_v33  ;;  %vm8046_vm3 = vcmp.le.f32.partialorder %v1969_v8, 0.7853982 }
 0x243   : > { %v5735_v46 = vrot.slane %v5721_v0, %v7164_v40  ;;  %v2048_v6 = vor.u32 4788187, %v2047_v51  ;;  %vm2083_vm7 = vcmp.gt.s32.totalorder %v2082_v10, 0  ;;  %v2236_v7 = vadd.s32 536870912, %v2235_v39 }
 0x244   : > { %v2084_v28 = vsel %vm2083_vm7, %v2082_v10, 0  ;;  %v2051_v12 = vcvt.s32.f32 %v2044_v19  ;;  %v2056_v60 = vsel %vm1971_vm8, %v2055_v20, %v7945_v25  ;;  %v2080_v50 = vor.u32 8388608, %v2079_v22 }
 0x245   : > { %v5736_v42 = vcombine.low %v5728_v55, %v5735_v46  ;;  %v2049_v16 = vand.u32 2147483647, %v2048_v6  ;;  %v2086_v1 = vand.u32 31, %v2084_v28  ;;  %v8038_v59 = vshrl.u32 %v2236_v7, 30 }
 0x246   : > { %v2281_v23 = vand.u32 2139095040, %v7495_v62  ;;  %v2058_v52 = vsel %vm8046_vm3, 0, %v2056_v60  ;;  %v2231_v24 = vadd.s32 %v8016_v21, %v8009_v27  ;;  %v2085_v44 = vshrl.u32 %v2084_v28, 5 }
 0x247   : > { %5802 = vst [vmem:[%s7569_s23 + $0x8] sm:$0xff] %v5736_v42  ;;  %v2087_v9 = vsub.s32 32, %v2086_v1  ;;  %v2052_v34 = vmul.f32 %v2051_v12, %v2049_v16  ;;  %v2238_v56 = vshll.u32 %v8038_v59, 30  ;;  %v2089_v32 = vshll.u32 %v6700_v57, %v2086_v1 }
 0x248   : > { %v2092_v25 = vshll.u32 %v6701_v61, %v2086_v1  ;;  %v2098_v37 = vshll.u32 %v6703_v2, %v2086_v1  ;;  %v2095_v29 = vshll.u32 %v6702_v63, %v2086_v1  ;;  %v2101_v0 = vshll.u32 %v6704_v4, %v2086_v1 }
 0x249   : > { %v8053_v36 = vsub.s32 %v2235_v39, %v2238_v56  ;;  %v2090_v18 = vshrl.u32 %v6701_v61, %v2087_v9  ;;  %v2093_v14 = vshrl.u32 %v6702_v63, %v2087_v9  ;;  %v2099_v5 = vshrl.u32 %v6704_v4, %v2087_v9 }
 0x24a   : > { %v2096_v8 = vshrl.u32 %v6703_v2, %v2087_v9  ;;  %v2053_v38 = vxor.u32 2147483648, %v2052_v34  ;;  %v2102_v41 = vshrl.u32 %v6705_v11, %v2087_v9  ;;  %v2120_v51 = vshll.u32 %v2080_v50, 8 }
 0x24b   : > { %v2241_v26 = vsub.s32 0, %v8053_v36  ;;  %v2091_v13 = vor.u32 %v2090_v18, %v2089_v32  ;;  %v2094_v55 = vor.u32 %v2093_v14, %v2092_v25  ;;  %v2100_v43 = vor.u32 %v2099_v5, %v2098_v37 }
 0x24c   : > { %v2097_v49 = vor.u32 %v2096_v8, %v2095_v29  ;;  %v2054_v10 = vsel %vm1971_vm8, %v2053_v38, %v2052_v34  ;;  %v2088_v27 = vshrl.u32 %v6700_v57, %v2087_v9  ;;  %v2282_v21 = vshrl.u32 %v2281_v23, 23  ;;  %v8093_v23 = vpop.f32.mrb[16].mxu0 }
 0x24d   : > { %v6047_v17 = vmin.u32 %v2241_v26, %v8053_v36  ;;  %v2103_v46 = vor.u32 %v2102_v41, %v2101_v0  ;;  %vm2104_vm11 = vcmp.lt.s32.totalorder %v2085_v44, 1  ;;  %vm2105_vm10 = vcmp.lt.s32.totalorder %v2085_v44, 2 }
 0x24e   : > { %vm2107_vm12 = vcmp.lt.s32.totalorder %v2085_v44, 4  ;;  %vm2106_vm15 = vcmp.lt.s32.totalorder %v2085_v44, 3  ;;  %v2112_v6 = vsel %vm2104_vm11, %v2091_v13, %v2094_v55  ;;  %v2116_v7 = vsel %vm2104_vm11, %v2094_v55, %v2097_v49 }
 0x24f   : > { %v2243_v58 = vclz %v6047_v17  ;;  %v2113_v39 = vsel %vm2107_vm12, %v2100_v43, 920167782  ;;  %v2109_v42 = vsel %vm2107_vm12, %v2097_v49, 2102212464  ;;  %v2117_v28 = vsel %vm2107_vm12, %v2103_v46, 1326507024 }
 0x250   : > { %v2114_v16 = vsel %vm2106_vm15, %v2097_v49, %v2113_v39  ;;  %v2057_v20 = vsel %vm8046_vm3, %v7166_v45, %v2054_v10  ;;  %v2118_v12 = vsel %vm2106_vm15, %v2100_v43, %v2117_v28  ;;  %v2108_v14 = vsel %vm2104_vm11, %v2088_v27, %v2091_v13 }
 0x251   : > { %v6048_v19 = vadd.s32 4294967294, %v2243_v58  ;;  %v2115_v1 = vsel %vm2105_vm10, %v2112_v6, %v2114_v16  ;;  %v2119_v9 = vsel %vm2105_vm10, %v2116_v7, %v2118_v12  ;;  %v2110_v5 = vsel %vm2106_vm15, %v2094_v55, %v2109_v42 }
 0x252   : > { %v8083_v34 = vmul.u32.u64.low %v2120_v51, %v2115_v1  ;;  %v8084_v56 = vmul.u32.u64.high %v2120_v51, %v2115_v1, %v8083_v34  ;;  %v8089_v35 = vmul.u32.u64.low %v2120_v51, %v2119_v9  ;;  %v8090_v50 = vmul.u32.u64.high %v2120_v51, %v2119_v9, %v8089_v35 }
 0x253   : > { %vm6049_vm0 = vcmp.lt.s32.totalorder %v6048_v19, 0  ;;  %v2278_v32 = vand.u32 2147483647, %v7495_v62  ;;  %v6050_v8 = vadd.s32 4294967169, %v2282_v21  ;;  %6510 = vcosq.f32 %v2057_v20 }
 0x254   : > { %v2246_v22 = vsel %vm6049_vm0, 0, %v6048_v19  ;;  %6512 = vsinq.f32 %v2057_v20  ;;  %v2111_v37 = vsel %vm2105_vm10, %v2108_v14, %v2110_v5  ;;  %v2130_v29 = vadd.s32 1, %v8084_v56 }
 0x255   : > { %v2247_v60 = vsub.s32 32, %v2246_v22  ;;  %v2251_v18 = vsub.s32 4294967266, %v2246_v22  ;;  %v2248_v38 = vshll.u32 %v8053_v36, %v2246_v22  ;;  %v2288_v17 = vadd.s32 1, %v6050_v8 }
 0x256   : > { %vm2129_vm1 = vc.u32 %v8090_v50, %v8083_v34  ;;  %v8100_v43 = vand.u32 3, %v2058_v52  ;;  %v4233_v49 = vadd.s32 3, %v2058_v52  ;;  %v2127_v41 = vmul.u32 %v2120_v51, %v2111_v37 }
 0x257   : > { %v2249_v26 = vshrl.u32 %v2231_v24, %v2247_v60  ;;  %v2252_v25 = vadd.s32 127, %v2251_v18  ;;  %v2261_v36 = vsub.s32 4, %v8038_v59  ;;  %v2131_v24 = vsel %vm2129_vm1, %v2130_v29, %v8084_v56 }
 0x258   : > { %v2285_v44 = vand.u32 8388607, %v2278_v32  ;;  %vm2289_vm2 = vcmp.gt.s32.totalorder %v2288_v17, 0  ;;  %v2132_v27 = vadd.s32 %v2131_v24, %v2127_v41  ;;  %vm2177_vm14 = vcmp.lt.s32.totalorder %v7258_v30, 0 }
 0x259   : > { %v2250_v13 = vor.u32 %v2249_v26, %v2248_v38  ;;  %v2253_v55 = vshll.u32 %v2252_v25, 23  ;;  %v2290_v21 = vsel %vm2289_vm2, %v2288_v17, 0  ;;  %vm2067_vm4 = vcmp.eq.s32.totalorder %v8100_v43, 2 }
 0x25a   : > { %v2292_v46 = vand.u32 31, %v2290_v21  ;;  %vm8110_vm5 = vcmp.le.f32.partialorder %v2175_v47, 0.7853982  ;;  %v2133_v19 = vadd.s32 536870912, %v2132_v27  ;;  %vm2064_vm6 = vcmp.eq.s32.totalorder %v8100_v43, 0 }
 0x25b   : > { %v2254_v0 = vor.u32 4788187, %v2253_v55  ;;  %v2257_v58 = vcvt.s32.f32 %v2250_v13  ;;  %v8115_v6 = vand.u32 3, %v4233_v49  ;;  %v2262_v39 = vsel %vm2177_vm14, %v2261_v36, %v8038_v59 }
 0x25c   : > { %v2286_v42 = vor.u32 8388608, %v2285_v44  ;;  %v2293_v16 = vsub.s32 32, %v2292_v46  ;;  %v8120_v28 = vshrl.u32 %v2133_v19, 30  ;;  %v8122_v20 = vshrl.u32 %v2290_v21, 5 }
 0x25d   : > { %v2255_v10 = vand.u32 2147483647, %v2254_v0  ;;  %v6511_v7 = vpop.eup %6510  ;;  %v2295_v47 = vshll.u32 %v6700_v57, %v2292_v46  ;;  %v2298_v1 = vshll.u32 %v6701_v61, %v2292_v46  ;;  %v2301_v56 = vshll.u32 %v6702_v63, %v2292_v46 }
 0x25e   : > { %v6513_v12 = vpop.eup %6512  ;;  %v2296_v22 = vshrl.u32 %v6701_v61, %v2293_v16  ;;  %v2299_v9 = vshrl.u32 %v6702_v63, %v2293_v16  ;;  %v2304_v59 = vshll.u32 %v6703_v2, %v2292_v46  ;;  %vm2063_vm13 = vcmp.lt.s32.totalorder %v8100_v43, 2 }
 0x25f   : > { %v2258_v51 = vmul.f32 %v2257_v58, %v2255_v10  ;;  %v2135_v18 = vshll.u32 %v8120_v28, 30  ;;  %v2302_v14 = vshrl.u32 %v6703_v2, %v2293_v16  ;;  %v2305_v5 = vshrl.u32 %v6704_v4, %v2293_v16 }
 0x260   : > { %v2068_v35 = vxor.u32 2147483648, %v6511_v7  ;;  %vm4236_vm7 = vcmp.eq.s32.totalorder %v8115_v6, 0  ;;  %vm4239_vm8 = vcmp.eq.s32.totalorder %v8115_v6, 2  ;;  %v8138_v8 = vsel %vm8110_vm5, 0, %v2262_v39 }
 0x261   : > { %v2259_v60 = vxor.u32 2147483648, %v2258_v51  ;;  %v2065_v38 = vxor.u32 2147483648, %v6513_v12  ;;  %v8140_v26 = vsub.s32 %v2132_v27, %v2135_v18  ;;  %v2307_v25 = vshll.u32 %v6704_v4, %v2292_v46 }
 0x262   : > { %v8143_v37 = vshll.u32 %v2286_v42, 8  ;;  %v2297_v29 = vor.u32 %v2296_v22, %v2295_v47  ;;  %v2300_v17 = vor.u32 %v2299_v9, %v2298_v1  ;;  %v2306_v13 = vor.u32 %v2305_v5, %v2304_v59  ;;  %v8175_v1 = vpop.f32.mrb[16].mxu1 }
 0x263   : > { %v2308_v55 = vshrl.u32 %v6705_v11, %v2293_v16  ;;  %v2260_v49 = vsel %vm2177_vm14, %v2259_v60, %v2258_v51  ;;  %v2138_v0 = vsub.s32 0, %v8140_v26  ;;  %v2303_v41 = vor.u32 %v2302_v14, %v2301_v56 }
 0x264   : > { %vm2310_vm3 = vcmp.lt.s32.totalorder %v8122_v20, 1  ;;  %vm2061_vm11 = vweird.f32 %v7166_v45  ;;  %v2069_v36 = vsel %vm2067_vm4, %v2068_v35, %v6513_v12  ;;  %v4241_v24 = vsel %vm4239_vm8, %v2068_v35, %v6513_v12 }
 0x265   : > { %vm2312_vm10 = vcmp.lt.s32.totalorder %v8122_v20, 3  ;;  %vm2313_vm12 = vcmp.lt.s32.totalorder %v8122_v20, 4  ;;  %v2066_v44 = vsel %vm2064_vm6, %v6511_v7, %v2065_v38  ;;  %vm2074_vm15 = vcmp.lt.s32.totalorder %v7370_v3, 0 }
 0x266   : > { %v6043_v10 = vmin.u32 %v2138_v0, %v8140_v26  ;;  %v2309_v58 = vor.u32 %v2308_v55, %v2307_v25  ;;  %v2384_v27 = vand.u32 2139095040, %v7633_v15  ;;  %v2263_v21 = vsel %vm8110_vm5, %v7258_v30, %v2260_v49 }
 0x267   : > { %vm2311_vm0 = vcmp.lt.s32.totalorder %v8122_v20, 2  ;;  %v2318_v46 = vsel %vm2310_vm3, %v2297_v29, %v2300_v17  ;;  %v2319_v51 = vsel %vm2313_vm12, %v2306_v13, 920167782  ;;  %v4238_v19 = vsel %vm4236_vm7, %v6511_v7, %v2065_v38 }
 0x268   : > { %v2140_v39 = vclz %v6043_v10  ;;  %v2294_v42 = vshrl.u32 %v6700_v57, %v2293_v16  ;;  %v2320_v47 = vsel %vm2312_vm10, %v2303_v41, %v2319_v51  ;;  %v2070_v52 = vsel %vm2063_vm13, %v2066_v44, %v2069_v36 }
 0x269   : > { %vm8181_vm1 = vcmp.le.f32.partialorder %v2072_v33, 0.7853982  ;;  %v2158_v22 = vsub.s32 4, %v8120_v28  ;;  %v2315_v7 = vsel %vm2313_vm12, %v2303_v41, 2102212464  ;;  %v2322_v16 = vsel %vm2310_vm3, %v2300_v17, %v2303_v41 }
 0x26a   : > { %6514 = vcosq.f32 %v2263_v21  ;;  %v6044_v9 = vadd.s32 4294967294, %v2140_v39  ;;  %v2321_v43 = vsel %vm2311_vm0, %v2318_v46, %v2320_v47  ;;  %v2323_v56 = vsel %vm2313_vm12, %v2309_v58, 1326507024 }
 0x26b   : > { %v2324_v33 = vsel %vm2312_vm10, %v2306_v13, %v2323_v56  ;;  %v8197_v59 = vmul.u32.u64.low %v8143_v37, %v2321_v43  ;;  %v8198_v60 = vmul.u32.u64.high %v8143_v37, %v2321_v43, %v8197_v59  ;;  %v2385_v18 = vshrl.u32 %v2384_v27, 23 }
 0x26c   : > { %vm6045_vm2 = vcmp.lt.s32.totalorder %v6044_v9, 0  ;;  %v2314_v14 = vsel %vm2310_vm3, %v2294_v42, %v2297_v29  ;;  %v2316_v5 = vsel %vm2312_vm10, %v2300_v17, %v2315_v7  ;;  %v2325_v35 = vsel %vm2311_vm0, %v2322_v16, %v2324_v33 }
 0x26d   : > { %6516 = vsinq.f32 %v2263_v21  ;;  %v2143_v38 = vsel %vm6045_vm2, 0, %v6044_v9  ;;  %v8208_v25 = vmul.u32.u64.low %v8143_v37, %v2325_v35  ;;  %v8209_v13 = vmul.u32.u64.high %v8143_v37, %v2325_v35, %v8208_v25 }
 0x26e   : > { %v2071_v55 = vsel %vm2061_vm11, nan, %v2070_v52  ;;  %v2128_v49 = vadd.s32 %v8083_v34, %v8090_v50  ;;  %v2144_v0 = vsub.s32 32, %v2143_v38  ;;  %v2148_v29 = vsub.s32 4294967266, %v2143_v38 }
 0x26f   : > { %v2159_v17 = vsel %vm2074_vm15, %v2158_v22, %v8120_v28  ;;  %v2317_v41 = vsel %vm2311_vm0, %v2314_v14, %v2316_v5  ;;  %v2336_v36 = vadd.s32 1, %v8198_v60  ;;  %v6054_v44 = vadd.s32 4294967169, %v2385_v18 }
 0x270   : > { %vm4235_vm14 = vcmp.lt.s32.totalorder %v8115_v6, 2  ;;  %v2145_v10 = vshll.u32 %v8140_v26, %v2143_v38  ;;  %v2146_v58 = vshrl.u32 %v2128_v49, %v2144_v0  ;;  %v2149_v27 = vadd.s32 127, %v2148_v29 }
 0x271   : > { %v4242_v21 = vsel %vm4235_vm14, %v4238_v19, %v4241_v24  ;;  %v5521_v34 = vrot.slane %v2071_v55, 1  ;;  %v4441_v50 = vadd.s32 3, %v8138_v8  ;;  %vm2335_vm4 = vc.u32 %v8209_v13, %v8197_v59 }
 0x272   : > { %v2147_v28 = vor.u32 %v2146_v58, %v2145_v10  ;;  %v2150_v46 = vshll.u32 %v2149_v27, 23  ;;  %v2161_v20 = vsel %vm8181_vm1, 0, %v2159_v17  ;;  %v2333_v51 = vmul.u32 %v8143_v37, %v2317_v41 }
 0x273   : > { %v5612_v6 = vrot.slane %v7166_v45, %v7102_v54  ;;  %v2337_v26 = vsel %vm2335_vm4, %v2336_v36, %v8198_v60  ;;  %v2381_v24 = vand.u32 2147483647, %v7633_v15  ;;  %v2391_v19 = vadd.s32 1, %v6054_v44 }
 0x274   : > { %v8233_v39 = vpop.eup %6514  ;;  %v4243_v42 = vsel %vm2061_vm11, nan, %v4242_v21  ;;  %v8238_v47 = vand.u32 3, %v8138_v8  ;;  %v2151_v52 = vor.u32 4788187, %v2150_v46  ;;  %v2338_v22 = vadd.s32 %v2337_v26, %v2333_v51 }
 0x275   : > { %v5564_v37 = vsel %vm5555_vm9, %v5521_v34, %v4243_v42  ;;  %v8241_v7 = vand.u32 3, %v4441_v50  ;;  %v4337_v16 = vadd.s32 3, %v2161_v20  ;;  %vm2392_vm5 = vcmp.gt.s32.totalorder %v2391_v19, 0 }
 0x276   : > { %v2152_v9 = vand.u32 2147483647, %v2151_v52  ;;  %v2154_v43 = vcvt.s32.f32 %v2147_v28  ;;  %v2339_v56 = vadd.s32 536870912, %v2338_v22  ;;  %v2393_v33 = vsel %vm2392_vm5, %v2391_v19, 0 }
 0x277   : > { %v8243_v60 = vpop.eup %6516  ;;  %v2274_v45 = vxor.u32 2147483648, %v8233_v39  ;;  %v5616_v8 = vrot.slane %v7370_v3, %v7102_v54  ;;  %v2388_v18 = vand.u32 8388607, %v2381_v24  ;;  %v2395_v14 = vand.u32 31, %v2393_v33 }
 0x278   : > { %vm2270_vm6 = vcmp.eq.s32.totalorder %v8238_v47, 0  ;;  %vm2273_vm13 = vcmp.eq.s32.totalorder %v8238_v47, 2  ;;  %v2155_v5 = vmul.f32 %v2154_v43, %v2152_v9  ;;  %v8252_v35 = vshrl.u32 %v2339_v56, 30 }
 0x279   : > { %v8254_v38 = vmul.f32 %v5612_v6, %v5564_v37  ;;  %vm4447_vm7 = vcmp.eq.s32.totalorder %v8241_v7, 2  ;;  %v8257_v25 = vand.u32 3, %v2161_v20  ;;  %v2396_v55 = vsub.s32 32, %v2395_v14 }
 0x27a   : > { %v2271_v49 = vxor.u32 2147483648, %v8243_v60  ;;  %v2156_v0 = vxor.u32 2147483648, %v2155_v5  ;;  %v8260_v29 = vand.u32 3, %v4337_v16  ;;  %v2341_v17 = vshll.u32 %v8252_v35, 30 }
 0x27b   : > { %v8264_v41 = vsel %vm2273_vm13, %v2274_v45, %v8243_v60  ;;  %v2389_v36 = vor.u32 8388608, %v2388_v18  ;;  %v2399_v44 = vshrl.u32 %v6701_v61, %v2396_v55  ;;  %v2402_v10 = vshrl.u32 %v6702_v63, %v2396_v55 }
 0x27c   : > { %v2157_v58 = vsel %vm2074_vm15, %v2156_v0, %v2155_v5  ;;  %v8270_v27 = vsub.s32 %v2338_v22, %v2341_v17  ;;  %v2405_v21 = vshrl.u32 %v6703_v2, %v2396_v55  ;;  %v2408_v34 = vshrl.u32 %v6704_v4, %v2396_v55  ;;  %v8303_v5 = vpop.f32.mrb[17].mxu0 }
 0x27d   : > { %v2160_v50 = vsel %vm8181_vm1, %v7370_v3, %v2157_v58  ;;  %v2394_v28 = vshrl.u32 %v2393_v33, 5  ;;  %v2398_v46 = vshll.u32 %v6700_v57, %v2395_v14  ;;  %v2401_v20 = vshll.u32 %v6701_v61, %v2395_v14  ;;  %v1061_v0 = vpop.f32.mrb[18].mxu0 }
 0x27e   : > { %6518 = vcosq.f32 %v2160_v50  ;;  %v2344_v51 = vsub.s32 0, %v8270_v27  ;;  %v2404_v6 = vshll.u32 %v6702_v63, %v2395_v14  ;;  %v2407_v26 = vshll.u32 %v6703_v2, %v2395_v14  ;;  %v1062_v58 = vpop.f32.mrb[19].mxu0 }
 0x27f   : > { %v8287_v19 = vsel %vm2270_vm6, %v8233_v39, %v2271_v49  ;;  %v8292_v12 = vsel %vm4447_vm7, %v2274_v45, %v8243_v60  ;;  %6520 = vsinq.f32 %v2160_v50  ;;  %v2400_v42 = vor.u32 %v2399_v44, %v2398_v46 }
 0x280   : > { %v6051_v52 = vmin.u32 %v2344_v51, %v8270_v27  ;;  %v2403_v22 = vor.u32 %v2402_v10, %v2401_v20  ;;  %v2406_v37 = vor.u32 %v2405_v21, %v2404_v6  ;;  %v2409_v16 = vor.u32 %v2408_v34, %v2407_v26 }
 0x281   : > { %v2397_v9 = vshrl.u32 %v6700_v57, %v2396_v55  ;;  %v2410_v43 = vshll.u32 %v6704_v4, %v2395_v14  ;;  %v2411_v56 = vshrl.u32 %v6705_v11, %v2396_v55  ;;  %v8298_v33 = vshll.u32 %v2389_v36, 8 }
 0x282   : > { %vm2170_vm8 = vcmp.eq.s32.totalorder %v8257_v25, 2  ;;  %vm4343_vm3 = vcmp.eq.s32.totalorder %v8260_v29, 2  ;;  %v2346_v45 = vclz %v6051_v52  ;;  %vm2413_vm11 = vcmp.lt.s32.totalorder %v2394_v28, 1 }
 0x283   : > { %vm2414_vm10 = vcmp.lt.s32.totalorder %v2394_v28, 2  ;;  %v2590_v18 = vand.u32 2139095040, %v7699_v31  ;;  %vm2167_vm12 = vcmp.eq.s32.totalorder %v8257_v25, 0  ;;  %vm4340_vm15 = vcmp.eq.s32.totalorder %v8260_v29, 0 }
 0x284   : > { %v2412_v14 = vor.u32 %v2411_v56, %v2410_v43  ;;  %vm2415_vm0 = vcmp.lt.s32.totalorder %v2394_v28, 3  ;;  %vm2416_vm1 = vcmp.lt.s32.totalorder %v2394_v28, 4  ;;  %v2417_v55 = vsel %vm2413_vm11, %v2397_v9, %v2400_v42 }
 0x285   : > { %vm4444_vm2 = vcmp.eq.s32.totalorder %v8241_v7, 0  ;;  %vm2166_vm14 = vcmp.lt.s32.totalorder %v8257_v25, 2  ;;  %vm4339_vm4 = vcmp.lt.s32.totalorder %v8260_v29, 2  ;;  %v6052_v17 = vadd.s32 4294967294, %v2346_v45 }
 0x286   : > { %v2418_v36 = vsel %vm2416_vm1, %v2406_v37, 2102212464  ;;  %v2421_v44 = vsel %vm2413_vm11, %v2400_v42, %v2403_v22  ;;  %v2422_v10 = vsel %vm2416_vm1, %v2409_v16, 920167782  ;;  %vm2269_vm5 = vcmp.lt.s32.totalorder %v8238_v47, 2 }
 0x287   : > { %vm2164_vm6 = vweird.f32 %v7370_v3  ;;  %v2419_v21 = vsel %vm2415_vm0, %v2403_v22, %v2418_v36  ;;  %v2423_v34 = vsel %vm2415_vm0, %v2406_v37, %v2422_v10  ;;  %v2425_v50 = vsel %vm2413_vm11, %v2403_v22, %v2406_v37 }
 0x288   : > { %v2426_v46 = vsel %vm2416_vm1, %v2412_v14, 1326507024  ;;  %vm2280_vm13 = vcmp.lt.s32.totalorder %v7495_v62, 0  ;;  %v2334_v20 = vadd.s32 %v8197_v59, %v8209_v13  ;;  %vm6053_vm7 = vcmp.lt.s32.totalorder %v6052_v17, 0  ;;  %v6519_v22 = vpop.eup %6518 }
 0x289   : > { %v2424_v51 = vsel %vm2414_vm10, %v2421_v44, %v2423_v34  ;;  %v2427_v6 = vsel %vm2415_vm0, %v2409_v16, %v2426_v46  ;;  %v2349_v26 = vsel %vm6053_vm7, 0, %v6052_v17  ;;  %vm4443_vm11 = vcmp.lt.s32.totalorder %v8241_v7, 2  ;;  %v6521_v56 = vpop.eup %6520 }
 0x28a   : > { %v2428_v42 = vsel %vm2414_vm10, %v2425_v50, %v2427_v6  ;;  %v8327_v52 = vmul.u32.u64.low %v8298_v33, %v2424_v51  ;;  %v8328_v9 = vmul.u32.u64.high %v8298_v33, %v2424_v51, %v8327_v52  ;;  %v2350_v37 = vsub.s32 32, %v2349_v26 }
 0x28b   : > { %v2354_v43 = vsub.s32 4294967266, %v2349_v26  ;;  %v2364_v59 = vsub.s32 4, %v8252_v35  ;;  %v2420_v13 = vsel %vm2414_vm10, %v2417_v55, %v2419_v21  ;;  %v2171_v45 = vxor.u32 2147483648, %v6519_v22 }
 0x28c   : > { %v8335_v16 = vmul.u32.u64.low %v8298_v33, %v2428_v42  ;;  %v8336_v14 = vmul.u32.u64.high %v8298_v33, %v2428_v42, %v8335_v16  ;;  %v2591_v0 = vshrl.u32 %v2590_v18, 23  ;;  %vm2267_vm0 = vweird.f32 %v7258_v30 }
 0x28d   : > { %v2168_v17 = vxor.u32 2147483648, %v6521_v56  ;;  %v2351_v36 = vshll.u32 %v8270_v27, %v2349_v26  ;;  %v2352_v44 = vshrl.u32 %v2334_v20, %v2350_v37  ;;  %v2355_v10 = vadd.s32 127, %v2354_v43 }
 0x28e   : > { %v2172_v58 = vsel %vm2170_vm8, %v2171_v45, %v6521_v56  ;;  %v4345_v28 = vsel %vm4343_vm3, %v2171_v45, %v6521_v56  ;;  %v2439_v55 = vadd.s32 1, %v8328_v9  ;;  %v6062_v21 = vadd.s32 4294967169, %v2591_v0 }
 0x28f   : > { %v2169_v34 = vsel %vm2167_vm12, %v6519_v22, %v2168_v17  ;;  %v4342_v18 = vsel %vm4340_vm15, %v6519_v22, %v2168_v17  ;;  %v2353_v50 = vor.u32 %v2352_v44, %v2351_v36  ;;  %v2356_v46 = vshll.u32 %v2355_v10, 23 }
 0x290   : > { %v4446_v27 = vsel %vm4444_vm2, %v8233_v39, %v2271_v49  ;;  %v2173_v20 = vsel %vm2166_vm14, %v2169_v34, %v2172_v58  ;;  %v4346_v51 = vsel %vm4339_vm4, %v4342_v18, %v4345_v28  ;;  %vm2438_vm8 = vc.u32 %v8336_v14, %v8327_v52 }
 0x291   : > { %v2276_v6 = vsel %vm2269_vm5, %v8287_v19, %v8264_v41  ;;  %v2174_v60 = vsel %vm2164_vm6, nan, %v2173_v20  ;;  %v2357_v26 = vor.u32 4788187, %v2356_v46  ;;  %v2436_v39 = vmul.u32 %v8298_v33, %v2420_v13 }
 0x292   : > { %v5522_v49 = vrot.slane %v2174_v60, 1  ;;  %v2365_v25 = vsel %vm2280_vm13, %v2364_v59, %v8252_v35  ;;  %v2440_v29 = vsel %vm2438_vm8, %v2439_v55, %v8328_v9  ;;  %v2597_v42 = vadd.s32 1, %v6062_v21 }
 0x293   : > { %v4347_v22 = vsel %vm2164_vm6, nan, %v4346_v51  ;;  %v2358_v37 = vand.u32 2147483647, %v2357_v26  ;;  %v2360_v47 = vcvt.s32.f32 %v2353_v50  ;;  %v2441_v41 = vadd.s32 %v2440_v29, %v2436_v39 }
 0x294   : > { %v4450_v19 = vsel %vm4443_vm11, %v4446_v27, %v8292_v12  ;;  %v5565_v33 = vsel %vm5555_vm9, %v5522_v49, %v4347_v22  ;;  %vm8379_vm3 = vcmp.le.f32.partialorder %v2278_v32, 0.7853982  ;;  %vm2598_vm10 = vcmp.gt.s32.totalorder %v2597_v42, 0 }
 0x295   : > { %v8386_v35 = vmul.f32 %v5616_v8, %v5565_v33  ;;  %v2361_v9 = vmul.f32 %v2360_v47, %v2358_v37  ;;  %v2442_v59 = vadd.s32 536870912, %v2441_v41  ;;  %v2599_v13 = vsel %vm2598_vm10, %v2597_v42, 0 }
 0x296   : > { %v2277_v7 = vsel %vm2267_vm0, nan, %v2276_v6  ;;  %v2367_v12 = vsel %vm8379_vm3, 0, %v2365_v25  ;;  %v2587_v32 = vand.u32 2147483647, %v7699_v31  ;;  %v2601_v56 = vand.u32 31, %v2599_v13 }
 0x297   : > { %v5737_v45 = vcombine.low %v8254_v38, %v8386_v35  ;;  %v2362_v16 = vxor.u32 2147483648, %v2361_v9  ;;  %v8395_v0 = vshrl.u32 %v2442_v59, 30  ;;  %v4451_v3 = vsel %vm2267_vm0, nan, %v4450_v19 }
 0x298   : > { %v5620_v8 = vrot.slane %v7258_v30, %v7102_v54  ;;  %v2602_v17 = vsub.s32 32, %v2601_v56  ;;  %v5523_v36 = vrot.slane %v2277_v7, 1  ;;  %v4545_v10 = vadd.s32 3, %v2367_v12 }
 0x299   : > { %v2363_v44 = vsel %vm2280_vm13, %v2362_v16, %v2361_v9  ;;  %v2444_v58 = vshll.u32 %v8395_v0, 30  ;;  %v8407_v55 = vand.u32 3, %v2367_v12  ;;  %v2594_v21 = vand.u32 8388607, %v2587_v32  ;;  %v8443_v16 = vpop.f32.mrb[17].mxu1 }
 0x29a   : > { %v2366_v28 = vsel %vm8379_vm3, %v7495_v62, %v2363_v44  ;;  %v2604_v34 = vshll.u32 %v6700_v57, %v2601_v56  ;;  %v2605_v50 = vshrl.u32 %v6701_v61, %v2602_v17  ;;  %v2607_v46 = vshll.u32 %v6701_v61, %v2601_v56 }
 0x29b   : > { %6522 = vcosq.f32 %v2366_v28  ;;  %v8412_v18 = vsub.s32 %v2441_v41, %v2444_v58  ;;  %v2608_v27 = vshrl.u32 %v6702_v63, %v2602_v17  ;;  %v2610_v20 = vshll.u32 %v6702_v63, %v2601_v56 }
 0x29c   : > { %6524 = vsinq.f32 %v2366_v28  ;;  %v2611_v51 = vshrl.u32 %v6703_v2, %v2602_v17  ;;  %v8420_v6 = vsel %vm5555_vm9, %v5523_v36, %v4451_v3  ;;  %v4546_v60 = vand.u32 3, %v4545_v10 }
 0x29d   : > { %v2447_v26 = vsub.s32 0, %v8412_v18  ;;  %v8423_v39 = vshrl.u32 %v2599_v13, 5  ;;  %v2613_v49 = vshll.u32 %v6703_v2, %v2601_v56  ;;  %v2614_v25 = vshrl.u32 %v6704_v4, %v2602_v17 }
 0x29e   : > { %v2616_v29 = vshll.u32 %v6704_v4, %v2601_v56  ;;  %v2617_v42 = vshrl.u32 %v6705_v11, %v2602_v17  ;;  %vm2376_vm12 = vcmp.eq.s32.totalorder %v8407_v55, 2  ;;  %v2595_v37 = vor.u32 8388608, %v2594_v21 }
 0x29f   : > { %v6055_v22 = vmin.u32 %v2447_v26, %v8412_v18  ;;  %v2603_v47 = vshrl.u32 %v6700_v57, %v2602_v17  ;;  %v2606_v41 = vor.u32 %v2605_v50, %v2604_v34  ;;  %vm2373_vm15 = vcmp.eq.s32.totalorder %v8407_v55, 0 }
 0x2a0   : > { %v2609_v19 = vor.u32 %v2608_v27, %v2607_v46  ;;  %v2612_v33 = vor.u32 %v2611_v51, %v2610_v20  ;;  %v2615_v43 = vor.u32 %v2614_v25, %v2613_v49  ;;  %v2618_v9 = vor.u32 %v2617_v42, %v2616_v29 }
 0x2a1   : > { %vm2372_vm1 = vcmp.lt.s32.totalorder %v8407_v55, 2  ;;  %v2449_v59 = vclz %v6055_v22  ;;  %vm2619_vm2 = vcmp.lt.s32.totalorder %v8423_v39, 1  ;;  %vm2621_vm14 = vcmp.lt.s32.totalorder %v8423_v39, 3 }
 0x2a2   : > { %vm2622_vm4 = vcmp.lt.s32.totalorder %v8423_v39, 4  ;;  %vm2370_vm5 = vweird.f32 %v7495_v62  ;;  %vm4547_vm6 = vcmp.lt.s32.totalorder %v4546_v60, 2  ;;  %vm4548_vm13 = vcmp.eq.s32.totalorder %v4546_v60, 0 }
 0x2a3   : > { %vm4551_vm7 = vcmp.eq.s32.totalorder %v4546_v60, 2  ;;  %v2437_v13 = vadd.s32 %v8327_v52, %v8336_v14  ;;  %v6056_v7 = vadd.s32 4294967294, %v2449_v59  ;;  %vm2620_vm11 = vcmp.lt.s32.totalorder %v8423_v39, 2  ;;  %v1102_v14 = vpop.f32.mrb[18].mxu1 }
 0x2a4   : > { %v2628_v12 = vsel %vm2622_vm4, %v2615_v43, 920167782  ;;  %v2635_v56 = vshll.u32 %v2595_v37, 8  ;;  %v2627_v3 = vsel %vm2619_vm2, %v2606_v41, %v2609_v19  ;;  %v2631_v36 = vsel %vm2619_vm2, %v2609_v19, %v2612_v33  ;;  %v1103_v21 = vpop.f32.mrb[19].mxu1 }
 0x2a5   : > { %v2629_v17 = vsel %vm2621_vm14, %v2612_v33, %v2628_v12  ;;  %v2632_v52 = vsel %vm2622_vm4, %v2618_v9, 1326507024  ;;  %v6523_v44 = vpop.eup %6522  ;;  %vm6057_vm0 = vcmp.lt.s32.totalorder %v6056_v7, 0  ;;  %v2623_v10 = vsel %vm2619_vm2, %v2603_v47, %v2606_v41 }
 0x2a6   : > { %v2633_v58 = vsel %vm2621_vm14, %v2615_v43, %v2632_v52  ;;  %v2487_v28 = vand.u32 2139095040, %v7849_v48  ;;  %v6525_v34 = vpop.eup %6524  ;;  %v2377_v50 = vxor.u32 2147483648, %v6523_v44  ;;  %v2452_v46 = vsel %vm6057_vm0, 0, %v6056_v7 }
 0x2a7   : > { %v2624_v27 = vsel %vm2622_vm4, %v2612_v33, 2102212464  ;;  %v2634_v20 = vsel %vm2620_vm11, %v2631_v36, %v2633_v58  ;;  %v2374_v51 = vxor.u32 2147483648, %v6525_v34  ;;  %v2453_v26 = vsub.s32 32, %v2452_v46 }
 0x2a8   : > { %v2457_v49 = vsub.s32 4294967266, %v2452_v46  ;;  %v2630_v25 = vsel %vm2620_vm11, %v2627_v3, %v2629_v17  ;;  %v2378_v29 = vsel %vm2376_vm12, %v2377_v50, %v6525_v34  ;;  %v4553_v42 = vsel %vm4551_vm7, %v2377_v50, %v6525_v34 }
 0x2a9   : > { %v8467_v22 = vmul.u32.u64.low %v2635_v56, %v2634_v20  ;;  %v8468_v37 = vmul.u32.u64.high %v2635_v56, %v2634_v20, %v8467_v22  ;;  %v2375_v47 = vsel %vm2373_vm15, %v6523_v44, %v2374_v51  ;;  %v4550_v41 = vsel %vm4548_vm13, %v6523_v44, %v2374_v51 }
 0x2aa   : > { %v2458_v33 = vadd.s32 127, %v2457_v49  ;;  %v2625_v43 = vsel %vm2621_vm14, %v2609_v19, %v2624_v27  ;;  %v2379_v9 = vsel %vm2372_vm1, %v2375_v47, %v2378_v29  ;;  %v4554_v59 = vsel %vm4547_vm6, %v4550_v41, %v4553_v42 }
 0x2ab   : > { %v8478_v7 = vmul.u32.u64.low %v2635_v56, %v2630_v25  ;;  %v8479_v12 = vmul.u32.u64.high %v2635_v56, %v2630_v25, %v8478_v7  ;;  %v2380_v3 = vsel %vm2370_vm5, nan, %v2379_v9  ;;  %v5624_v17 = vrot.slane %v7495_v62, %v7102_v54 }
 0x2ac   : > { %v2455_v36 = vshrl.u32 %v2437_v13, %v2453_v26  ;;  %v2459_v52 = vshll.u32 %v2458_v33, 23  ;;  %v5671_v55 = vmul.f32 %v5620_v8, %v8420_v6  ;;  %v5524_v19 = vrot.slane %v2380_v3, 1 }
 0x2ad   : > { %v2626_v60 = vsel %vm2620_vm11, %v2623_v10, %v2625_v43  ;;  %v2488_v14 = vshrl.u32 %v2487_v28, 23  ;;  %v4555_v44 = vsel %vm2370_vm5, nan, %v4554_v59  ;;  %v2454_v58 = vshll.u32 %v8412_v18, %v2452_v46 }
 0x2ae   : > { %v2460_v21 = vor.u32 4788187, %v2459_v52  ;;  %vm2644_vm8 = vc.u32 %v8468_v37, %v8478_v7  ;;  %v5567_v13 = vsel %vm5555_vm9, %v5524_v19, %v4555_v44  ;;  %v2645_v34 = vadd.s32 1, %v8479_v12 }
 0x2af   : > { %v6058_v30 = vadd.s32 4294967169, %v2488_v14  ;;  %v5672_v8 = vmul.f32 %v5624_v17, %v5567_v13  ;;  %v2456_v6 = vor.u32 %v2455_v36, %v2454_v58  ;;  %v2642_v50 = vmul.u32 %v2635_v56, %v2626_v60 }
 0x2b0   : > { %v2646_v39 = vsel %vm2644_vm8, %v2645_v34, %v8479_v12  ;;  %v5745_v62 = vrot.slane %v5737_v45, %v7164_v40  ;;  %v2461_v28 = vand.u32 2147483647, %v2460_v21  ;;  %v2467_v56 = vsub.s32 4, %v8395_v0 }
 0x2b1   : > { %v2494_v10 = vadd.s32 1, %v6058_v30  ;;  %v5738_v18 = vcombine.low %v5671_v55, %v5672_v8  ;;  %v2647_v46 = vadd.s32 %v2646_v39, %v2642_v50  ;;  %v2463_v20 = vcvt.s32.f32 %v2456_v6 }
 0x2b2   : > { %v2484_v49 = vand.u32 2147483647, %v7849_v48  ;;  %v2693_v38 = vand.u32 2139095040, %v7992_v53  ;;  %vm2383_vm10 = vcmp.lt.s32.totalorder %v7633_v15, 0  ;;  %vm2382_vm12 = vcmp.le.f32.partialorder %v2381_v24, 0.7853982 }
 0x2b3   : > { %vm2495_vm3 = vcmp.gt.s32.totalorder %v2494_v10, 0  ;;  %v5752_v27 = vrot.slane %v5738_v18, %v7164_v40  ;;  %v2648_v51 = vadd.s32 536870912, %v2647_v46  ;;  %v2464_v42 = vmul.f32 %v2463_v20, %v2461_v28 }
 0x2b4   : > { %v2496_v26 = vsel %vm2495_vm3, %v2494_v10, 0  ;;  %v2491_v47 = vand.u32 8388607, %v2484_v49  ;;  %v2468_v33 = vsel %vm2383_vm10, %v2467_v56, %v8395_v0  ;;  %v2694_v9 = vshrl.u32 %v2693_v38, 23 }
 0x2b5   : > { %v2498_v25 = vand.u32 31, %v2496_v26  ;;  %v5753_v29 = vcombine.low %v5745_v62, %v5752_v27  ;;  %v8507_v22 = vshrl.u32 %v2648_v51, 30  ;;  %v2465_v41 = vxor.u32 2147483648, %v2464_v42 }
 0x2b6   : > { %v2497_v52 = vshrl.u32 %v2496_v26, 5  ;;  %v2470_v50 = vsel %vm2382_vm12, 0, %v2468_v33  ;;  %v5628_v39 = vrot.slane %v7633_v15, %v7102_v54  ;;  %v2492_v62 = vor.u32 8388608, %v2491_v47 }
 0x2b7   : > { %v2499_v35 = vsub.s32 32, %v2498_v25  ;;  %5803 = vst [vmem:[%s7569_s23 + $0x10] sm:$0xff] %v5753_v29  ;;  %v2650_v45 = vshll.u32 %v8507_v22, 30  ;;  %v2501_v55 = vshll.u32 %v6700_v57, %v2498_v25  ;;  %v2510_v19 = vshll.u32 %v6703_v2, %v2498_v25 }
 0x2b8   : > { %v2504_v0 = vshll.u32 %v6701_v61, %v2498_v25  ;;  %v2507_v60 = vshll.u32 %v6702_v63, %v2498_v25  ;;  %v2513_v14 = vshll.u32 %v6704_v4, %v2498_v25  ;;  %v2466_v58 = vsel %vm2383_vm10, %v2465_v41, %v2464_v42 }
 0x2b9   : > { %v8518_v43 = vsub.s32 %v2647_v46, %v2650_v45  ;;  %v2502_v59 = vshrl.u32 %v6701_v61, %v2499_v35  ;;  %v2505_v12 = vshrl.u32 %v6702_v63, %v2499_v35  ;;  %v2508_v3 = vshrl.u32 %v6703_v2, %v2499_v35 }
 0x2ba   : > { %v2511_v17 = vshrl.u32 %v6704_v4, %v2499_v35  ;;  %v2514_v44 = vshrl.u32 %v6705_v11, %v2499_v35  ;;  %vm2519_vm15 = vcmp.lt.s32.totalorder %v2497_v52, 4  ;;  %v2690_v18 = vand.u32 2147483647, %v7992_v53 }
 0x2bb   : > { %v2653_v36 = vsub.s32 0, %v8518_v43  ;;  %v2503_v34 = vor.u32 %v2502_v59, %v2501_v55  ;;  %v2506_v30 = vor.u32 %v2505_v12, %v2504_v0  ;;  %v2509_v8 = vor.u32 %v2508_v3, %v2507_v60 }
 0x2bc   : > { %v2512_v13 = vor.u32 %v2511_v17, %v2510_v19  ;;  %v2515_v6 = vor.u32 %v2514_v44, %v2513_v14  ;;  %v6066_v24 = vadd.s32 4294967169, %v2694_v9  ;;  %v2469_v28 = vsel %vm2382_vm12, %v7633_v15, %v2466_v58  ;;  %v8564_v44 = vpop.f32.mrb[20].mxu0 }
 0x2bd   : > { %v6063_v21 = vmin.u32 %v2653_v36, %v8518_v43  ;;  %vm2516_vm1 = vcmp.lt.s32.totalorder %v2497_v52, 1  ;;  %vm2518_vm2 = vcmp.lt.s32.totalorder %v2497_v52, 3  ;;  %v2521_v56 = vsel %vm2519_vm15, %v2509_v8, 2102212464 }
 0x2be   : > { %v2525_v27 = vsel %vm2519_vm15, %v2512_v13, 920167782  ;;  %v2524_v20 = vsel %vm2516_vm1, %v2503_v34, %v2506_v30  ;;  %v2528_v51 = vsel %vm2516_vm1, %v2506_v30, %v2509_v8  ;;  %v2529_v26 = vsel %vm2519_vm15, %v2515_v6, 1326507024 }
 0x2bf   : > { %v2655_v10 = vclz %v6063_v21  ;;  %v2526_v25 = vsel %vm2518_vm2, %v2509_v8, %v2525_v27  ;;  %v2530_v29 = vsel %vm2518_vm2, %v2512_v13, %v2529_v26  ;;  %v2643_v42 = vadd.s32 %v8478_v7, %v8468_v37 }
 0x2c0   : > { %v2500_v45 = vshrl.u32 %v6700_v57, %v2499_v35  ;;  %vm2517_vm4 = vcmp.lt.s32.totalorder %v2497_v52, 2  ;;  %6526 = vcosq.f32 %v2469_v28  ;;  %v2532_v33 = vshll.u32 %v2492_v62, 8 }
 0x2c1   : > { %v6064_v46 = vadd.s32 4294967294, %v2655_v10  ;;  %v2531_v41 = vsel %vm2517_vm4, %v2528_v51, %v2530_v29  ;;  %v2522_v12 = vsel %vm2518_vm2, %v2506_v30, %v2521_v56  ;;  %v2527_v3 = vsel %vm2517_vm4, %v2524_v20, %v2526_v25 }
 0x2c2   : > { %v2520_v59 = vsel %vm2516_vm1, %v2500_v45, %v2503_v34  ;;  %6528 = vsinq.f32 %v2469_v28  ;;  %v8553_v37 = vand.u32 8388607, %v2690_v18  ;;  %v2700_v7 = vadd.s32 1, %v6066_v24  ;;  %v6195_v34 = vpop.f32.mrb[21].mxu0 }
 0x2c3   : > { %vm6065_vm14 = vcmp.lt.s32.totalorder %v6064_v46, 0  ;;  %v8556_v55 = vmul.u32.u64.low %v2532_v33, %v2531_v41  ;;  %v8557_v19 = vmul.u32.u64.high %v2532_v33, %v2531_v41, %v8556_v55  ;;  %v2523_v0 = vsel %vm2517_vm4, %v2520_v59, %v2522_v12  ;;  %v1142_v10 = vpop.f32.mrb[22].mxu0 }
 0x2c4   : > { %v2658_v38 = vsel %vm6065_vm14, 0, %v6064_v46  ;;  %v8560_v60 = vmul.u32.u64.low %v2532_v33, %v2527_v3  ;;  %v8561_v14 = vmul.u32.u64.high %v2532_v33, %v2527_v3, %v8560_v60  ;;  %vm2701_vm5 = vcmp.gt.s32.totalorder %v2700_v7, 0  ;;  %v6196_v46 = vpop.f32.mrb[23].mxu0 }
 0x2c5   : > { %v2659_v47 = vsub.s32 32, %v2658_v38  ;;  %v2663_v9 = vsub.s32 4294967266, %v2658_v38  ;;  %v2660_v35 = vshll.u32 %v8518_v43, %v2658_v38  ;;  %v8566_v58 = vand.u32 3, %v2470_v50 }
 0x2c6   : > { %vm2589_vm6 = vcmp.lt.s32.totalorder %v7699_v31, 0  ;;  %v2702_v43 = vsel %vm2701_vm5, %v2700_v7, 0  ;;  %v4649_v30 = vadd.s32 3, %v2470_v50  ;;  %v2673_v8 = vsub.s32 4, %v8507_v22 }
 0x2c7   : > { %v2661_v17 = vshrl.u32 %v2643_v42, %v2659_v47  ;;  %v2664_v36 = vadd.s32 127, %v2663_v9  ;;  %v2698_v52 = vor.u32 8388608, %v8553_v37  ;;  %v2704_v6 = vand.u32 31, %v2702_v43 }
 0x2c8   : > { %v2539_v24 = vmul.u32 %v2532_v33, %v2523_v0  ;;  %vm2541_vm13 = vc.u32 %v8557_v19, %v8560_v60  ;;  %v8573_v28 = vshrl.u32 %v2702_v43, 5  ;;  %v2542_v27 = vadd.s32 1, %v8561_v14 }
 0x2c9   : > { %v2662_v21 = vor.u32 %v2661_v17, %v2660_v35  ;;  %v2665_v13 = vshll.u32 %v2664_v36, 23  ;;  %v2705_v20 = vsub.s32 32, %v2704_v6  ;;  %v2707_v51 = vshll.u32 %v6700_v57, %v2704_v6 }
 0x2ca   : > { %v2710_v50 = vshll.u32 %v6701_v61, %v2704_v6  ;;  %vm8580_vm7 = vcmp.le.f32.partialorder %v2587_v32, 0.7853982  ;;  %v2713_v29 = vshll.u32 %v6702_v63, %v2704_v6  ;;  %v2716_v42 = vshll.u32 %v6703_v2, %v2704_v6  ;;  %v8586_v38 = vpop.eup %6526 }
 0x2cb   : > { %v2666_v62 = vor.u32 4788187, %v2665_v13  ;;  %v2669_v25 = vcvt.s32.f32 %v2662_v21  ;;  %vm2479_vm11 = vcmp.eq.s32.totalorder %v8566_v58, 2  ;;  %v2543_v45 = vsel %vm2541_vm13, %v2542_v27, %v8561_v14 }
 0x2cc   : > { %v2708_v47 = vshrl.u32 %v6701_v61, %v2705_v20  ;;  %v2711_v41 = vshrl.u32 %v6702_v63, %v2705_v20  ;;  %v2719_v32 = vshll.u32 %v6704_v4, %v2704_v6  ;;  %vm2476_vm0 = vcmp.eq.s32.totalorder %v8566_v58, 0  ;;  %v6529_v3 = vpop.eup %6528 }
 0x2cd   : > { %v2667_v56 = vand.u32 2147483647, %v2666_v62  ;;  %v2544_v9 = vadd.s32 %v2543_v45, %v2539_v24  ;;  %v2714_v59 = vshrl.u32 %v6703_v2, %v2705_v20  ;;  %v2717_v12 = vshrl.u32 %v6704_v4, %v2705_v20 }
 0x2ce   : > { %v2709_v17 = vor.u32 %v2708_v47, %v2707_v51  ;;  %v2712_v37 = vor.u32 %v2711_v41, %v2710_v50  ;;  %v2720_v7 = vshrl.u32 %v6705_v11, %v2705_v20  ;;  %vm2722_vm8 = vcmp.lt.s32.totalorder %v8573_v28, 1 }
 0x2cf   : > { %v2670_v33 = vmul.f32 %v2669_v25, %v2667_v56  ;;  %v2545_v36 = vadd.s32 536870912, %v2544_v9  ;;  %v2715_v55 = vor.u32 %v2714_v59, %v2713_v29  ;;  %v2718_v0 = vor.u32 %v2717_v12, %v2716_v42 }
 0x2d0   : > { %vm2475_vm3 = vcmp.lt.s32.totalorder %v8566_v58, 2  ;;  %v4650_v14 = vand.u32 3, %v4649_v30  ;;  %v2674_v21 = vsel %vm2589_vm6, %v2673_v8, %v8507_v22  ;;  %v2721_v13 = vor.u32 %v2720_v7, %v2719_v32 }
 0x2d1   : > { %v2671_v35 = vxor.u32 2147483648, %v2670_v33  ;;  %vm2725_vm10 = vcmp.lt.s32.totalorder %v8573_v28, 4  ;;  %v2480_v43 = vxor.u32 2147483648, %v8586_v38  ;;  %v2546_v6 = vshrl.u32 %v2545_v36, 30 }
 0x2d2   : > { %vm2724_vm12 = vcmp.lt.s32.totalorder %v8573_v28, 3  ;;  %v2477_v10 = vxor.u32 2147483648, %v6529_v3  ;;  %vm2723_vm15 = vcmp.lt.s32.totalorder %v8573_v28, 2  ;;  %v2730_v30 = vsel %vm2722_vm8, %v2709_v17, %v2712_v37 }
 0x2d3   : > { %v2672_v34 = vsel %vm2589_vm6, %v2671_v35, %v2670_v33  ;;  %v2731_v22 = vsel %vm2725_vm10, %v2718_v0, 920167782  ;;  %vm2473_vm1 = vweird.f32 %v7633_v15  ;;  %vm2486_vm2 = vcmp.lt.s32.totalorder %v7849_v48, 0 }
 0x2d4   : > { %v2547_v8 = vshll.u32 %v2546_v6, 30  ;;  %v2706_v62 = vshrl.u32 %v6700_v57, %v2705_v20  ;;  %v2727_v24 = vsel %vm2725_vm10, %v2715_v55, 2102212464  ;;  %v2738_v46 = vshll.u32 %v2698_v52, 8 }
 0x2d5   : > { %v2675_v27 = vsel %vm8580_vm7, %v7699_v31, %v2672_v34  ;;  %v2732_v51 = vsel %vm2724_vm12, %v2715_v55, %v2731_v22  ;;  %v2734_v50 = vsel %vm2722_vm8, %v2712_v37, %v2715_v55  ;;  %v2735_v56 = vsel %vm2725_vm10, %v2721_v13, 1326507024 }
 0x2d6   : > { %v2481_v20 = vsel %vm2479_vm11, %v2480_v43, %v6529_v3  ;;  %v8628_v25 = vsub.s32 %v2544_v9, %v2547_v8  ;;  %v2733_v52 = vsel %vm2723_vm15, %v2730_v30, %v2732_v51  ;;  %v2736_v29 = vsel %vm2724_vm12, %v2718_v0, %v2735_v56 }
 0x2d7   : > { %v2478_v42 = vsel %vm2476_vm0, %v8586_v38, %v2477_v10  ;;  %v2737_v45 = vsel %vm2723_vm15, %v2734_v50, %v2736_v29  ;;  %v8639_v47 = vmul.u32.u64.low %v2738_v46, %v2733_v52  ;;  %v8640_v41 = vmul.u32.u64.high %v2738_v46, %v2733_v52, %v8639_v47 }
 0x2d8   : > { %6530 = vcosq.f32 %v2675_v27  ;;  %v2550_v32 = vsub.s32 0, %v8628_v25  ;;  %v2726_v33 = vsel %vm2722_vm8, %v2706_v62, %v2709_v17  ;;  %v2728_v9 = vsel %vm2724_vm12, %v2712_v37, %v2727_v24 }
 0x2d9   : > { %6532 = vsinq.f32 %v2675_v27  ;;  %v2570_v59 = vsub.s32 4, %v2546_v6  ;;  %v8648_v12 = vmul.u32.u64.low %v2738_v46, %v2737_v45  ;;  %v8649_v7 = vmul.u32.u64.high %v2738_v46, %v2737_v45, %v8648_v12 }
 0x2da   : > { %v2482_v35 = vsel %vm2475_vm3, %v2478_v42, %v2481_v20  ;;  %vm4652_vm14 = vcmp.eq.s32.totalorder %v4650_v14, 0  ;;  %v2676_v36 = vsel %vm8580_vm7, 0, %v2674_v21  ;;  %v6059_v55 = vmin.u32 %v2550_v32, %v8628_v25 }
 0x2db   : > { %vm4655_vm4 = vcmp.eq.s32.totalorder %v4650_v14, 2  ;;  %v2729_v17 = vsel %vm2723_vm15, %v2726_v33, %v2728_v9  ;;  %v2748_v37 = vadd.s32 1, %v8640_v41  ;;  %v2796_v0 = vand.u32 2139095040, %v8093_v23 }
 0x2dc   : > { %vm4651_vm5 = vcmp.lt.s32.totalorder %v4650_v14, 2  ;;  %v4654_v13 = vsel %vm4652_vm14, %v8586_v38, %v2477_v10  ;;  %v4657_v34 = vsel %vm4655_vm4, %v2480_v43, %v6529_v3  ;;  %v2552_v58 = vclz %v6059_v55 }
 0x2dd   : > { %v2483_v30 = vsel %vm2473_vm1, nan, %v2482_v35  ;;  %v8663_v26 = vand.u32 3, %v2676_v36  ;;  %v4857_v21 = vadd.s32 3, %v2676_v36  ;;  %v2571_v22 = vsel %vm2486_vm2, %v2570_v59, %v2546_v6 }
 0x2de   : > { %v6060_v28 = vadd.s32 4294967294, %v2552_v58  ;;  %v2745_v8 = vmul.u32 %v2738_v46, %v2729_v17  ;;  %vm2747_vm6 = vc.u32 %v8649_v7, %v8639_v47  ;;  %v2797_v62 = vshrl.u32 %v2796_v0, 23 }
 0x2df   : > { %v4658_v14 = vsel %vm4651_vm5, %v4654_v13, %v4657_v34  ;;  %v5636_v38 = vrot.slane %v7699_v31, %v7102_v54  ;;  %vm8673_vm13 = vcmp.le.f32.partialorder %v2484_v49, 0.7853982  ;;  %v2749_v43 = vsel %vm2747_vm6, %v2748_v37, %v8640_v41 }
 0x2e0   : > { %v5525_v10 = vrot.slane %v2483_v30, 1  ;;  %vm6061_vm7 = vcmp.lt.s32.totalorder %v6060_v28, 0  ;;  %v2750_v6 = vadd.s32 %v2749_v43, %v2745_v8  ;;  %v6070_v24 = vadd.s32 4294967169, %v2797_v62 }
 0x2e1   : > { %v4858_v46 = vand.u32 3, %v4857_v21  ;;  %v2555_v27 = vsel %vm6061_vm7, 0, %v6060_v28  ;;  %v2573_v51 = vsel %vm8673_vm13, 0, %v2571_v22  ;;  %v2793_v50 = vand.u32 2147483647, %v8093_v23 }
 0x2e2   : > { %v6531_v56 = vpop.eup %6530  ;;  %vm2682_vm11 = vcmp.eq.s32.totalorder %v8663_v26, 0  ;;  %v2540_v49 = vadd.s32 %v8560_v60, %v8557_v19  ;;  %v2556_v20 = vsub.s32 32, %v2555_v27  ;;  %v5632_v52 = vrot.slane %v7849_v48, %v7102_v54 }
 0x2e3   : > { %v6533_v29 = vpop.eup %6532  ;;  %v4659_v42 = vsel %vm2473_vm1, nan, %v4658_v14  ;;  %vm2685_vm0 = vcmp.eq.s32.totalorder %v8663_v26, 2  ;;  %v2560_v45 = vsub.s32 4294967266, %v2555_v27  ;;  %v2751_v41 = vadd.s32 536870912, %v2750_v6 }
 0x2e4   : > { %v5568_v32 = vsel %vm5555_vm9, %v5525_v10, %v4659_v42  ;;  %vm2681_vm8 = vcmp.lt.s32.totalorder %v8663_v26, 2  ;;  %v2558_v33 = vshrl.u32 %v2540_v49, %v2556_v20  ;;  %v4753_v9 = vadd.s32 3, %v2573_v51 }
 0x2e5   : > { %v2803_v59 = vadd.s32 1, %v6070_v24  ;;  %vm4859_vm3 = vcmp.lt.s32.totalorder %v4858_v46, 2  ;;  %v2557_v19 = vshll.u32 %v8628_v25, %v2555_v27  ;;  %v2561_v60 = vadd.s32 127, %v2560_v45 }
 0x2e6   : > { %v8692_v12 = vshrl.u32 %v2751_v41, 30  ;;  %v2800_v35 = vand.u32 8388607, %v2793_v50  ;;  %v2683_v36 = vxor.u32 2147483648, %v6533_v29  ;;  %v2686_v55 = vxor.u32 2147483648, %v6531_v56 }
 0x2e7   : > { %vm4860_vm10 = vcmp.eq.s32.totalorder %v4858_v46, 0  ;;  %vm2804_vm12 = vcmp.gt.s32.totalorder %v2803_v59, 0  ;;  %vm4863_vm15 = vcmp.eq.s32.totalorder %v4858_v46, 2  ;;  %v2559_v17 = vor.u32 %v2558_v33, %v2557_v19 }
 0x2e8   : > { %v2562_v37 = vshll.u32 %v2561_v60, 23  ;;  %v2753_v0 = vshll.u32 %v8692_v12, 30  ;;  %v8700_v13 = vmul.f32 %v5628_v39, %v5568_v32  ;;  %v8702_v25 = vand.u32 3, %v2573_v51 }
 0x2e9   : > { %v2805_v34 = vsel %vm2804_vm12, %v2803_v59, 0  ;;  %v3002_v58 = vand.u32 2139095040, %v8175_v1  ;;  %v8705_v21 = vand.u32 3, %v4753_v9  ;;  %v2801_v28 = vor.u32 8388608, %v2800_v35 }
 0x2ea   : > { %v2563_v30 = vor.u32 4788187, %v2562_v37  ;;  %v8707_v22 = vsub.s32 %v2750_v6, %v2753_v0  ;;  %v2684_v8 = vsel %vm2682_vm11, %v6531_v56, %v2683_v36  ;;  %v2687_v62 = vsel %vm2685_vm0, %v2686_v55, %v6533_v29 }
 0x2eb   : > { %v4865_v15 = vsel %vm4863_vm15, %v2686_v55, %v6533_v29  ;;  %v2807_v39 = vand.u32 31, %v2805_v34  ;;  %v4862_v14 = vsel %vm4860_vm10, %v6531_v56, %v2683_v36  ;;  %v2566_v10 = vcvt.s32.f32 %v2559_v17 }
 0x2ec   : > { %v2564_v43 = vand.u32 2147483647, %v2563_v30  ;;  %v2756_v24 = vsub.s32 0, %v8707_v22  ;;  %v2746_v27 = vadd.s32 %v8639_v47, %v8649_v7  ;;  %v2999_v51 = vand.u32 2147483647, %v8175_v1 }
 0x2ed   : > { %v2808_v6 = vsub.s32 32, %v2807_v39  ;;  %v3003_v49 = vshrl.u32 %v3002_v58, 23  ;;  %v8720_v20 = vsel %vm2681_vm8, %v2684_v8, %v2687_v62  ;;  %v8723_v45 = vshll.u32 %v2801_v28, 8 }
 0x2ee   : > { %v2567_v42 = vmul.f32 %v2566_v10, %v2564_v43  ;;  %v6067_v29 = vmin.u32 %v2756_v24, %v8707_v22  ;;  %v8726_v56 = vsel %vm4859_vm3, %v4862_v14, %v4865_v15  ;;  %v2810_v41 = vshll.u32 %v6700_v57, %v2807_v39 }
 0x2ef   : > { %v2811_v47 = vshrl.u32 %v6701_v61, %v2808_v6  ;;  %v2813_v7 = vshll.u32 %v6701_v61, %v2807_v39  ;;  %v2814_v26 = vshrl.u32 %v6702_v63, %v2808_v6  ;;  %v2817_v9 = vshrl.u32 %v6703_v2, %v2808_v6 }
 0x2f0   : > { %v2568_v32 = vxor.u32 2147483648, %v2567_v42  ;;  %v2758_v33 = vclz %v6067_v29  ;;  %v2776_v59 = vsub.s32 4, %v8692_v12  ;;  %v8734_v19 = vshrl.u32 %v2805_v34, 5 }
 0x2f1   : > { %v2816_v46 = vshll.u32 %v6702_v63, %v2807_v39  ;;  %v6078_v60 = vadd.s32 4294967169, %v3003_v49  ;;  %v2812_v55 = vor.u32 %v2811_v47, %v2810_v41  ;;  %v2815_v17 = vor.u32 %v2814_v26, %v2813_v7 }
 0x2f2   : > { %v2569_v35 = vsel %vm2486_vm2, %v2568_v32, %v2567_v42  ;;  %v6068_v36 = vadd.s32 4294967294, %v2758_v33  ;;  %vm2679_vm1 = vweird.f32 %v7699_v31  ;;  %v2819_v58 = vshll.u32 %v6703_v2, %v2807_v39 }
 0x2f3   : > { %v2572_v37 = vsel %vm8673_vm13, %v7849_v48, %v2569_v35  ;;  %v2818_v0 = vor.u32 %v2817_v9, %v2816_v46  ;;  %v2820_v34 = vshrl.u32 %v6704_v4, %v2808_v6  ;;  %vm2692_vm14 = vcmp.lt.s32.totalorder %v7992_v53, 0 }
 0x2f4   : > { %6534 = vcosq.f32 %v2572_v37  ;;  %vm6069_vm4 = vcmp.lt.s32.totalorder %v6068_v36, 0  ;;  %v2822_v30 = vshll.u32 %v6704_v4, %v2807_v39  ;;  %v2823_v28 = vshrl.u32 %v6705_v11, %v2808_v6 }
 0x2f5   : > { %6536 = vsinq.f32 %v2572_v37  ;;  %v2761_v8 = vsel %vm6069_vm4, 0, %v6068_v36  ;;  %v2809_v62 = vshrl.u32 %v6700_v57, %v2808_v6  ;;  %v2821_v15 = vor.u32 %v2820_v34, %v2819_v58 }
 0x2f6   : > { %v2762_v3 = vsub.s32 32, %v2761_v8  ;;  %v2766_v14 = vsub.s32 4294967266, %v2761_v8  ;;  %v2824_v43 = vor.u32 %v2823_v28, %v2822_v30  ;;  %vm2825_vm2 = vcmp.lt.s32.totalorder %v8734_v19, 1 }
 0x2f7   : > { %vm8752_vm5 = vcmp.le.f32.partialorder %v2690_v18, 0.7853982  ;;  %v2763_v39 = vshll.u32 %v8707_v22, %v2761_v8  ;;  %vm2827_vm6 = vcmp.lt.s32.totalorder %v8734_v19, 3  ;;  %vm2828_vm13 = vcmp.lt.s32.totalorder %v8734_v19, 4 }
 0x2f8   : > { %v2833_v24 = vsel %vm2825_vm2, %v2812_v55, %v2815_v17  ;;  %vm2582_vm7 = vcmp.eq.s32.totalorder %v8702_v25, 2  ;;  %vm4759_vm11 = vcmp.eq.s32.totalorder %v8705_v21, 2  ;;  %v2764_v6 = vshrl.u32 %v2746_v27, %v2762_v3 }
 0x2f9   : > { %v2767_v49 = vadd.s32 127, %v2766_v14  ;;  %v2830_v42 = vsel %vm2828_vm13, %v2818_v0, 2102212464  ;;  %v2834_v18 = vsel %vm2828_vm13, %v2821_v15, 920167782  ;;  %vm2579_vm0 = vcmp.eq.s32.totalorder %v8702_v25, 0 }
 0x2fa   : > { %vm4756_vm8 = vcmp.eq.s32.totalorder %v8705_v21, 0  ;;  %vm2826_vm3 = vcmp.lt.s32.totalorder %v8734_v19, 2  ;;  %v2835_v22 = vsel %vm2827_vm6, %v2818_v0, %v2834_v18  ;;  %v2837_v29 = vsel %vm2825_vm2, %v2815_v17, %v2818_v0 }
 0x2fb   : > { %v2838_v41 = vsel %vm2828_vm13, %v2824_v43, 1326507024  ;;  %vm2578_vm10 = vcmp.lt.s32.totalorder %v8702_v25, 2  ;;  %vm4755_vm12 = vcmp.lt.s32.totalorder %v8705_v21, 2  ;;  %v2765_v27 = vor.u32 %v2764_v6, %v2763_v39 }
 0x2fc   : > { %v2768_v47 = vshll.u32 %v2767_v49, 23  ;;  %v2829_v7 = vsel %vm2825_vm2, %v2809_v62, %v2812_v55  ;;  %v2836_v32 = vsel %vm2826_vm3, %v2833_v24, %v2835_v22  ;;  %vm2576_vm15 = vweird.f32 %v7849_v48 }
 0x2fd   : > { %v2831_v33 = vsel %vm2827_vm6, %v2815_v17, %v2830_v42  ;;  %v2839_v26 = vsel %vm2827_vm6, %v2821_v15, %v2838_v41  ;;  %v8782_v9 = vmul.u32.u64.low %v8723_v45, %v2836_v32  ;;  %v8783_v46 = vmul.u32.u64.high %v8723_v45, %v2836_v32, %v8782_v9 }
 0x2fe   : > { %v2689_v35 = vsel %vm2679_vm1, nan, %v8720_v20  ;;  %v2769_v36 = vor.u32 4788187, %v2768_v47  ;;  %v2840_v55 = vsel %vm2826_vm3, %v2837_v29, %v2839_v26  ;;  %v3009_v37 = vadd.s32 1, %v6078_v60  ;;  %v6535_v30 = vpop.eup %6534 }
 0x2ff   : > { %v4867_v17 = vsel %vm2679_vm1, nan, %v8726_v56  ;;  %v2777_v0 = vsel %vm2692_vm14, %v2776_v59, %v8692_v12  ;;  %v8798_v58 = vmul.u32.u64.low %v8723_v45, %v2840_v55  ;;  %v8799_v34 = vmul.u32.u64.high %v8723_v45, %v2840_v55, %v8798_v58  ;;  %v6537_v60 = vpop.eup %6536 }
 0x300   : > { %v2770_v28 = vand.u32 2147483647, %v2769_v36  ;;  %v2772_v20 = vcvt.s32.f32 %v2765_v27  ;;  %v2832_v8 = vsel %vm2826_vm3, %v2829_v7, %v2831_v33  ;;  %vm3010_vm4 = vcmp.gt.s32.totalorder %v3009_v37, 0 }
 0x301   : > { %v5527_v62 = vrot.slane %v2689_v35, 1  ;;  %v2583_v15 = vxor.u32 2147483648, %v6535_v30  ;;  %v2851_v56 = vadd.s32 1, %v8783_v46  ;;  %v3011_v3 = vsel %vm3010_vm4, %v3009_v37, 0 }
 0x302   : > { %v2580_v14 = vxor.u32 2147483648, %v6537_v60  ;;  %v2773_v43 = vmul.f32 %v2772_v20, %v2770_v28  ;;  %v2779_v12 = vsel %vm8752_vm5, 0, %v2777_v0  ;;  %v3013_v59 = vand.u32 31, %v3011_v3 }
 0x303   : > { %v2584_v39 = vsel %vm2582_vm7, %v2583_v15, %v6537_v60  ;;  %v4761_v19 = vsel %vm4759_vm11, %v2583_v15, %v6537_v60  ;;  %v2848_v24 = vmul.u32 %v8723_v45, %v2832_v8  ;;  %vm2850_vm1 = vc.u32 %v8799_v34, %v8782_v9 }
 0x304   : > { %v2581_v6 = vsel %vm2579_vm0, %v6535_v30, %v2580_v14  ;;  %v4758_v49 = vsel %vm4756_vm8, %v6535_v30, %v2580_v14  ;;  %v2774_v42 = vxor.u32 2147483648, %v2773_v43  ;;  %v2852_v18 = vsel %vm2850_vm1, %v2851_v56, %v8783_v46 }
 0x305   : > { %v2585_v22 = vsel %vm2578_vm10, %v2581_v6, %v2584_v39  ;;  %v4762_v29 = vsel %vm4755_vm12, %v4758_v49, %v4761_v19  ;;  %v2853_v41 = vadd.s32 %v2852_v18, %v2848_v24  ;;  %v3014_v45 = vsub.s32 32, %v3013_v59 }
 0x306   : > { %v5570_v27 = vsel %vm5555_vm9, %v5527_v62, %v4867_v17  ;;  %v2586_v47 = vsel %vm2576_vm15, nan, %v2585_v22  ;;  %v2775_v7 = vsel %vm2692_vm14, %v2774_v42, %v2773_v43  ;;  %v3006_v32 = vand.u32 8388607, %v2999_v51 }
 0x307   : > { %v5526_v33 = vrot.slane %v2586_v47, 1  ;;  %v2778_v25 = vsel %vm8752_vm5, %v7992_v53, %v2775_v7  ;;  %v8832_v21 = vand.u32 3, %v2779_v12  ;;  %v2854_v26 = vadd.s32 536870912, %v2853_v41 }
 0x308   : > { %v4763_v46 = vsel %vm2576_vm15, nan, %v4762_v29  ;;  %6538 = vcosq.f32 %v2778_v25  ;;  %v4961_v35 = vadd.s32 3, %v2779_v12  ;;  %v3016_v36 = vshll.u32 %v6700_v57, %v3013_v59 }
 0x309   : > { %v5569_v55 = vsel %vm5555_vm9, %v5526_v33, %v4763_v46  ;;  %6540 = vsinq.f32 %v2778_v25  ;;  %v8838_v37 = vshrl.u32 %v2854_v26, 30  ;;  %v3017_v17 = vshrl.u32 %v6701_v61, %v3014_v45 }
 0x30a   : > { %v8844_v10 = vmul.f32 %v5632_v52, %v5569_v55  ;;  %v3019_v0 = vshll.u32 %v6701_v61, %v3013_v59  ;;  %v3020_v58 = vshrl.u32 %v6702_v63, %v3014_v45  ;;  %v3022_v30 = vshll.u32 %v6702_v63, %v3013_v59 }
 0x30b   : > { %v2856_v28 = vshll.u32 %v8838_v37, 30  ;;  %v3023_v20 = vshrl.u32 %v6703_v2, %v3014_v45  ;;  %v3025_v8 = vshll.u32 %v6703_v2, %v3013_v59  ;;  %v3026_v60 = vshrl.u32 %v6704_v4, %v3014_v45 }
 0x30c   : > { %v8856_v48 = vmul.f32 %v5636_v38, %v5570_v27  ;;  %v5754_v52 = vcombine.low %v8700_v13, %v8844_v10  ;;  %v5640_v62 = vrot.slane %v7992_v53, %v7102_v54  ;;  %v8862_v15 = vshrl.u32 %v3011_v3, 5 }
 0x30d   : > { %vm2785_vm14 = vcmp.eq.s32.totalorder %v8832_v21, 0  ;;  %v4962_v56 = vand.u32 3, %v4961_v35  ;;  %v8865_v14 = vsub.s32 %v2853_v41, %v2856_v28  ;;  %v3007_v43 = vor.u32 8388608, %v3006_v32 }
 0x30e   : > { %vm2784_vm2 = vcmp.lt.s32.totalorder %v8832_v21, 2  ;;  %vm2788_vm5 = vcmp.eq.s32.totalorder %v8832_v21, 2  ;;  %v3027_v31 = vor.u32 %v3026_v60, %v3025_v8  ;;  %v3028_v38 = vshll.u32 %v6704_v4, %v3013_v59 }
 0x30f   : > { %v3029_v12 = vshrl.u32 %v6705_v11, %v3014_v45  ;;  %vm2782_vm6 = vweird.f32 %v7992_v53  ;;  %v2859_v3 = vsub.s32 0, %v8865_v14  ;;  %v3018_v39 = vor.u32 %v3017_v17, %v3016_v36 }
 0x310   : > { %v3021_v19 = vor.u32 %v3020_v58, %v3019_v0  ;;  %v3024_v24 = vor.u32 %v3023_v20, %v3022_v30  ;;  %v3015_v6 = vshrl.u32 %v6700_v57, %v3014_v45  ;;  %vm3031_vm13 = vcmp.lt.s32.totalorder %v8862_v15, 1 }
 0x311   : > { %vm3033_vm7 = vcmp.lt.s32.totalorder %v8862_v15, 3  ;;  %vm3034_vm11 = vcmp.lt.s32.totalorder %v8862_v15, 4  ;;  %vm4963_vm0 = vcmp.lt.s32.totalorder %v4962_v56, 2  ;;  %vm4964_vm8 = vcmp.eq.s32.totalorder %v4962_v56, 0 }
 0x312   : > { %vm4967_vm3 = vcmp.eq.s32.totalorder %v4962_v56, 2  ;;  %v6071_v59 = vmin.u32 %v2859_v3, %v8865_v14  ;;  %v6539_v49 = vpop.eup %6538  ;;  %v3030_v42 = vor.u32 %v3029_v12, %v3028_v38  ;;  %vm3032_vm10 = vcmp.lt.s32.totalorder %v8862_v15, 2 }
 0x313   : > { %v3040_v18 = vsel %vm3034_vm11, %v3027_v31, 920167782  ;;  %v3047_v22 = vshll.u32 %v3007_v43, 8  ;;  %v6541_v29 = vpop.eup %6540  ;;  %v2789_v41 = vxor.u32 2147483648, %v6539_v49  ;;  %v3039_v27 = vsel %vm3031_vm13, %v3018_v39, %v3021_v19 }
 0x314   : > { %v2861_v45 = vclz %v6071_v59  ;;  %v3041_v47 = vsel %vm3033_vm7, %v3024_v24, %v3040_v18  ;;  %v2786_v7 = vxor.u32 2147483648, %v6541_v29  ;;  %v3035_v32 = vsel %vm3031_vm13, %v3015_v6, %v3018_v39 }
 0x315   : > { %v3043_v33 = vsel %vm3031_vm13, %v3021_v19, %v3024_v24  ;;  %v2899_v25 = vand.u32 2139095040, %v8303_v5  ;;  %v2790_v26 = vsel %vm2788_vm5, %v2789_v41, %v6541_v29  ;;  %v4969_v46 = vsel %vm4967_vm3, %v2789_v41, %v6541_v29 }
 0x316   : > { %v6072_v35 = vadd.s32 4294967294, %v2861_v45  ;;  %v3036_v36 = vsel %vm3034_vm11, %v3024_v24, 2102212464  ;;  %v2787_v55 = vsel %vm2785_vm14, %v6539_v49, %v2786_v7  ;;  %v4966_v17 = vsel %vm4964_vm8, %v6539_v49, %v2786_v7 }
 0x317   : > { %v3042_v0 = vsel %vm3032_vm10, %v3039_v27, %v3041_v47  ;;  %v3044_v58 = vsel %vm3034_vm11, %v3030_v42, 1326507024  ;;  %v2791_v30 = vsel %vm2784_vm2, %v2787_v55, %v2790_v26  ;;  %v4970_v28 = vsel %vm4963_vm0, %v4966_v17, %v4969_v46 }
 0x318   : > { %vm6073_vm12 = vcmp.lt.s32.totalorder %v6072_v35, 0  ;;  %v3045_v20 = vsel %vm3033_vm7, %v3027_v31, %v3044_v58  ;;  %v2792_v8 = vsel %vm2782_vm6, nan, %v2791_v30  ;;  %v2900_v38 = vshrl.u32 %v2899_v25, 23 }
 0x319   : > { %v2864_v60 = vsel %vm6073_vm12, 0, %v6072_v35  ;;  %v3046_v43 = vsel %vm3032_vm10, %v3043_v33, %v3045_v20  ;;  %v4971_v12 = vsel %vm2782_vm6, nan, %v4970_v28  ;;  %v5528_v3 = vrot.slane %v2792_v8, 1 }
 0x31a   : > { %v2869_v21 = vsub.s32 4294967266, %v2864_v60  ;;  %v3037_v56 = vsel %vm3033_vm7, %v3021_v19, %v3036_v36  ;;  %v8915_v39 = vmul.u32.u64.low %v3047_v22, %v3046_v43  ;;  %v8916_v24 = vmul.u32.u64.high %v3047_v22, %v3046_v43, %v8915_v39 }
 0x31b   : > { %v8918_v31 = vmul.u32.u64.low %v3047_v22, %v3042_v0  ;;  %v8919_v6 = vmul.u32.u64.high %v3047_v22, %v3042_v0, %v8918_v31  ;;  %v5571_v59 = vsel %vm5555_vm9, %v5528_v3, %v4971_v12  ;;  %v3038_v42 = vsel %vm3032_vm10, %v3035_v32, %v3037_v56 }
 0x31c   : > { %v5676_v49 = vmul.f32 %v5640_v62, %v5571_v59  ;;  %v6074_v53 = vadd.s32 4294967169, %v2900_v38  ;;  %v5762_v18 = vrot.slane %v5754_v52, %v7164_v40  ;;  %v2870_v29 = vadd.s32 127, %v2869_v21 }
 0x31d   : > { %vm3056_vm15 = vc.u32 %v8916_v24, %v8918_v31  ;;  %v3057_v41 = vadd.s32 1, %v8919_v6  ;;  %v3054_v45 = vmul.u32 %v3047_v22, %v3038_v42  ;;  %v2865_v13 = vsub.s32 32, %v2864_v60 }
 0x31e   : > { %v5755_v19 = vcombine.low %v8856_v48, %v5676_v49  ;;  %v2906_v62 = vadd.s32 1, %v6074_v53  ;;  %v2871_v10 = vshll.u32 %v2870_v29, 23  ;;  %v2849_v33 = vadd.s32 %v8782_v9, %v8799_v34 }
 0x31f   : > { %v3058_v27 = vsel %vm3056_vm15, %v3057_v41, %v8919_v6  ;;  %v2896_v25 = vand.u32 2147483647, %v8303_v5  ;;  %v2866_v55 = vshll.u32 %v8865_v14, %v2864_v60  ;;  %v3105_v8 = vand.u32 2139095040, %v8443_v16 }
 0x320   : > { %v5769_v15 = vrot.slane %v5755_v19, %v7164_v40  ;;  %v3059_v47 = vadd.s32 %v3058_v27, %v3054_v45  ;;  %vm2907_vm4 = vcmp.gt.s32.totalorder %v2906_v62, 0  ;;  %v2867_v46 = vshrl.u32 %v2849_v33, %v2865_v13 }
 0x321   : > { %v2908_v52 = vsel %vm2907_vm4, %v2906_v62, 0  ;;  %v2872_v35 = vor.u32 4788187, %v2871_v10  ;;  %v2903_v17 = vand.u32 8388607, %v2896_v25  ;;  %v3106_v19 = vshrl.u32 %v3105_v8, 23 }
 0x322   : > { %v5770_v7 = vcombine.low %v5762_v18, %v5769_v15  ;;  %v3060_v48 = vadd.s32 536870912, %v3059_v47  ;;  %v2910_v32 = vand.u32 31, %v2908_v52  ;;  %v2868_v30 = vor.u32 %v2867_v46, %v2866_v55 }
 0x323   : > { %v2873_v28 = vand.u32 2147483647, %v2872_v35  ;;  %v2909_v12 = vshrl.u32 %v2908_v52, 5  ;;  %v2904_v45 = vor.u32 8388608, %v2903_v17  ;;  %v6082_v10 = vadd.s32 4294967169, %v3106_v19 }
 0x324   : > { %5804 = vst [vmem:[%s7569_s23 + $0x18] sm:$0xff] %v5770_v7  ;;  %v8939_v22 = vshrl.u32 %v3060_v48, 30  ;;  %v2911_v26 = vsub.s32 32, %v2910_v32  ;;  %v2916_v14 = vshll.u32 %v6701_v61, %v2910_v32  ;;  %v2919_v60 = vshll.u32 %v6702_v63, %v2910_v32 }
 0x325   : > { %v2922_v38 = vshll.u32 %v6703_v2, %v2910_v32  ;;  %v2913_v3 = vshll.u32 %v6700_v57, %v2910_v32  ;;  %v2925_v21 = vshll.u32 %v6704_v4, %v2910_v32  ;;  %v2875_v42 = vcvt.s32.f32 %v2868_v30 }
 0x326   : > { %v3062_v36 = vshll.u32 %v8939_v22, 30  ;;  %v2917_v58 = vshrl.u32 %v6702_v63, %v2911_v26  ;;  %v2920_v9 = vshrl.u32 %v6703_v2, %v2911_v26  ;;  %v2923_v34 = vshrl.u32 %v6704_v4, %v2911_v26 }
 0x327   : > { %v2914_v20 = vshrl.u32 %v6701_v61, %v2911_v26  ;;  %v2926_v56 = vshrl.u32 %v6705_v11, %v2911_v26  ;;  %v2876_v41 = vmul.f32 %v2875_v42, %v2873_v28  ;;  %vm2928_vm1 = vcmp.lt.s32.totalorder %v2909_v12, 1 }
 0x328   : > { %v8945_v0 = vsub.s32 %v3059_v47, %v3062_v36  ;;  %v2918_v6 = vor.u32 %v2917_v58, %v2916_v14  ;;  %v2921_v59 = vor.u32 %v2920_v9, %v2919_v60  ;;  %v2924_v49 = vor.u32 %v2923_v34, %v2922_v38 }
 0x329   : > { %v2915_v53 = vor.u32 %v2914_v20, %v2913_v3  ;;  %v2927_v18 = vor.u32 %v2926_v56, %v2925_v21  ;;  %vm2931_vm14 = vcmp.lt.s32.totalorder %v2909_v12, 4  ;;  %vm2930_vm2 = vcmp.lt.s32.totalorder %v2909_v12, 3 }
 0x32a   : > { %v3065_v43 = vsub.s32 0, %v8945_v0  ;;  %v2937_v15 = vsel %vm2931_vm14, %v2924_v49, 920167782  ;;  %v2940_v27 = vsel %vm2928_vm1, %v2918_v6, %v2921_v59  ;;  %vm2929_vm6 = vcmp.lt.s32.totalorder %v2909_v12, 2 }
 0x32b   : > { %v2936_v47 = vsel %vm2928_vm1, %v2915_v53, %v2918_v6  ;;  %v2938_v7 = vsel %vm2930_vm2, %v2921_v59, %v2937_v15  ;;  %v2941_v13 = vsel %vm2931_vm14, %v2927_v18, 1326507024  ;;  %v2933_v48 = vsel %vm2931_vm14, %v2921_v59, 2102212464 }
 0x32c   : > { %v6079_v39 = vmin.u32 %v3065_v43, %v8945_v0  ;;  %v2942_v52 = vsel %vm2930_vm2, %v2924_v49, %v2941_v13  ;;  %v2944_v33 = vshll.u32 %v2904_v45, 8  ;;  %v2877_v46 = vxor.u32 2147483648, %v2876_v41 }
 0x32d   : > { %v2943_v32 = vsel %vm2929_vm6, %v2940_v27, %v2942_v52  ;;  %v2912_v35 = vshrl.u32 %v6700_v57, %v2911_v26  ;;  %v2939_v36 = vsel %vm2929_vm6, %v2936_v47, %v2938_v7  ;;  %v3112_v9 = vadd.s32 1, %v6082_v10 }
 0x32e   : > { %v3067_v29 = vclz %v6079_v39  ;;  %v8969_v17 = vmul.u32.u64.low %v2944_v33, %v2943_v32  ;;  %v8970_v58 = vmul.u32.u64.high %v2944_v33, %v2943_v32, %v8969_v17  ;;  %v2934_v30 = vsel %vm2930_vm2, %v2918_v6, %v2933_v48 }
 0x32f   : > { %v2932_v34 = vsel %vm2928_vm1, %v2912_v35, %v2915_v53  ;;  %v2879_v28 = vsub.s32 4, %v8838_v37  ;;  %v8975_v20 = vmul.u32.u64.low %v2944_v33, %v2939_v36  ;;  %v8976_v8 = vmul.u32.u64.high %v2944_v33, %v2939_v36, %v8975_v20 }
 0x330   : > { %v6080_v62 = vadd.s32 4294967294, %v3067_v29  ;;  %vm2795_vm13 = vcmp.lt.s32.totalorder %v8093_v23, 0  ;;  %v3102_v43 = vand.u32 2147483647, %v8443_v16  ;;  %v2935_v60 = vsel %vm2929_vm6, %v2932_v34, %v2934_v30 }
 0x331   : > { %v2878_v14 = vsel %vm2795_vm13, %v2877_v46, %v2876_v41  ;;  %vm3113_vm7 = vcmp.gt.s32.totalorder %v3112_v9, 0  ;;  %vm8985_vm11 = vcmp.le.f32.partialorder %v2793_v50, 0.7853982  ;;  %vm2953_vm0 = vc.u32 %v8970_v58, %v8975_v20 }
 0x332   : > { %vm6081_vm5 = vcmp.lt.s32.totalorder %v6080_v62, 0  ;;  %v3114_v3 = vsel %vm3113_vm7, %v3112_v9, 0  ;;  %v2880_v21 = vsel %vm2795_vm13, %v2879_v28, %v8838_v37  ;;  %v3055_v56 = vadd.s32 %v8918_v31, %v8916_v24 }
 0x333   : > { %v8967_v55 = vsel %vm6081_vm5, 0, %v6080_v62  ;;  %v2954_v39 = vadd.s32 1, %v8976_v8  ;;  %v3116_v12 = vand.u32 31, %v3114_v3  ;;  %v2881_v6 = vsel %vm8985_vm11, %v8093_v23, %v2878_v14 }
 0x334   : > { %v3075_v26 = vsub.s32 4294967266, %v8967_v55  ;;  %v2951_v59 = vmul.u32 %v2944_v33, %v2935_v60  ;;  %v3109_v49 = vand.u32 8388607, %v3102_v43  ;;  %v3071_v24 = vsub.s32 32, %v8967_v55 }
 0x335   : > { %v2955_v42 = vsel %vm2953_vm0, %v2954_v39, %v8976_v8  ;;  %v3117_v53 = vsub.s32 32, %v3116_v12  ;;  %v3119_v37 = vshll.u32 %v6700_v57, %v3116_v12  ;;  %v3122_v18 = vshll.u32 %v6701_v61, %v3116_v12 }
 0x336   : > { %v3076_v50 = vadd.s32 127, %v3075_v26  ;;  %v2956_v31 = vadd.s32 %v2955_v42, %v2951_v59  ;;  %v9004_v19 = vshrl.u32 %v3114_v3, 5  ;;  %v3128_v29 = vshll.u32 %v6703_v2, %v3116_v12 }
 0x337   : > { %v3120_v41 = vshrl.u32 %v6701_v61, %v3117_v53  ;;  %v3123_v45 = vshrl.u32 %v6702_v63, %v3117_v53  ;;  %v3125_v62 = vshll.u32 %v6702_v63, %v3116_v12  ;;  %v3126_v15 = vshrl.u32 %v6703_v2, %v3117_v53 }
 0x338   : > { %6542 = vcosq.f32 %v2881_v6  ;;  %v3077_v27 = vshll.u32 %v3076_v50, 23  ;;  %v2957_v47 = vadd.s32 536870912, %v2956_v31  ;;  %v3129_v7 = vshrl.u32 %v6704_v4, %v3117_v53 }
 0x339   : > { %v3121_v13 = vor.u32 %v3120_v41, %v3119_v37  ;;  %v3124_v10 = vor.u32 %v3123_v45, %v3122_v18  ;;  %v3131_v52 = vshll.u32 %v6704_v4, %v3116_v12  ;;  %v3132_v48 = vshrl.u32 %v6705_v11, %v3117_v53 }
 0x33a   : > { %6544 = vsinq.f32 %v2881_v6  ;;  %v9014_v32 = vshrl.u32 %v2957_v47, 30  ;;  %v3130_v33 = vor.u32 %v3129_v7, %v3128_v29  ;;  %vm3134_vm8 = vcmp.lt.s32.totalorder %v9004_v19, 1 }
 0x33b   : > { %v2882_v46 = vsel %vm8985_vm11, 0, %v2880_v21  ;;  %v3073_v35 = vshrl.u32 %v3055_v56, %v3071_v24  ;;  %v3110_v36 = vor.u32 8388608, %v3109_v49  ;;  %v3127_v17 = vor.u32 %v3126_v15, %v3125_v62 }
 0x33c   : > { %v3078_v9 = vor.u32 4788187, %v3077_v27  ;;  %v2959_v34 = vshll.u32 %v9014_v32, 30  ;;  %vm3136_vm3 = vcmp.lt.s32.totalorder %v9004_v19, 3  ;;  %vm3137_vm10 = vcmp.lt.s32.totalorder %v9004_v19, 4 }
 0x33d   : > { %v3072_v30 = vshll.u32 %v8945_v0, %v8967_v55  ;;  %v3133_v28 = vor.u32 %v3132_v48, %v3131_v52  ;;  %vm3135_vm12 = vcmp.lt.s32.totalorder %v9004_v19, 2  ;;  %v3142_v8 = vsel %vm3134_vm8, %v3121_v13, %v3124_v10 }
 0x33e   : > { %v9027_v26 = vsub.s32 %v2956_v31, %v2959_v34  ;;  %v3143_v14 = vsel %vm3137_vm10, %v3130_v33, 920167782  ;;  %v5065_v60 = vadd.s32 3, %v2882_v46  ;;  %v9033_v21 = vshll.u32 %v3110_v36, 8 }
 0x33f   : > { %v3074_v38 = vor.u32 %v3073_v35, %v3072_v30  ;;  %v3144_v3 = vsel %vm3136_vm3, %v3127_v17, %v3143_v14  ;;  %v3079_v56 = vand.u32 2147483647, %v3078_v9  ;;  %v3118_v55 = vshrl.u32 %v6700_v57, %v3117_v53 }
 0x340   : > { %v2962_v0 = vsub.s32 0, %v9027_v26  ;;  %v3145_v39 = vsel %vm3135_vm12, %v3142_v8, %v3144_v3  ;;  %v3146_v12 = vsel %vm3134_vm8, %v3124_v10, %v3127_v17  ;;  %v3147_v6 = vsel %vm3137_vm10, %v3133_v28, 1326507024 }
 0x341   : > { %v9044_v50 = vmul.u32.u64.low %v9033_v21, %v3145_v39  ;;  %v9045_v59 = vmul.u32.u64.high %v9033_v21, %v3145_v39, %v9044_v50  ;;  %v3139_v53 = vsel %vm3137_vm10, %v3127_v17, 2102212464  ;;  %v2886_v37 = vand.u32 3, %v2882_v46 }
 0x342   : > { %v6543_v49 = vpop.eup %6542  ;;  %v6075_v42 = vmin.u32 %v2962_v0, %v9027_v26  ;;  %v3081_v18 = vcvt.s32.f32 %v3074_v38  ;;  %v3148_v24 = vsel %vm3136_vm3, %v3130_v33, %v3147_v6  ;;  %v3208_v31 = vand.u32 2139095040, %v8564_v44 }
 0x343   : > { %v5066_v41 = vand.u32 3, %v5065_v60  ;;  %v3149_v62 = vsel %vm3135_vm12, %v3146_v12, %v3148_v24  ;;  %v2892_v15 = vxor.u32 2147483648, %v6543_v49  ;;  %vm3001_vm15 = vcmp.lt.s32.totalorder %v8175_v1, 0 }
 0x344   : > { %v6545_v29 = vpop.eup %6544  ;;  %v2964_v45 = vclz %v6075_v42  ;;  %v3082_v27 = vmul.f32 %v3081_v18, %v3079_v56  ;;  %v3138_v47 = vsel %vm3134_vm8, %v3118_v55, %v3121_v13  ;;  %v3140_v7 = vsel %vm3136_vm3, %v3124_v10, %v3139_v53 }
 0x345   : > { %vm2898_vm4 = vcmp.lt.s32.totalorder %v8303_v5, 0  ;;  %v9063_v48 = vmul.u32.u64.low %v9033_v21, %v3149_v62  ;;  %v9064_v33 = vmul.u32.u64.high %v9033_v21, %v3149_v62, %v9063_v48  ;;  %v3209_v46 = vshrl.u32 %v3208_v31, 23 }
 0x346   : > { %v6076_v52 = vadd.s32 4294967294, %v2964_v45  ;;  %vm2887_vm1 = vcmp.lt.s32.totalorder %v2886_v37, 2  ;;  %vm2888_vm14 = vcmp.eq.s32.totalorder %v2886_v37, 0  ;;  %v2889_v35 = vxor.u32 2147483648, %v6545_v29 }
 0x347   : > { %vm2891_vm2 = vcmp.eq.s32.totalorder %v2886_v37, 2  ;;  %vm5067_vm5 = vcmp.lt.s32.totalorder %v5066_v41, 2  ;;  %vm5068_vm6 = vcmp.eq.s32.totalorder %v5066_v41, 0  ;;  %vm5071_vm13 = vcmp.eq.s32.totalorder %v5066_v41, 2 }
 0x348   : > { %vm9068_vm7 = vcmp.le.f32.partialorder %v2999_v51, 0.7853982  ;;  %v3085_v10 = vsub.s32 4, %v8939_v22  ;;  %vm6077_vm11 = vcmp.lt.s32.totalorder %v6076_v52, 0  ;;  %vm2885_vm0 = vweird.f32 %v8093_v23 }
 0x349   : > { %v2967_v36 = vsel %vm6077_vm11, 0, %v6076_v52  ;;  %v3141_v17 = vsel %vm3135_vm12, %v3138_v47, %v3140_v7  ;;  %v3160_v9 = vadd.s32 1, %v9045_v59  ;;  %v6086_v34 = vadd.s32 4294967169, %v3209_v46 }
 0x34a   : > { %v2893_v30 = vsel %vm2891_vm2, %v2892_v15, %v6545_v29  ;;  %v3083_v28 = vxor.u32 2147483648, %v3082_v27  ;;  %v2952_v51 = vadd.s32 %v8975_v20, %v8970_v58  ;;  %v2968_v8 = vsub.s32 32, %v2967_v36 }
 0x34b   : > { %v2890_v14 = vsel %vm2888_vm14, %v6543_v49, %v2889_v35  ;;  %v5073_v60 = vsel %vm5071_vm13, %v2892_v15, %v6545_v29  ;;  %v2972_v38 = vsub.s32 4294967266, %v2967_v36  ;;  %v2982_v3 = vsub.s32 4, %v9014_v32 }
 0x34c   : > { %v5070_v56 = vsel %vm5068_vm6, %v6543_v49, %v2889_v35  ;;  %v2970_v0 = vshrl.u32 %v2952_v51, %v2968_v8  ;;  %v3157_v19 = vmul.u32 %v9033_v21, %v3141_v17  ;;  %vm3159_vm8 = vc.u32 %v9064_v33, %v9044_v50 }
 0x34d   : > { %v2969_v55 = vshll.u32 %v9027_v26, %v2967_v36  ;;  %v2973_v39 = vadd.s32 127, %v2972_v38  ;;  %v3161_v58 = vsel %vm3159_vm8, %v3160_v9, %v9045_v59  ;;  %v3215_v20 = vadd.s32 1, %v6086_v34 }
 0x34e   : > { %v2894_v12 = vsel %vm2887_vm1, %v2890_v14, %v2893_v30  ;;  %v3084_v6 = vsel %vm3001_vm15, %v3083_v28, %v3082_v27  ;;  %v3162_v42 = vadd.s32 %v3161_v58, %v3157_v19  ;;  %v3205_v49 = vand.u32 2147483647, %v8564_v44 }
 0x34f   : > { %v2971_v53 = vor.u32 %v2970_v0, %v2969_v55  ;;  %v2974_v18 = vshll.u32 %v2973_v39, 23  ;;  %v2983_v21 = vsel %vm2898_vm4, %v2982_v3, %v9014_v32  ;;  %vm3216_vm3 = vcmp.gt.s32.totalorder %v3215_v20, 0 }
 0x350   : > { %v3086_v26 = vsel %vm3001_vm15, %v3085_v10, %v8939_v22  ;;  %vm9099_vm10 = vcmp.le.f32.partialorder %v2896_v25, 0.7853982  ;;  %v3163_v37 = vadd.s32 536870912, %v3162_v42  ;;  %v3217_v24 = vsel %vm3216_vm3, %v3215_v20, 0 }
 0x351   : > { %v5074_v31 = vsel %vm5067_vm5, %v5070_v56, %v5073_v60  ;;  %v3087_v29 = vsel %vm9068_vm7, %v8175_v1, %v3084_v6  ;;  %v2975_v32 = vor.u32 4788187, %v2974_v18  ;;  %v3219_v45 = vand.u32 31, %v3217_v24 }
 0x352   : > { %v2895_v62 = vsel %vm2885_vm0, nan, %v2894_v12  ;;  %v2985_v22 = vsel %vm9099_vm10, 0, %v2983_v21  ;;  %v9111_v25 = vshrl.u32 %v3163_v37, 30  ;;  %v3212_v15 = vand.u32 8388607, %v3205_v49 }
 0x353   : > { %v5644_v41 = vrot.slane %v8093_v23, %v7102_v54  ;;  %v2976_v27 = vand.u32 2147483647, %v2975_v32  ;;  %v2978_v47 = vcvt.s32.f32 %v2971_v53  ;;  %v3220_v7 = vsub.s32 32, %v3219_v45 }
 0x354   : > { %v5075_v52 = vsel %vm2885_vm0, nan, %v5074_v31  ;;  %v9121_v48 = vsel %vm9068_vm7, 0, %v3086_v26  ;;  %6546 = vcosq.f32 %v3087_v29  ;;  %v3165_v46 = vshll.u32 %v9111_v25, 30 }
 0x355   : > { %v5529_v35 = vrot.slane %v2895_v62, 1  ;;  %6548 = vsinq.f32 %v3087_v29  ;;  %v2979_v10 = vmul.f32 %v2978_v47, %v2976_v27  ;;  %v5169_v36 = vadd.s32 3, %v2985_v22 }
 0x356   : > { %v9124_v17 = vsub.s32 %v3162_v42, %v3165_v46  ;;  %v3213_v9 = vor.u32 8388608, %v3212_v15  ;;  %v3223_v34 = vshrl.u32 %v6701_v61, %v3220_v7  ;;  %v3226_v30 = vshrl.u32 %v6702_v63, %v3220_v7 }
 0x357   : > { %v2980_v28 = vxor.u32 2147483648, %v2979_v10  ;;  %v3218_v51 = vshrl.u32 %v3217_v24, 5  ;;  %v3229_v13 = vshrl.u32 %v6703_v2, %v3220_v7  ;;  %v3232_v8 = vshrl.u32 %v6704_v4, %v3220_v7 }
 0x358   : > { %v3168_v14 = vsub.s32 0, %v9124_v17  ;;  %v3222_v60 = vshll.u32 %v6700_v57, %v3219_v45  ;;  %v3225_v38 = vshll.u32 %v6701_v61, %v3219_v45  ;;  %v3228_v3 = vshll.u32 %v6702_v63, %v3219_v45 }
 0x359   : > { %v2981_v56 = vsel %vm2898_vm4, %v2980_v28, %v2979_v10  ;;  %v3231_v0 = vshll.u32 %v6703_v2, %v3219_v45  ;;  %v3234_v19 = vshll.u32 %v6704_v4, %v3219_v45  ;;  %v3235_v55 = vshrl.u32 %v6705_v11, %v3220_v7 }
 0x35a   : > { %v2984_v39 = vsel %vm9099_vm10, %v8303_v5, %v2981_v56  ;;  %v6083_v58 = vmin.u32 %v3168_v14, %v9124_v17  ;;  %v3224_v20 = vor.u32 %v3223_v34, %v3222_v60  ;;  %v3227_v12 = vor.u32 %v3226_v30, %v3225_v38 }
 0x35b   : > { %6550 = vcosq.f32 %v2984_v39  ;;  %v3230_v61 = vor.u32 %v3229_v13, %v3228_v3  ;;  %v3233_v63 = vor.u32 %v3232_v8, %v3231_v0  ;;  %v3236_v6 = vor.u32 %v3235_v55, %v3234_v19 }
 0x35c   : > { %v9144_v42 = vsel %vm5555_vm9, %v5529_v35, %v5075_v52  ;;  %6552 = vsinq.f32 %v2984_v39  ;;  %v2989_v2 = vand.u32 3, %v2985_v22  ;;  %v3170_v4 = vclz %v6083_v58 }
 0x35d   : > { %v5170_v53 = vand.u32 3, %v5169_v36  ;;  %v3221_v11 = vshrl.u32 %v6700_v57, %v3220_v7  ;;  %vm3237_vm12 = vcmp.lt.s32.totalorder %v3218_v51, 1  ;;  %v3253_v18 = vshll.u32 %v3213_v9, 8 }
 0x35e   : > { %v9147_v21 = vpop.eup %6546  ;;  %v6084_v26 = vadd.s32 4294967294, %v3170_v4  ;;  %vm3239_vm15 = vcmp.lt.s32.totalorder %v3218_v51, 3  ;;  %vm3240_vm4 = vcmp.lt.s32.totalorder %v3218_v51, 4  ;;  %v3245_v59 = vsel %vm3237_vm12, %v3224_v20, %v3227_v12 }
 0x35f   : > { %v9150_v37 = vpop.eup %6548  ;;  %v3242_v24 = vsel %vm3240_vm4, %v3230_v61, 2102212464  ;;  %v3246_v31 = vsel %vm3240_vm4, %v3233_v63, 920167782  ;;  %v3249_v29 = vsel %vm3237_vm12, %v3227_v12, %v3230_v61  ;;  %v3250_v32 = vsel %vm3240_vm4, %v3236_v6, 1326507024 }
 0x360   : > { %vm6085_vm1 = vcmp.lt.s32.totalorder %v6084_v26, 0  ;;  %vm3238_vm14 = vcmp.lt.s32.totalorder %v3218_v51, 2  ;;  %v3247_v57 = vsel %vm3239_vm15, %v3230_v61, %v3246_v31  ;;  %v3251_v45 = vsel %vm3239_vm15, %v3233_v63, %v3250_v32 }
 0x361   : > { %v3158_v62 = vadd.s32 %v9044_v50, %v9064_v33  ;;  %v3173_v22 = vsel %vm6085_vm1, 0, %v6084_v26  ;;  %v3248_v15 = vsel %vm3238_vm14, %v3245_v59, %v3247_v57  ;;  %v3252_v27 = vsel %vm3238_vm14, %v3249_v29, %v3251_v45 }
 0x362   : > { %vm2988_vm2 = vweird.f32 %v8303_v5  ;;  %v3174_v47 = vsub.s32 32, %v3173_v22  ;;  %v3178_v7 = vsub.s32 4294967266, %v3173_v22  ;;  %v3241_v52 = vsel %vm3237_vm12, %v3221_v11, %v3224_v20 }
 0x363   : > { %v3243_v46 = vsel %vm3239_vm15, %v3227_v12, %v3242_v24  ;;  %v9162_v35 = vmul.u32.u64.low %v3253_v18, %v3252_v27  ;;  %v9163_v10 = vmul.u32.u64.high %v3253_v18, %v3252_v27, %v9162_v35  ;;  %vm2990_vm5 = vcmp.lt.s32.totalorder %v2989_v2, 2 }
 0x364   : > { %v9165_v36 = vmul.u32.u64.low %v3253_v18, %v3248_v15  ;;  %v9166_v9 = vmul.u32.u64.high %v3253_v18, %v3248_v15, %v9165_v36  ;;  %v3175_v50 = vshll.u32 %v9124_v17, %v3173_v22  ;;  %v3176_v33 = vshrl.u32 %v3158_v62, %v3174_v47 }
 0x365   : > { %v3179_v34 = vadd.s32 127, %v3178_v7  ;;  %v6551_v30 = vpop.eup %6550  ;;  %vm2991_vm6 = vcmp.eq.s32.totalorder %v2989_v2, 0  ;;  %vm2994_vm13 = vcmp.eq.s32.totalorder %v2989_v2, 2  ;;  %vm5171_vm7 = vcmp.lt.s32.totalorder %v5170_v53, 2 }
 0x366   : > { %v3244_v28 = vsel %vm3238_vm14, %v3241_v52, %v3243_v46  ;;  %v6553_v13 = vpop.eup %6552  ;;  %v2995_v8 = vxor.u32 2147483648, %v6551_v30  ;;  %vm5172_vm11 = vcmp.eq.s32.totalorder %v5170_v53, 0  ;;  %v3177_v14 = vor.u32 %v3176_v33, %v3175_v50 }
 0x367   : > { %v3180_v60 = vshll.u32 %v3179_v34, 23  ;;  %v2992_v38 = vxor.u32 2147483648, %v6553_v13  ;;  %vm5175_vm0 = vcmp.eq.s32.totalorder %v5170_v53, 2  ;;  %vm3262_vm8 = vc.u32 %v9163_v10, %v9165_v36 }
 0x368   : > { %v3263_v17 = vadd.s32 1, %v9166_v9  ;;  %v2996_v3 = vsel %vm2994_vm13, %v2995_v8, %v6553_v13  ;;  %v5177_v56 = vsel %vm5175_vm0, %v2995_v8, %v6553_v13  ;;  %v3260_v19 = vmul.u32 %v3253_v18, %v3244_v28 }
 0x369   : > { %v3181_v0 = vor.u32 4788187, %v3180_v60  ;;  %v2993_v55 = vsel %vm2991_vm6, %v6551_v30, %v2992_v38  ;;  %v5174_v51 = vsel %vm5172_vm11, %v6551_v30, %v2992_v38  ;;  %v3184_v39 = vcvt.s32.f32 %v3177_v14 }
 0x36a   : > { %v3264_v58 = vsel %vm3262_vm8, %v3263_v17, %v9166_v9  ;;  %v2997_v20 = vsel %vm2990_vm5, %v2993_v55, %v2996_v3  ;;  %v5178_v12 = vsel %vm5171_vm7, %v5174_v51, %v5177_v56  ;;  %v3092_v6 = vand.u32 3, %v9121_v48 }
 0x36b   : > { %v3182_v61 = vand.u32 2147483647, %v3181_v0  ;;  %v3265_v63 = vadd.s32 %v3264_v58, %v3260_v19  ;;  %v2998_v4 = vsel %vm2988_vm2, nan, %v2997_v20  ;;  %v5648_v11 = vrot.slane %v8303_v5, %v7102_v54 }
 0x36c   : > { %v3188_v18 = vsub.s32 4, %v9111_v25  ;;  %v5273_v26 = vadd.s32 3, %v9121_v48  ;;  %v5530_v59 = vrot.slane %v2998_v4, 1  ;;  %v9189_v53 = vmul.f32 %v5644_v41, %v9144_v42 }
 0x36d   : > { %v3185_v24 = vmul.f32 %v3184_v39, %v3182_v61  ;;  %v3266_v2 = vadd.s32 536870912, %v3265_v63  ;;  %v3098_v31 = vxor.u32 2147483648, %v9147_v21  ;;  %v5179_v29 = vsel %vm2988_vm2, nan, %v5178_v12 }
 0x36e   : > { %vm3104_vm3 = vcmp.lt.s32.totalorder %v8443_v16, 0  ;;  %v3095_v32 = vxor.u32 2147483648, %v9150_v37  ;;  %v5573_v48 = vsel %vm5555_vm9, %v5530_v59, %v5179_v29  ;;  %vm3103_vm10 = vcmp.le.f32.partialorder %v3102_v43, 0.7853982 }
 0x36f   : > { %v3186_v57 = vxor.u32 2147483648, %v3185_v24  ;;  %v9197_v45 = vshrl.u32 %v3266_v2, 30  ;;  %v9199_v62 = vmul.f32 %v5648_v11, %v5573_v48  ;;  %v3189_v23 = vsel %vm3104_vm3, %v3188_v18, %v9111_v25 }
 0x370   : > { %vm3097_vm12 = vcmp.eq.s32.totalorder %v3092_v6, 2  ;;  %v5274_v41 = vand.u32 3, %v5273_v26  ;;  %vm3094_vm15 = vcmp.eq.s32.totalorder %v3092_v6, 0  ;;  %v3191_v7 = vsel %vm3103_vm10, 0, %v3189_v23 }
 0x371   : > { %v3187_v5 = vsel %vm3104_vm3, %v3186_v57, %v3185_v24  ;;  %v3268_v42 = vshll.u32 %v9197_v45, 30  ;;  %v3099_v22 = vsel %vm3097_vm12, %v3098_v31, %v9150_v37  ;;  %v5771_v15 = vcombine.low %v9189_v53, %v9199_v62 }
 0x372   : > { %v3190_v27 = vsel %vm3103_vm10, %v8443_v16, %v3187_v5  ;;  %v3096_v47 = vsel %vm3094_vm15, %v9147_v21, %v3095_v32  ;;  %vm3093_vm4 = vcmp.lt.s32.totalorder %v3092_v6, 2  ;;  %vm5276_vm1 = vcmp.eq.s32.totalorder %v5274_v41, 0 }
 0x373   : > { %6554 = vcosq.f32 %v3190_v27  ;;  %v3269_v43 = vsub.s32 %v3265_v63, %v3268_v42  ;;  %vm5279_vm14 = vcmp.eq.s32.totalorder %v5274_v41, 2  ;;  %v3100_v52 = vsel %vm3093_vm4, %v3096_v47, %v3099_v22 }
 0x374   : > { %6556 = vsinq.f32 %v3190_v27  ;;  %v5278_v46 = vsel %vm5276_vm1, %v9147_v21, %v3095_v32  ;;  %v5281_v35 = vsel %vm5279_vm14, %v3098_v31, %v9150_v37  ;;  %v5377_v9 = vadd.s32 3, %v3191_v7 }
 0x375   : > { %v3271_v25 = vsub.s32 0, %v3269_v43  ;;  %vm3091_vm2 = vweird.f32 %v8175_v1  ;;  %vm5275_vm5 = vcmp.lt.s32.totalorder %v5274_v41, 2  ;;  %v3195_v30 = vand.u32 3, %v3191_v7 }
 0x376   : > { %v3101_v33 = vsel %vm3091_vm2, nan, %v3100_v52  ;;  %v5282_v34 = vsel %vm5275_vm5, %v5278_v46, %v5281_v35  ;;  %v5378_v13 = vand.u32 3, %v5377_v9  ;;  %v3261_v56 = vadd.s32 %v9165_v36, %v9163_v10 }
 0x377   : > { %v6087_v50 = vmin.u32 %v3271_v25, %v3269_v43  ;;  %v5283_v14 = vsel %vm3091_vm2, nan, %v5282_v34  ;;  %v5531_v60 = vrot.slane %v3101_v33, 1  ;;  %vm3196_vm6 = vcmp.lt.s32.totalorder %v3195_v30, 2 }
 0x378   : > { %vm3197_vm13 = vcmp.eq.s32.totalorder %v3195_v30, 0  ;;  %vm3200_vm7 = vcmp.eq.s32.totalorder %v3195_v30, 2  ;;  %vm5379_vm0 = vcmp.lt.s32.totalorder %v5378_v13, 2  ;;  %vm5383_vm8 = vcmp.eq.s32.totalorder %v5378_v13, 2 }
 0x379   : > { %v3273_v28 = vclz %v6087_v50  ;;  %vm5380_vm3 = vcmp.eq.s32.totalorder %v5378_v13, 0  ;;  %v5574_v63 = vsel %vm5555_vm9, %v5531_v60, %v5283_v14  ;;  %vm3194_vm10 = vweird.f32 %v8443_v16 }
 0x37a   : > { %v5652_v10 = vrot.slane %v8175_v1, %v7102_v54  ;;  %v5656_v2 = vrot.slane %v8443_v16, %v7102_v54  ;;  %v5779_v1 = vrot.slane %v5771_v15, %v7164_v40  ;;  %v3291_v5 = vsub.s32 4, %v9197_v45 }
 0x37b   : > { %v6088_v8 = vadd.s32 4294967294, %v3273_v28  ;;  %vm3207_vm12 = vcmp.lt.s32.totalorder %v8564_v44, 0  ;;  %vm3206_vm15 = vcmp.le.f32.partialorder %v3205_v49, 0.7853982  ;;  %v5660_v13 = vrot.slane %v8564_v44, %v7102_v54 }
 0x37c   : > { %v5679_v59 = vmul.f32 %v5652_v10, %v5574_v63  ;;  %v3292_v47 = vsel %vm3207_vm12, %v3291_v5, %v9197_v45 }
 0x37d   : > { %v6555_v38 = vpop.eup %6554  ;;  %vm6089_vm11 = vcmp.lt.s32.totalorder %v6088_v8, 0  ;;  %v3294_v53 = vsel %vm3206_vm15, 0, %v3292_v47 }
 0x37e   : > { %v6557_v21 = vpop.eup %6556  ;;  %v3201_v37 = vxor.u32 2147483648, %v6555_v38  ;;  %v3276_v17 = vsel %vm6089_vm11, 0, %v6088_v8  ;;  %v5481_v62 = vadd.s32 3, %v3294_v53  ;;  %v3298_v15 = vand.u32 3, %v3294_v53 }
 0x37f   : > { %v3198_v3 = vxor.u32 2147483648, %v6557_v21  ;;  %v3277_v0 = vsub.s32 32, %v3276_v17  ;;  %v3281_v19 = vsub.s32 4294967266, %v3276_v17  ;;  %v3278_v39 = vshll.u32 %v3269_v43, %v3276_v17 }
 0x380   : > { %v3202_v55 = vsel %vm3200_vm7, %v3201_v37, %v6557_v21  ;;  %v5385_v51 = vsel %vm5383_vm8, %v3201_v37, %v6557_v21  ;;  %v5482_v43 = vand.u32 3, %v5481_v62  ;;  %vm3303_vm4 = vcmp.eq.s32.totalorder %v3298_v15, 2 }
 0x381   : > { %v3199_v58 = vsel %vm3197_vm13, %v6555_v38, %v3198_v3  ;;  %v5382_v20 = vsel %vm5380_vm3, %v6555_v38, %v3198_v3  ;;  %v3279_v12 = vshrl.u32 %v3261_v56, %v3277_v0  ;;  %v3282_v61 = vadd.s32 127, %v3281_v19 }
 0x382   : > { %v3203_v6 = vsel %vm3196_vm6, %v3199_v58, %v3202_v55  ;;  %v5386_v4 = vsel %vm5379_vm0, %v5382_v20, %v5385_v51  ;;  %vm5487_vm1 = vcmp.eq.s32.totalorder %v5482_v43, 2  ;;  %vm3300_vm14 = vcmp.eq.s32.totalorder %v3298_v15, 0 }
 0x383   : > { %v3204_v36 = vsel %vm3194_vm10, nan, %v3203_v6  ;;  %v3280_v11 = vor.u32 %v3279_v12, %v3278_v39  ;;  %v3283_v18 = vshll.u32 %v3282_v61, 23  ;;  %v5387_v24 = vsel %vm3194_vm10, nan, %v5386_v4 }
 0x384   : > { %v5532_v26 = vrot.slane %v3204_v36, 1  ;;  %vm5484_vm2 = vcmp.eq.s32.totalorder %v5482_v43, 0  ;;  %vm3299_vm5 = vcmp.lt.s32.totalorder %v3298_v15, 2  ;;  %vm5483_vm6 = vcmp.lt.s32.totalorder %v5482_v43, 2 }
 0x385   : > { %v3284_v31 = vor.u32 4788187, %v3283_v18  ;;  %v3287_v57 = vcvt.s32.f32 %v3280_v11  ;;  %vm3297_vm13 = vweird.f32 %v8564_v44 }
 0x386   : > { %v5575_v29 = vsel %vm5555_vm9, %v5532_v26, %v5387_v24 }
 0x387   : > { %v5680_v32 = vmul.f32 %v5656_v2, %v5575_v29  ;;  %v3285_v48 = vand.u32 2147483647, %v3284_v31 }
 0x389   : > { %v5772_v23 = vcombine.low %v5679_v59, %v5680_v32  ;;  %v3288_v41 = vmul.f32 %v3287_v57, %v3285_v48 }
 0x38b   : > { %v5786_v42 = vrot.slane %v5772_v23, %v7164_v40  ;;  %v3289_v22 = vxor.u32 2147483648, %v3288_v41 }
 0x38d   : > { %v5787_v16 = vcombine.low %v5779_v1, %v5786_v42  ;;  %v3290_v27 = vsel %vm3207_vm12, %v3289_v22, %v3288_v41 }
 0x38e   : > { %v3293_v7 = vsel %vm3206_vm15, %v8564_v44, %v3290_v27 }
 0x38f   : > { %5805 = vst [vmem:[%s7569_s23 + $0x20] sm:$0xff] %v5787_v16  ;;  %6558 = vcosq.f32 %v3293_v7 }
 0x390   : > { %6560 = vsinq.f32 %v3293_v7 }
 0x399   : > { %v6559_v40 = vpop.eup %6558 }
 0x39a   : > { %v6561_v25 = vpop.eup %6560  ;;  %v3304_v52 = vxor.u32 2147483648, %v6559_v40 }
 0x39b   : > { %v3301_v46 = vxor.u32 2147483648, %v6561_v25 }
 0x39c   : > { %v3305_v49 = vsel %vm3303_vm4, %v3304_v52, %v6561_v25  ;;  %v5489_v45 = vsel %vm5487_vm1, %v3304_v52, %v6561_v25 }
 0x39d   : > { %v3302_v35 = vsel %vm3300_vm14, %v6559_v40, %v3301_v46  ;;  %v5486_v9 = vsel %vm5484_vm2, %v6559_v40, %v3301_v46 }
 0x39e   : > { %v3306_v50 = vsel %vm3299_vm5, %v3302_v35, %v3305_v49  ;;  %v5490_v33 = vsel %vm5483_vm6, %v5486_v9, %v5489_v45 }
 0x39f   : > { %v3307_v34 = vsel %vm3297_vm13, nan, %v3306_v50  ;;  %v5491_v28 = vsel %vm3297_vm13, nan, %v5490_v33 }
 0x3a0   : > { %v5533_v30 = vrot.slane %v3307_v34, 1 }
 0x3a2   : > { %v5576_v8 = vsel %vm5555_vm9, %v5533_v30, %v5491_v28 }
 0x3a3   : > { %v5681_v14 = vmul.f32 %v5660_v13, %v5576_v8 }
 0x3a5   : > { %6174 = vst.sshfl [vmem:[%s7569_s23 + $0x28] sm:$0x3 pattern:$0x76325410] %v5681_v14 }
 0x3a6   : > { %6633 = shalt.err (!%p6630_p13)
}
 0x3a7   : > { %s6634_s24 = scalar_lea.hbm %s9246_s14, 672  ;;  %s6638_s5 = scalar_lea.hbm %s9293_s2, 1344 }
 0x3a8   : > { %p6635_p7 = scmp.ne.s32.totalorder %s9246_s14, %s6634_s24  ;;  %p6639_p1 = scmp.lt.u32.totalorder %s9246_s14, %s9293_s2 }
 0x3a9   : > { %p6640_p8 = scmp.lt.u32.totalorder %s6638_s5, %s6634_s24  ;;  %p6642_p9 = scmp.lt.u32.totalorder %s6634_s24, %s9246_s14 }
 0x3aa   : > { %p6636_p3 = pnand %p6635_p7, %p9346_p10 }
 0x3ab   : > { %p6641_p11 = por %p6640_p8, %p6639_p1 }
 0x3ac   : > { %p6637_p12 = pneg %p6636_p3 }
 0x3ad   : > { %p6643_p2 = por %p6642_p9, %p6641_p11 }
 0x3af   : > { %p6644_p4 = pnand %p6643_p2, %p6637_p12 }
 0x3b1   : > { %6647 = shalt.err (!%p6644_p4)
}
 0x3b2   : > { %6290 = dma.vmem_to_hbm [thread:$0]  (%p9346_p10), %s9248_s3, 672, %s9246_s14, %s5808_s13  }
 0x3b3 PF: > { %s5834_s29 = sand.u32 1, %s6678_s9   ;;  %p9347_p5 = scmp.ne.s32.totalorder %s9302_s22, 0 }
 0x3b4   : > { %p9348_p0 = scmp.ge.s32.totalorder %s6690_s12, 2  ;;  %s5835_s8 = scalar_lea.sflag [#allocation4], %s5834_s29 }
 0x3b6   : > { %p6301_p6 = pnand %p9348_p0, %p9347_p5 }
 0x3b8   : > { %6673 = dma.done.wait (!%p6301_p6), %s5835_s8, 672  }
 0x3b9   : > { %6675 = vsyncadd (!%p6301_p6), %s5835_s8, 4294966624  ;;  %p16_p13 = scmp.ge.s32.totalorder %s6748_s15, 4   ;;  %s9349_s9 = smov %s6682_s10 }
 0x3ba   : > { %s9350_s10 = smov %s6686_s11  ;;  %s9351_s11 = smov %s6760_s18 }
 0x3bb   : > { %s9352_s12 = smov %s6748_s15  ;;  %18 = sbr.rel (!%p16_p13) target bundleno = 6 (0x6), region = 78 }
 0x3c2   :  { %5840 = vsyncpa [#allocation3], 1 }
 0x3c3   :  { %5842 = vsyncpa [#allocation3 + $0x1], 1 }
 0x3c4   :  { %5843 = vsyncpa [#allocation6], 1 }
 0x3c5   :  { %5845 = vsyncpa [#allocation6 + $0x1], 1 }
 0x3c6   :  { %5846 = vsyncpa [#allocation4], 1 }
 0x3c7   :  { %5848 = vsyncpa [#allocation4 + $0x1], 1 }

</bundles_post_ra>
